<compile_context>
chip_gen: v6e
topology: v6e:2x2x1
jax: 0.10.0
libtpu: 0.0.40
codegen_flags: <defaults>
</compile_context>

<pallas_src>
import functools

import jax
import jax.numpy as jnp
import numpy as np
from jax.experimental import pallas as pl
from jax.experimental.pallas import tpu as pltpu

EPS = 1e-5


def _round_up(x, m):
    return -(-x // m) * m


def _vmem_capacity_bytes():
    try:
        return int(pltpu.get_tpu_info().vmem_capacity_bytes)
    except Exception:
        return 64 << 20  # conservative: v7x has 64 MiB VMEM per TensorCore


# ---------------------------------------------------------------------------
# Fast path: whole slab resident in VMEM, single grid step, 1 read + 1 write.
# ---------------------------------------------------------------------------
def _resblock_small_kernel(x_ref, w1_ref, w2_ref, g1_ref, b1_ref, g2_ref,
                           b2_ref, o_ref, y_buf, *, inv_count):
    n_batch, ch, _ = x_ref.shape
    w1 = w1_ref[...]
    w2 = w2_ref[...]

    # conv1 per batch (channels on sublanes, time on lanes), stash y1, sum.
    s1 = jnp.zeros((ch, 1), jnp.float32)
    for n in range(n_batch):
        y1 = jnp.dot(w1, x_ref[n].astype(jnp.float32),
                     preferred_element_type=jnp.float32)
        y_buf[n] = y1
        s1 = s1 + jnp.sum(y1, axis=1, keepdims=True)
    mean1 = s1 * inv_count

    # Centered second sweep: numerically matches PyTorch's BN reduction.
    v1 = jnp.zeros((ch, 1), jnp.float32)
    for n in range(n_batch):
        d = y_buf[n] - mean1
        v1 = v1 + jnp.sum(d * d, axis=1, keepdims=True)
    scale1 = g1_ref[...] * jax.lax.rsqrt(v1 * inv_count + EPS)
    shift1 = b1_ref[...] - mean1 * scale1

    # BN1 (per-channel FMA) + relu + conv2; scratch now holds y2.
    s2 = jnp.zeros((ch, 1), jnp.float32)
    for n in range(n_batch):
        h = jnp.maximum(y_buf[n] * scale1 + shift1, 0.0)
        y2 = jnp.dot(w2, h, preferred_element_type=jnp.float32)
        y_buf[n] = y2
        s2 = s2 + jnp.sum(y2, axis=1, keepdims=True)
    mean2 = s2 * inv_count

    v2 = jnp.zeros((ch, 1), jnp.float32)
    for n in range(n_batch):
        d = y_buf[n] - mean2
        v2 = v2 + jnp.sum(d * d, axis=1, keepdims=True)
    scale2 = g2_ref[...] * jax.lax.rsqrt(v2 * inv_count + EPS)
    shift2 = b2_ref[...] - mean2 * scale2

    # BN2 fused with residual add; single HBM write of the slab.
    for n in range(n_batch):
        o_ref[n] = (y_buf[n] * scale2 + shift2
                    + x_ref[n].astype(jnp.float32)).astype(o_ref.dtype)


def _resblock_small(x, w1, w2, g1, b1, g2, b2, *, vmem_cap):
    N, C, T = x.shape
    isz = x.dtype.itemsize
    slab = N * C * T * isz
    est = (4 * slab                    # x + out blocks (double-buffer slack)
           + N * C * T * 4             # f32 y scratch
           + 4 * C * C * isz           # weights (x2 buffers each)
           + 16 * C * 128 * 4          # per-channel vectors incl. lane padding
           + (2 << 20))                # slack
    vmem_limit = int(min(max(int(est * 1.25), 32 << 20), vmem_cap))

    kernel = functools.partial(_resblock_small_kernel,
                               inv_count=1.0 / float(N * T))
    full3 = lambda i: (0, 0, 0)
    full2 = lambda i: (0, 0)
    return pl.pallas_call(
        kernel,
        out_shape=jax.ShapeDtypeStruct((N, C, T), x.dtype),
        grid_spec=pltpu.PrefetchScalarGridSpec(
            num_scalar_prefetch=0,
            grid=(1,),
            in_specs=[pl.BlockSpec((N, C, T), full3),
                      pl.BlockSpec((C, C), full2),
                      pl.BlockSpec((C, C), full2),
                      pl.BlockSpec((C, 1), full2),
                      pl.BlockSpec((C, 1), full2),
                      pl.BlockSpec((C, 1), full2),
                      pl.BlockSpec((C, 1), full2)],
            out_specs=pl.BlockSpec((N, C, T), full3),
            scratch_shapes=[pltpu.VMEM((N, C, T), jnp.float32)],
        ),
        compiler_params=pltpu.CompilerParams(
            dimension_semantics=("arbitrary",),
            vmem_limit_bytes=vmem_limit,
        ),
    )(x, w1, w2, g1, b1, g2, b2)


# ---------------------------------------------------------------------------
# Tiled path: 3-pass grid (stats1 / stats2 / apply) over (pass, batch, time).
# ---------------------------------------------------------------------------
def _resblock_tiled_kernel(x_ref, w1_ref, w2_ref, g1_ref, b1_ref, g2_ref,
                           b2_ref, o_ref, *scratch, inv_count, block_t, num_t,
                           t_valid, use_cache):
    if use_cache:
        cache_ref, s1, ss1, s2, ss2 = scratch
    else:
        s1, ss1, s2, ss2 = scratch

    p = pl.program_id(0)
    n = pl.program_id(1)
    t = pl.program_id(2)
    first_tile = jnp.logical_and(n == 0, t == 0)

    if use_cache:
        idx = n * num_t + t
        # Pass 0 is the only pass that reads x from HBM; keep a VMEM copy so
        # passes 1/2 (whose x index_map is frozen) never re-fetch it.
        @pl.when(p == 0)
        def _():
            cache_ref[idx] = x_ref[...]
        x = cache_ref[idx].astype(jnp.float32)
    else:
        x = x_ref[...].astype(jnp.float32)

    # conv1 (1x1, no bias): recomputed every pass -- (C, C) weights, ~free on MXU.
    y1 = jnp.dot(w1_ref[...], x, preferred_element_type=jnp.float32)

    # ---------------- pass 0: accumulate BN1 sum / sum-of-squares --------------
    @pl.when(p == 0)
    def _():
        @pl.when(first_tile)
        def _():
            s1[...] = jnp.zeros_like(s1)
            ss1[...] = jnp.zeros_like(ss1)
        s1[...] += jnp.sum(y1, axis=1, keepdims=True)
        ss1[...] += jnp.sum(y1 * y1, axis=1, keepdims=True)

    # ------------- passes 1 & 2: BN1 (fused FMA) + relu + conv2 ----------------
    @pl.when(p > 0)
    def _():
        mean1 = s1[...] * inv_count
        # Single-pass E[x^2]-E[x]^2 (clamped); fine at f32 for conv outputs whose
        # mean is not huge relative to their std (see fast path for the centered
        # version used when everything is resident).
        var1 = jnp.maximum(ss1[...] * inv_count - mean1 * mean1, 0.0)
        scale1 = g1_ref[...] * jax.lax.rsqrt(var1 + EPS)
        shift1 = b1_ref[...] - mean1 * scale1
        h = jnp.maximum(y1 * scale1 + shift1, 0.0)
        if t_valid is not None:
            # Zero the zero-padded tail columns so they don't pollute BN2 stats.
            col = t * block_t + jax.lax.broadcasted_iota(
                jnp.int32, (1, block_t), 1)
            h = jnp.where(col < t_valid, h, 0.0)
        y2 = jnp.dot(w2_ref[...], h, preferred_element_type=jnp.float32)

        # pass 1: accumulate BN2 statistics.
        @pl.when(p == 1)
        def _():
            @pl.when(first_tile)
            def _():
                s2[...] = jnp.zeros_like(s2)
                ss2[...] = jnp.zeros_like(ss2)
            s2[...] += jnp.sum(y2, axis=1, keepdims=True)
            ss2[...] += jnp.sum(y2 * y2, axis=1, keepdims=True)

        # pass 2: BN2 fused with residual add; only pass that writes output.
        @pl.when(p == 2)
        def _():
            mean2 = s2[...] * inv_count
            var2 = jnp.maximum(ss2[...] * inv_count - mean2 * mean2, 0.0)
            scale2 = g2_ref[...] * jax.lax.rsqrt(var2 + EPS)
            shift2 = b2_ref[...] - mean2 * scale2
            o_ref[...] = (y2 * scale2 + shift2 + x).astype(o_ref.dtype)


def _pick_time_tiling(T, C, itemsize, budget):
    """MiB-scale, lane-dense (multiple of 128) time tiles from a byte budget."""
    t_ceil = _round_up(T, 128)
    target_tile_bytes = max(1 << 20, min(8 << 20, budget // 8))
    bt = max(128, (target_tile_bytes // (C * itemsize)) // 128 * 128)
    bt = min(bt, t_ceil)
    num_t = -(-t_ceil // bt)
    block_t = _round_up(-(-t_ceil // num_t), 128)   # balance tiles, pad <= ~128/tile
    num_t = -(-t_ceil // block_t)
    return block_t, num_t


def _resblock_tiled(x, w1, w2, g1, b1, g2, b2, *, vmem_cap, cache_x=None):
    N, C, T = x.shape
    isz = x.dtype.itemsize
    budget = vmem_cap * 3 // 4
    block_t, num_t = _pick_time_tiling(T, C, isz, budget)
    T_pad = block_t * num_t
    t_valid = T if T_pad != T else None
    x_in = jnp.pad(x, ((0, 0), (0, 0), (0, T_pad - T))) if T_pad != T else x

    tile_bytes = C * block_t * isz
    base_est = (4 * tile_bytes          # double-buffered x and out tiles
                + 4 * C * C * isz       # both weight matrices, double-buffered
                + 12 * C * 128 * 4      # per-channel vectors + stat scratch (lane pad)
                + (2 << 20))            # slack
    cache_bytes = N * num_t * C * block_t * isz
    if cache_x is None:
        use_cache = base_est + cache_bytes <= budget
    else:
        use_cache = bool(cache_x)
    est = base_est + (cache_bytes if use_cache else 0)
    vmem_limit = int(min(max(int(est * 1.25), 32 << 20), vmem_cap))

    # x tiles: batch dim squeezed, channels on sublanes, time on lanes.  With the
    # VMEM cache the index map is frozen after pass 0, so x is read from HBM once.
    if use_cache:
        def x_map(p, n, t):
            fetch = p == 0
            return (jnp.where(fetch, n, 0), 0, jnp.where(fetch, t, 0))
    else:
        def x_map(p, n, t):
            return (n, 0, t)
    x_spec = pl.BlockSpec((None, C, block_t), x_map)

    def out_map(p, n, t):
        # Output is only produced during pass 2; freeze the block index during
        # the statistics passes so no (garbage) writebacks are issued earlier.
        last = p == 2
        return (jnp.where(last, n, 0), 0, jnp.where(last, t, 0))

    out_spec = pl.BlockSpec((None, C, block_t), out_map)
    w_spec = pl.BlockSpec((C, C), lambda p, n, t: (0, 0))
    v_spec = pl.BlockSpec((C, 1), lambda p, n, t: (0, 0))

    scratch = []
    if use_cache:
        scratch.append(pltpu.VMEM((N * num_t, C, block_t), x.dtype))
    scratch += [pltpu.VMEM((C, 1), jnp.float32)] * 4

    kernel = functools.partial(
        _resblock_tiled_kernel,
        inv_count=1.0 / float(N * T),   # true (unpadded) element count
        block_t=block_t, num_t=num_t, t_valid=t_valid, use_cache=use_cache)

    # TODO(synk): on v7x, split BN statistics per TensorCore (core_map +
    # CORE_PARALLEL with a CMEM/barrier combine) so both cores contribute; with
    # carried stats every grid axis must stay "arbitrary", so one core runs now.
    out = pl.pallas_call(
        kernel,
        out_shape=jax.ShapeDtypeStruct((N, C, T_pad), x.dtype),
        grid_spec=pltpu.PrefetchScalarGridSpec(
            num_scalar_prefetch=0,
            grid=(3, N, num_t),                    # (pass, batch, time-tile)
            in_specs=[x_spec, w_spec, w_spec, v_spec, v_spec, v_spec, v_spec],
            out_specs=out_spec,
            scratch_shapes=scratch,
        ),
        compiler_params=pltpu.CompilerParams(
            dimension_semantics=("arbitrary", "arbitrary", "arbitrary"),
            vmem_limit_bytes=vmem_limit,
        ),
    )(x_in, w1, w2, g1, b1, g2, b2)
    return out[:, :, :T] if T_pad != T else out


# ---------------------------------------------------------------------------
# Dispatcher
# ---------------------------------------------------------------------------
def resblock_pallas(x, w1, w2, gamma1, beta1, gamma2, beta2, *,
                    force_tiled=False, cache_x=None):
    """x: (N, C, T) float (NCW, as PyTorch); w*: (C, C); gamma*/beta*: (C,)."""
    N, C, T = x.shape
    g1 = gamma1.reshape(C, 1).astype(jnp.float32)
    b1 = beta1.reshape(C, 1).astype(jnp.float32)
    g2 = gamma2.reshape(C, 1).astype(jnp.float32)
    b2 = beta2.reshape(C, 1).astype(jnp.float32)

    vmem_cap = _vmem_capacity_bytes()
    isz = x.dtype.itemsize
    fast_est = (4 * N * C * T * isz + N * C * T * 4 + 4 * C * C * isz
                + 16 * C * 128 * 4 + (2 << 20))
    if (not force_tiled) and fast_est <= vmem_cap * 3 // 4 and N <= 64:
        return _resblock_small(x, w1, w2, g1, b1, g2, b2, vmem_cap=vmem_cap)
    return _resblock_tiled(x, w1, w2, g1, b1, g2, b2,
                           vmem_cap=vmem_cap, cache_x=cache_x)


def resblock_reference(x, w1, w2, gamma1, beta1, gamma2, beta2):
    """Pure-JAX reference mirroring PyTorch training-mode forward (NCW layout)."""
    def bn(y, g, b):
        mean = jnp.mean(y, axis=(0, 2), keepdims=True)
        var = jnp.mean((y - mean) ** 2, axis=(0, 2), keepdims=True)
        return ((y - mean) / jnp.sqrt(var + EPS) * g.reshape(1, -1, 1)
                + b.reshape(1, -1, 1))

    y = jnp.einsum("oc,nct->not", w1, x)
    y = bn(y, gamma1, beta1)
    y = jnp.maximum(y, 0.0)
    y = jnp.einsum("oc,nct->not", w2, y)
    y = bn(y, gamma2, beta2)
    return y + x


if __name__ == "__main__":
    # ResBlock(dims=32): batch=2, channels=32.
    N, C = 2, 32
    key = jax.random.PRNGKey(0)
    k_x, k_w1, k_w2, k_g1, k_b1, k_g2, k_b2 = jax.random.split(key, 7)

    # Conv1d(dims, dims, kernel_size=1, bias=False) weights -> (C, C) matrices.
    w1 = jax.random.normal(k_w1, (C, C), dtype=jnp.float32) * 0.1
    w2 = jax.random.normal(k_w2, (C, C), dtype=jnp.float32) * 0.1
    # BatchNorm1d affine params (gamma, beta); randomized for a nontrivial test.
    gamma1 = 1.0 + 0.1 * jax.random.normal(k_g1, (C,), dtype=jnp.float32)
    beta1 = 0.1 * jax.random.normal(k_b1, (C,), dtype=jnp.float32)
    gamma2 = 1.0 + 0.1 * jax.random.normal(k_g2, (C,), dtype=jnp.float32)
    beta2 = 0.1 * jax.random.normal(k_b2, (C,), dtype=jnp.float32)

    def check(T, **kw):
        x = jax.random.normal(jax.random.fold_in(k_x, T), (N, C, T),
                              dtype=jnp.float32)
        out = jax.block_until_ready(
            resblock_pallas(x, w1, w2, gamma1, beta1, gamma2, beta2, **kw))
        ref = jax.block_until_ready(
            resblock_reference(x, w1, w2, gamma1, beta1, gamma2, beta2))
        np.testing.assert_allclose(np.asarray(out), np.asarray(ref),
                                   rtol=1e-4, atol=1e-4)

    check(1024)                                   # single-step fast path
    check(1024, force_tiled=True)                 # 3-pass grid + VMEM x cache
    check(1024, force_tiled=True, cache_x=False)  # 3-pass grid, x streamed 3x
    check(1000, force_tiled=True)                 # ragged T: pad + BN2 stat mask

    print("KERNEL_OK")
</pallas_src>

<mosaic_0001>
module attributes {stable_mosaic.version = 11 : i64} {
  func.func @_resblock_small_kernel(%arg0: i32, %arg1: memref<2x32x1024xf32, #tpu.memory_space<vmem>>, %arg2: memref<32x32xf32, #tpu.memory_space<vmem>>, %arg3: memref<32x32xf32, #tpu.memory_space<vmem>>, %arg4: memref<32x1xf32, #tpu.memory_space<vmem>>, %arg5: memref<32x1xf32, #tpu.memory_space<vmem>>, %arg6: memref<32x1xf32, #tpu.memory_space<vmem>>, %arg7: memref<32x1xf32, #tpu.memory_space<vmem>>, %arg8: memref<2x32x1024xf32, #tpu.memory_space<vmem>>, %arg9: memref<2x32x1024xf32, #tpu.memory_space<vmem>>) attributes {dimension_semantics = [#tpu.dimension_semantics<arbitrary>], iteration_bounds = array<i64: 1>, scalar_prefetch = 0 : i64, scratch_operands = 1 : i64, tpu.core_type = #tpu.core_type<tc>, window_params = [{pipeline_mode = #tpu.pipeline_mode<synchronous>, transform_indices = @transform_0, window_bounds = array<i64: 2, 32, 1024>}, {pipeline_mode = #tpu.pipeline_mode<synchronous>, transform_indices = @transform_1, window_bounds = array<i64: 32, 32>}, {pipeline_mode = #tpu.pipeline_mode<synchronous>, transform_indices = @transform_2, window_bounds = array<i64: 32, 32>}, {pipeline_mode = #tpu.pipeline_mode<synchronous>, transform_indices = @transform_3, window_bounds = array<i64: 32, 1>}, {pipeline_mode = #tpu.pipeline_mode<synchronous>, transform_indices = @transform_4, window_bounds = array<i64: 32, 1>}, {pipeline_mode = #tpu.pipeline_mode<synchronous>, transform_indices = @transform_5, window_bounds = array<i64: 32, 1>}, {pipeline_mode = #tpu.pipeline_mode<synchronous>, transform_indices = @transform_6, window_bounds = array<i64: 32, 1>}, {pipeline_mode = #tpu.pipeline_mode<synchronous>, transform_indices = @transform_7, window_bounds = array<i64: 2, 32, 1024>}]} {
    %c0 = arith.constant 0 : index
    %c0_0 = arith.constant 0 : index
    %0 = vector.load %arg2[%c0, %c0_0] : memref<32x32xf32, #tpu.memory_space<vmem>>, vector<32x32xf32>
    %c0_1 = arith.constant 0 : index
    %c0_2 = arith.constant 0 : index
    %1 = vector.load %arg3[%c0_1, %c0_2] : memref<32x32xf32, #tpu.memory_space<vmem>>, vector<32x32xf32>
    %cst = arith.constant 0.000000e+00 : f32
    %2 = vector.broadcast %cst : f32 to vector<32x1xf32>
    %c0_3 = arith.constant 0 : index
    %c0_4 = arith.constant 0 : index
    %c0_5 = arith.constant 0 : index
    %3 = vector.load %arg1[%c0_3, %c0_4, %c0_5] : memref<2x32x1024xf32, #tpu.memory_space<vmem>>, vector<1x32x1024xf32>
    %4 = vector.shape_cast %3 : vector<1x32x1024xf32> to vector<32x1024xf32>
    %cst_6 = arith.constant dense<0.000000e+00> : vector<32x1024xf32>
    %5 = tpu.matmul %0, %4, %cst_6 {dimension_numbers = #tpu.dot_dimension_numbers<[1], [0], [0], [1], [0, 0, 1, 1], [], []>} : vector<32x32xf32>, vector<32x1024xf32>, vector<32x1024xf32> -> vector<32x1024xf32>
    %c0_7 = arith.constant 0 : index
    %c0_8 = arith.constant 0 : index
    %c0_9 = arith.constant 0 : index
    %6 = vector.load %arg9[%c0_7, %c0_8, %c0_9] : memref<2x32x1024xf32, #tpu.memory_space<vmem>>, vector<1x32x1024xf32>
    %7 = vector.shape_cast %6 : vector<1x32x1024xf32> to vector<32x1024xf32>
    %8 = vector.shape_cast %5 : vector<32x1024xf32> to vector<1x32x1024xf32>
    tpu.vector_store %arg9[%c0_7, %c0_8, %c0_9], %8 {strides = array<i32>} : memref<2x32x1024xf32, #tpu.memory_space<vmem>>, vector<1x32x1024xf32>,
    %cst_10 = arith.constant dense<0.000000e+00> : vector<32xf32>
    %9 = vector.multi_reduction <add>, %5, %cst_10 [1] : vector<32x1024xf32> to vector<32xf32>
    %10 = vector.shape_cast %9 : vector<32xf32> to vector<32x1xf32>
    %11 = arith.addf %2, %10 : vector<32x1xf32>
    %c1 = arith.constant 1 : index
    %c0_11 = arith.constant 0 : index
    %c0_12 = arith.constant 0 : index
    %12 = vector.load %arg1[%c1, %c0_11, %c0_12] : memref<2x32x1024xf32, #tpu.memory_space<vmem>>, vector<1x32x1024xf32>
    %13 = vector.shape_cast %12 : vector<1x32x1024xf32> to vector<32x1024xf32>
    %cst_13 = arith.constant dense<0.000000e+00> : vector<32x1024xf32>
    %14 = tpu.matmul %0, %13, %cst_13 {dimension_numbers = #tpu.dot_dimension_numbers<[1], [0], [0], [1], [0, 0, 1, 1], [], []>} : vector<32x32xf32>, vector<32x1024xf32>, vector<32x1024xf32> -> vector<32x1024xf32>
    %c1_14 = arith.constant 1 : index
    %c0_15 = arith.constant 0 : index
    %c0_16 = arith.constant 0 : index
    %15 = vector.load %arg9[%c1_14, %c0_15, %c0_16] : memref<2x32x1024xf32, #tpu.memory_space<vmem>>, vector<1x32x1024xf32>
    %16 = vector.shape_cast %15 : vector<1x32x1024xf32> to vector<32x1024xf32>
    %17 = vector.shape_cast %14 : vector<32x1024xf32> to vector<1x32x1024xf32>
    tpu.vector_store %arg9[%c1_14, %c0_15, %c0_16], %17 {strides = array<i32>} : memref<2x32x1024xf32, #tpu.memory_space<vmem>>, vector<1x32x1024xf32>,
    %cst_17 = arith.constant dense<0.000000e+00> : vector<32xf32>
    %18 = vector.multi_reduction <add>, %14, %cst_17 [1] : vector<32x1024xf32> to vector<32xf32>
    %19 = vector.shape_cast %18 : vector<32xf32> to vector<32x1xf32>
    %20 = arith.addf %11, %19 : vector<32x1xf32>
    %cst_18 = arith.constant 4.8828125E-4 : f32
    %21 = vector.broadcast %cst_18 : f32 to vector<32x1xf32>
    %22 = arith.mulf %20, %21 : vector<32x1xf32>
    %cst_19 = arith.constant 0.000000e+00 : f32
    %23 = vector.broadcast %cst_19 : f32 to vector<32x1xf32>
    %c0_20 = arith.constant 0 : index
    %c0_21 = arith.constant 0 : index
    %c0_22 = arith.constant 0 : index
    %24 = vector.load %arg9[%c0_20, %c0_21, %c0_22] : memref<2x32x1024xf32, #tpu.memory_space<vmem>>, vector<1x32x1024xf32>
    %25 = vector.shape_cast %24 : vector<1x32x1024xf32> to vector<32x1024xf32>
    %26 = vector.broadcast %22 : vector<32x1xf32> to vector<32x1024xf32>
    %27 = arith.subf %25, %26 : vector<32x1024xf32>
    %28 = arith.mulf %27, %27 : vector<32x1024xf32>
    %cst_23 = arith.constant dense<0.000000e+00> : vector<32xf32>
    %29 = vector.multi_reduction <add>, %28, %cst_23 [1] : vector<32x1024xf32> to vector<32xf32>
    %30 = vector.shape_cast %29 : vector<32xf32> to vector<32x1xf32>
    %31 = arith.addf %23, %30 : vector<32x1xf32>
    %c1_24 = arith.constant 1 : index
    %c0_25 = arith.constant 0 : index
    %c0_26 = arith.constant 0 : index
    %32 = vector.load %arg9[%c1_24, %c0_25, %c0_26] : memref<2x32x1024xf32, #tpu.memory_space<vmem>>, vector<1x32x1024xf32>
    %33 = vector.shape_cast %32 : vector<1x32x1024xf32> to vector<32x1024xf32>
    %34 = vector.broadcast %22 : vector<32x1xf32> to vector<32x1024xf32>
    %35 = arith.subf %33, %34 : vector<32x1024xf32>
    %36 = arith.mulf %35, %35 : vector<32x1024xf32>
    %cst_27 = arith.constant dense<0.000000e+00> : vector<32xf32>
    %37 = vector.multi_reduction <add>, %36, %cst_27 [1] : vector<32x1024xf32> to vector<32xf32>
    %38 = vector.shape_cast %37 : vector<32xf32> to vector<32x1xf32>
    %39 = arith.addf %31, %38 : vector<32x1xf32>
    %c0_28 = arith.constant 0 : index
    %c0_29 = arith.constant 0 : index
    %40 = vector.load %arg4[%c0_28, %c0_29] : memref<32x1xf32, #tpu.memory_space<vmem>>, vector<32x1xf32>
    %cst_30 = arith.constant 4.8828125E-4 : f32
    %41 = vector.broadcast %cst_30 : f32 to vector<32x1xf32>
    %42 = arith.mulf %39, %41 : vector<32x1xf32>
    %cst_31 = arith.constant 9.99999974E-6 : f32
    %43 = vector.broadcast %cst_31 : f32 to vector<32x1xf32>
    %44 = arith.addf %42, %43 : vector<32x1xf32>
    %45 = math.rsqrt %44 : vector<32x1xf32>
    %46 = arith.mulf %40, %45 : vector<32x1xf32>
    %c0_32 = arith.constant 0 : index
    %c0_33 = arith.constant 0 : index
    %47 = vector.load %arg5[%c0_32, %c0_33] : memref<32x1xf32, #tpu.memory_space<vmem>>, vector<32x1xf32>
    %48 = arith.mulf %22, %46 : vector<32x1xf32>
    %49 = arith.subf %47, %48 : vector<32x1xf32>
    %cst_34 = arith.constant 0.000000e+00 : f32
    %50 = vector.broadcast %cst_34 : f32 to vector<32x1xf32>
    %c0_35 = arith.constant 0 : index
    %c0_36 = arith.constant 0 : index
    %c0_37 = arith.constant 0 : index
    %51 = vector.load %arg9[%c0_35, %c0_36, %c0_37] : memref<2x32x1024xf32, #tpu.memory_space<vmem>>, vector<1x32x1024xf32>
    %52 = vector.shape_cast %51 : vector<1x32x1024xf32> to vector<32x1024xf32>
    %53 = vector.broadcast %46 : vector<32x1xf32> to vector<32x1024xf32>
    %54 = arith.mulf %52, %53 : vector<32x1024xf32>
    %55 = vector.broadcast %49 : vector<32x1xf32> to vector<32x1024xf32>
    %56 = arith.addf %54, %55 : vector<32x1024xf32>
    %cst_38 = arith.constant 0.000000e+00 : f32
    %57 = vector.broadcast %cst_38 : f32 to vector<32x1024xf32>
    %58 = arith.maximumf %56, %57 : vector<32x1024xf32>
    %cst_39 = arith.constant dense<0.000000e+00> : vector<32x1024xf32>
    %59 = tpu.matmul %1, %58, %cst_39 {dimension_numbers = #tpu.dot_dimension_numbers<[1], [0], [0], [1], [0, 0, 1, 1], [], []>} : vector<32x32xf32>, vector<32x1024xf32>, vector<32x1024xf32> -> vector<32x1024xf32>
    %c0_40 = arith.constant 0 : index
    %c0_41 = arith.constant 0 : index
    %c0_42 = arith.constant 0 : index
    %60 = vector.load %arg9[%c0_40, %c0_41, %c0_42] : memref<2x32x1024xf32, #tpu.memory_space<vmem>>, vector<1x32x1024xf32>
    %61 = vector.shape_cast %60 : vector<1x32x1024xf32> to vector<32x1024xf32>
    %62 = vector.shape_cast %59 : vector<32x1024xf32> to vector<1x32x1024xf32>
    tpu.vector_store %arg9[%c0_40, %c0_41, %c0_42], %62 {strides = array<i32>} : memref<2x32x1024xf32, #tpu.memory_space<vmem>>, vector<1x32x1024xf32>,
    %cst_43 = arith.constant dense<0.000000e+00> : vector<32xf32>
    %63 = vector.multi_reduction <add>, %59, %cst_43 [1] : vector<32x1024xf32> to vector<32xf32>
    %64 = vector.shape_cast %63 : vector<32xf32> to vector<32x1xf32>
    %65 = arith.addf %50, %64 : vector<32x1xf32>
    %c1_44 = arith.constant 1 : index
    %c0_45 = arith.constant 0 : index
    %c0_46 = arith.constant 0 : index
    %66 = vector.load %arg9[%c1_44, %c0_45, %c0_46] : memref<2x32x1024xf32, #tpu.memory_space<vmem>>, vector<1x32x1024xf32>
    %67 = vector.shape_cast %66 : vector<1x32x1024xf32> to vector<32x1024xf32>
    %68 = vector.broadcast %46 : vector<32x1xf32> to vector<32x1024xf32>
    %69 = arith.mulf %67, %68 : vector<32x1024xf32>
    %70 = vector.broadcast %49 : vector<32x1xf32> to vector<32x1024xf32>
    %71 = arith.addf %69, %70 : vector<32x1024xf32>
    %cst_47 = arith.constant 0.000000e+00 : f32
    %72 = vector.broadcast %cst_47 : f32 to vector<32x1024xf32>
    %73 = arith.maximumf %71, %72 : vector<32x1024xf32>
    %cst_48 = arith.constant dense<0.000000e+00> : vector<32x1024xf32>
    %74 = tpu.matmul %1, %73, %cst_48 {dimension_numbers = #tpu.dot_dimension_numbers<[1], [0], [0], [1], [0, 0, 1, 1], [], []>} : vector<32x32xf32>, vector<32x1024xf32>, vector<32x1024xf32> -> vector<32x1024xf32>
    %c1_49 = arith.constant 1 : index
    %c0_50 = arith.constant 0 : index
    %c0_51 = arith.constant 0 : index
    %75 = vector.load %arg9[%c1_49, %c0_50, %c0_51] : memref<2x32x1024xf32, #tpu.memory_space<vmem>>, vector<1x32x1024xf32>
    %76 = vector.shape_cast %75 : vector<1x32x1024xf32> to vector<32x1024xf32>
    %77 = vector.shape_cast %74 : vector<32x1024xf32> to vector<1x32x1024xf32>
    tpu.vector_store %arg9[%c1_49, %c0_50, %c0_51], %77 {strides = array<i32>} : memref<2x32x1024xf32, #tpu.memory_space<vmem>>, vector<1x32x1024xf32>,
    %cst_52 = arith.constant dense<0.000000e+00> : vector<32xf32>
    %78 = vector.multi_reduction <add>, %74, %cst_52 [1] : vector<32x1024xf32> to vector<32xf32>
    %79 = vector.shape_cast %78 : vector<32xf32> to vector<32x1xf32>
    %80 = arith.addf %65, %79 : vector<32x1xf32>
    %cst_53 = arith.constant 4.8828125E-4 : f32
    %81 = vector.broadcast %cst_53 : f32 to vector<32x1xf32>
    %82 = arith.mulf %80, %81 : vector<32x1xf32>
    %cst_54 = arith.constant 0.000000e+00 : f32
    %83 = vector.broadcast %cst_54 : f32 to vector<32x1xf32>
    %c0_55 = arith.constant 0 : index
    %c0_56 = arith.constant 0 : index
    %c0_57 = arith.constant 0 : index
    %84 = vector.load %arg9[%c0_55, %c0_56, %c0_57] : memref<2x32x1024xf32, #tpu.memory_space<vmem>>, vector<1x32x1024xf32>
    %85 = vector.shape_cast %84 : vector<1x32x1024xf32> to vector<32x1024xf32>
    %86 = vector.broadcast %82 : vector<32x1xf32> to vector<32x1024xf32>
    %87 = arith.subf %85, %86 : vector<32x1024xf32>
    %88 = arith.mulf %87, %87 : vector<32x1024xf32>
    %cst_58 = arith.constant dense<0.000000e+00> : vector<32xf32>
    %89 = vector.multi_reduction <add>, %88, %cst_58 [1] : vector<32x1024xf32> to vector<32xf32>
    %90 = vector.shape_cast %89 : vector<32xf32> to vector<32x1xf32>
    %91 = arith.addf %83, %90 : vector<32x1xf32>
    %c1_59 = arith.constant 1 : index
    %c0_60 = arith.constant 0 : index
    %c0_61 = arith.constant 0 : index
    %92 = vector.load %arg9[%c1_59, %c0_60, %c0_61] : memref<2x32x1024xf32, #tpu.memory_space<vmem>>, vector<1x32x1024xf32>
    %93 = vector.shape_cast %92 : vector<1x32x1024xf32> to vector<32x1024xf32>
    %94 = vector.broadcast %82 : vector<32x1xf32> to vector<32x1024xf32>
    %95 = arith.subf %93, %94 : vector<32x1024xf32>
    %96 = arith.mulf %95, %95 : vector<32x1024xf32>
    %cst_62 = arith.constant dense<0.000000e+00> : vector<32xf32>
    %97 = vector.multi_reduction <add>, %96, %cst_62 [1] : vector<32x1024xf32> to vector<32xf32>
    %98 = vector.shape_cast %97 : vector<32xf32> to vector<32x1xf32>
    %99 = arith.addf %91, %98 : vector<32x1xf32>
    %c0_63 = arith.constant 0 : index
    %c0_64 = arith.constant 0 : index
    %100 = vector.load %arg6[%c0_63, %c0_64] : memref<32x1xf32, #tpu.memory_space<vmem>>, vector<32x1xf32>
    %cst_65 = arith.constant 4.8828125E-4 : f32
    %101 = vector.broadcast %cst_65 : f32 to vector<32x1xf32>
    %102 = arith.mulf %99, %101 : vector<32x1xf32>
    %cst_66 = arith.constant 9.99999974E-6 : f32
    %103 = vector.broadcast %cst_66 : f32 to vector<32x1xf32>
    %104 = arith.addf %102, %103 : vector<32x1xf32>
    %105 = math.rsqrt %104 : vector<32x1xf32>
    %106 = arith.mulf %100, %105 : vector<32x1xf32>
    %c0_67 = arith.constant 0 : index
    %c0_68 = arith.constant 0 : index
    %107 = vector.load %arg7[%c0_67, %c0_68] : memref<32x1xf32, #tpu.memory_space<vmem>>, vector<32x1xf32>
    %108 = arith.mulf %82, %106 : vector<32x1xf32>
    %109 = arith.subf %107, %108 : vector<32x1xf32>
    %c0_69 = arith.constant 0 : index
    %c0_70 = arith.constant 0 : index
    %c0_71 = arith.constant 0 : index
    %110 = vector.load %arg9[%c0_69, %c0_70, %c0_71] : memref<2x32x1024xf32, #tpu.memory_space<vmem>>, vector<1x32x1024xf32>
    %111 = vector.shape_cast %110 : vector<1x32x1024xf32> to vector<32x1024xf32>
    %112 = vector.broadcast %106 : vector<32x1xf32> to vector<32x1024xf32>
    %113 = arith.mulf %111, %112 : vector<32x1024xf32>
    %114 = vector.broadcast %109 : vector<32x1xf32> to vector<32x1024xf32>
    %115 = arith.addf %113, %114 : vector<32x1024xf32>
    %c0_72 = arith.constant 0 : index
    %c0_73 = arith.constant 0 : index
    %c0_74 = arith.constant 0 : index
    %116 = vector.load %arg1[%c0_72, %c0_73, %c0_74] : memref<2x32x1024xf32, #tpu.memory_space<vmem>>, vector<1x32x1024xf32>
    %117 = vector.shape_cast %116 : vector<1x32x1024xf32> to vector<32x1024xf32>
    %118 = arith.addf %115, %117 : vector<32x1024xf32>
    %c0_75 = arith.constant 0 : index
    %c0_76 = arith.constant 0 : index
    %c0_77 = arith.constant 0 : index
    %119 = vector.load %arg8[%c0_75, %c0_76, %c0_77] : memref<2x32x1024xf32, #tpu.memory_space<vmem>>, vector<1x32x1024xf32>
    %120 = vector.shape_cast %119 : vector<1x32x1024xf32> to vector<32x1024xf32>
    %121 = vector.shape_cast %118 : vector<32x1024xf32> to vector<1x32x1024xf32>
    tpu.vector_store %arg8[%c0_75, %c0_76, %c0_77], %121 {strides = array<i32>} : memref<2x32x1024xf32, #tpu.memory_space<vmem>>, vector<1x32x1024xf32>,
    %c1_78 = arith.constant 1 : index
    %c0_79 = arith.constant 0 : index
    %c0_80 = arith.constant 0 : index
    %122 = vector.load %arg9[%c1_78, %c0_79, %c0_80] : memref<2x32x1024xf32, #tpu.memory_space<vmem>>, vector<1x32x1024xf32>
    %123 = vector.shape_cast %122 : vector<1x32x1024xf32> to vector<32x1024xf32>
    %124 = vector.broadcast %106 : vector<32x1xf32> to vector<32x1024xf32>
    %125 = arith.mulf %123, %124 : vector<32x1024xf32>
    %126 = vector.broadcast %109 : vector<32x1xf32> to vector<32x1024xf32>
    %127 = arith.addf %125, %126 : vector<32x1024xf32>
    %c1_81 = arith.constant 1 : index
    %c0_82 = arith.constant 0 : index
    %c0_83 = arith.constant 0 : index
    %128 = vector.load %arg1[%c1_81, %c0_82, %c0_83] : memref<2x32x1024xf32, #tpu.memory_space<vmem>>, vector<1x32x1024xf32>
    %129 = vector.shape_cast %128 : vector<1x32x1024xf32> to vector<32x1024xf32>
    %130 = arith.addf %127, %129 : vector<32x1024xf32>
    %c1_84 = arith.constant 1 : index
    %c0_85 = arith.constant 0 : index
    %c0_86 = arith.constant 0 : index
    %131 = vector.load %arg8[%c1_84, %c0_85, %c0_86] : memref<2x32x1024xf32, #tpu.memory_space<vmem>>, vector<1x32x1024xf32>
    %132 = vector.shape_cast %131 : vector<1x32x1024xf32> to vector<32x1024xf32>
    %133 = vector.shape_cast %130 : vector<32x1024xf32> to vector<1x32x1024xf32>
    tpu.vector_store %arg8[%c1_84, %c0_85, %c0_86], %133 {strides = array<i32>} : memref<2x32x1024xf32, #tpu.memory_space<vmem>>, vector<1x32x1024xf32>,
    return
  }
  func.func @transform_0(%arg0: i32) -> (i32, i32, i32) {
    %c0_i32 = arith.constant 0 : i32
    %c0_i32_0 = arith.constant 0 : i32
    %c0_i32_1 = arith.constant 0 : i32
    %c0_i32_2 = arith.constant 0 : i32
    return %c0_i32, %c0_i32_0, %c0_i32_1 : i32, i32, i32
  }
  func.func @transform_1(%arg0: i32) -> (i32, i32) {
    %c0_i32 = arith.constant 0 : i32
    %c0_i32_0 = arith.constant 0 : i32
    %c0_i32_1 = arith.constant 0 : i32
    return %c0_i32, %c0_i32_0 : i32, i32
  }
  func.func @transform_2(%arg0: i32) -> (i32, i32) {
    %c0_i32 = arith.constant 0 : i32
    %c0_i32_0 = arith.constant 0 : i32
    %c0_i32_1 = arith.constant 0 : i32
    return %c0_i32, %c0_i32_0 : i32, i32
  }
  func.func @transform_3(%arg0: i32) -> (i32, i32) {
    %c0_i32 = arith.constant 0 : i32
    %c0_i32_0 = arith.constant 0 : i32
    %c0_i32_1 = arith.constant 0 : i32
    return %c0_i32, %c0_i32_0 : i32, i32
  }
  func.func @transform_4(%arg0: i32) -> (i32, i32) {
    %c0_i32 = arith.constant 0 : i32
    %c0_i32_0 = arith.constant 0 : i32
    %c0_i32_1 = arith.constant 0 : i32
    return %c0_i32, %c0_i32_0 : i32, i32
  }
  func.func @transform_5(%arg0: i32) -> (i32, i32) {
    %c0_i32 = arith.constant 0 : i32
    %c0_i32_0 = arith.constant 0 : i32
    %c0_i32_1 = arith.constant 0 : i32
    return %c0_i32, %c0_i32_0 : i32, i32
  }
  func.func @transform_6(%arg0: i32) -> (i32, i32) {
    %c0_i32 = arith.constant 0 : i32
    %c0_i32_0 = arith.constant 0 : i32
    %c0_i32_1 = arith.constant 0 : i32
    return %c0_i32, %c0_i32_0 : i32, i32
  }
  func.func @transform_7(%arg0: i32) -> (i32, i32, i32) {
    %c0_i32 = arith.constant 0 : i32
    %c0_i32_0 = arith.constant 0 : i32
    %c0_i32_1 = arith.constant 0 : i32
    %c0_i32_2 = arith.constant 0 : i32
    return %c0_i32, %c0_i32_0, %c0_i32_1 : i32, i32, i32
  }
}

</mosaic_0001>

<bundles_post_ra>
// kernel: tpu_custom_call.1
= control target key start
LH: loop header
LB: loop body
LE: loop exit
PB: predicated region body
PF: predicated region fallthrough
CT: control target
= control target key end

     0   :  { %12 = vsyncpa [#allocation4], 0  ;;  %s4644_s0 = inlined_call_operand.hbm [shape: f32[2,32,1024], index: 0, kind: input, shape index: {}]   ;;  %s4645_s1 = inlined_call_operand.vmem [shape: f32[32,32], index: 1, kind: input, shape index: {}]   ;;  %s4646_s2 = inlined_call_operand.vmem [shape: f32[32,32], index: 2, kind: input, shape index: {}]   ;;  %s4647_s3 = inlined_call_operand.vmem [shape: f32[32,1], index: 3, kind: input, shape index: {}]   ;;  %s4648_s4 = inlined_call_operand.vmem [shape: f32[32,1], index: 4, kind: input, shape index: {}]   ;;  %s4649_s5 = inlined_call_operand.vmem [shape: f32[32,1], index: 5, kind: input, shape index: {}]   ;;  %s4650_s6 = inlined_call_operand.vmem [shape: f32[32,1], index: 6, kind: input, shape index: {}]   ;;  %s4651_s7 = inlined_call_operand.hbm [shape: f32[2,32,1024], index: 7, kind: output, shape index: {}]  }
   0x1   :  { %13 = vsyncpa [#allocation5], 0  ;;  %s3274_s24 = smov [#allocation3]  }
   0x2   :  { %s19_s25 = sshll.u32 %s3274_s24, 4  ;;  %s20_s25 = int_to_ptr.vmem [resolvable:$true] %s19_s25 }
   0x3   :  { %s3238_s26 = scalar_lea.vmem %s20_s25, 8192  ;;  %p3243_p1 = scmp.lt.s32.totalorder %s20_s25, %s20_s25 }
   0x4   :  { %p3239_p0 = scmp.ne.s32.totalorder %s20_s25, %s3238_s26  ;;  %p3244_p2 = scmp.lt.s32.totalorder %s3238_s26, %s3238_s26 }
   0x6   :  { %p3245_p3 = por %p3244_p2, %p3243_p1 }
   0x8   :  { %p3246_p4 = pnand %p3245_p3, %p3239_p0 }
   0xa   :  { %3249 = shalt.err (!%p3246_p4)
}
   0xb   :  { %s3275_s27 = smov 1024   ;;  %s3276_s28 = smov 64  }
   0xc   :  { %25 = dma.hbm_to_vmem [thread:$0]  %s4644_s0, 8192, %s20_s25, [#allocation4], %s3275_s27, %s3275_s27, %s3276_s28  }
   0xd   :  { %3270 = dma.done.wait [#allocation4], 8192  }
   0xe   :  { %3271 = vsyncadd [#allocation4], 4294959104  ;;  %v4652_v0 = vmov 0.0   ;;  %v74_v1 = vld [vmem:[#allocation3 + $0xc8] sm:$0xff]  ;;  %v73_v2 = vld [vmem:[#allocation3 + $0xc0] sm:$0xff]  ;;  %vm81_vm0 = vcmask 261120  }
   0xf   :  { %158 = vmatprep.mubr.f32.mxu0 %v4652_v0  ;;  %247 = vmatprep.mubr.f32.mxu1 %v4652_v0  ;;  %v66_v3 = vld [vmem:[#allocation3 + $0x88] sm:$0xff]  ;;  %v76_v4 = vld [vmem:[#allocation3 + $0xd8] sm:$0xff]  ;;  %v65_v5 = vld [vmem:[#allocation3 + $0x80] sm:$0xff] }
  0x10   :  { %118 = vmatprep.subr.mxu0 %v74_v1  ;;  %v75_v6 = vld [vmem:[#allocation3 + $0xd0] sm:$0xff]  ;;  %207 = vmatprep.subr.mxu1 %v76_v4  ;;  %v58_v7 = vld [vmem:[#allocation3 + $0x48] sm:$0xff]  ;;  %v68_v8 = vld [vmem:[#allocation3 + $0x98] sm:$0xff] }
  0x11   :  { %119 = vmatpush1.msra.mxu0 %v73_v2  ;;  %208 = vmatpush1.msra.mxu1 %v75_v6  ;;  %v57_v9 = vld [vmem:[#allocation3 + $0x40] sm:$0xff]  ;;  %v67_v10 = vld [vmem:[#allocation3 + $0x90] sm:$0xff]  ;;  %v60_v11 = vld [vmem:[#allocation3 + $0x58] sm:$0xff] }
  0x12   :  { %120 = vmatprep.subr.mxu0 %v66_v3  ;;  %209 = vmatprep.subr.mxu1 %v68_v8  ;;  %v50_v12 = vld [vmem:[#allocation3 + $0x8] sm:$0xff]  ;;  %v59_v13 = vld [vmem:[#allocation3 + $0x50] sm:$0xff]  ;;  %v49_v14 = vld [vmem:[#allocation3] sm:$0xff] }
  0x13   :  { %121 = vmatpush1.msra.mxu0 %v65_v5  ;;  %210 = vmatpush1.msra.mxu1 %v67_v10  ;;  %v52_v15 = vld [vmem:[#allocation3 + $0x18] sm:$0xff]  ;;  %v3331_v16 = vld [vmem:[%s4645_s1] sm:$0xff]  ;;  %v51_v17 = vld [vmem:[#allocation3 + $0x10] sm:$0xff] }
  0x14   :  { %122 = vmatprep.subr.mxu0 %v58_v7  ;;  %211 = vmatprep.subr.mxu1 %v60_v11  ;;  %v78_v18 = vld [vmem:[#allocation3 + $0xe8] sm:$0xff]  ;;  %v77_v19 = vld [vmem:[#allocation3 + $0xe0] sm:$0xff]  ;;  %v80_v20 = vld [vmem:[#allocation3 + $0xf8] sm:$0xff] }
  0x15   :  { %123 = vmatpush1.msra.mxu0 %v57_v9  ;;  %212 = vmatpush1.msra.mxu1 %v59_v13  ;;  %v3341_v21 = vld [vmem:[%s4645_s1 + $0x8] sm:$0xff]  ;;  %v69_v23 = vld [vmem:[#allocation3 + $0xa0] sm:$0xff]  ;;  %v79_v24 = vld [vmem:[#allocation3 + $0xf0] sm:$0xff] }
  0x16   :  { %124 = vmatprep.subr.mxu0 %v50_v12  ;;  %213 = vmatprep.subr.mxu1 %v52_v15  ;;  %v70_v22 = vld [vmem:[#allocation3 + $0xa8] sm:$0xff]  ;;  %v3352_v26 = vld [vmem:[%s4645_s1 + $0x10] sm:$0xff]  ;;  %v72_v27 = vld [vmem:[#allocation3 + $0xb8] sm:$0xff] }
  0x17   :  { %125 = vmatpush1.msra.mxu0 %v49_v14  ;;  %214 = vmatpush1.msra.mxu1 %v51_v17  ;;  %v62_v25 = vld [vmem:[#allocation3 + $0x68] sm:$0xff]  ;;  %v61_v28 = vld [vmem:[#allocation3 + $0x60] sm:$0xff]  ;;  %v71_v29 = vld [vmem:[#allocation3 + $0xb0] sm:$0xff] }
  0x18   :  { %3142 = vmatmul.mubr.msk.f32.vlgmr.msra.gmra.mxu0 %vm81_vm0, %v3331_v16  ;;  %3146 = vmatmul.mubr.msk.f32.vlgmr.msra.gmra.mxu1 %vm81_vm0, %v3331_v16  ;;  %v54_v30 = vld [vmem:[#allocation3 + $0x28] sm:$0xff]  ;;  %v3363_v31 = vld [vmem:[%s4645_s1 + $0x18] sm:$0xff]  ;;  %v53_v33 = vld [vmem:[#allocation3 + $0x20] sm:$0xff] }
  0x19   :  { %164 = vmatprep.mubr.f32.mxu0 %v4652_v0  ;;  %253 = vmatprep.mubr.f32.mxu1 %v4652_v0  ;;  %v64_v32 = vld [vmem:[#allocation3 + $0x78] sm:$0xff]  ;;  %v63_v34 = vld [vmem:[#allocation3 + $0x70] sm:$0xff]  ;;  %v548_v37 = vld [vmem:[#allocation3 + $0x1c8] sm:$0xff] }
  0x1a   :  { %296 = vmatprep.subr.mxu0 %v78_v18  ;;  %385 = vmatprep.subr.mxu1 %v80_v20  ;;  %v56_v35 = vld [vmem:[#allocation3 + $0x38] sm:$0xff]  ;;  %v55_v36 = vld [vmem:[#allocation3 + $0x30] sm:$0xff]  ;;  %v547_v38 = vld [vmem:[#allocation3 + $0x1c0] sm:$0xff] }
  0x1b   :  { %297 = vmatpush1.msra.mxu0 %v77_v19  ;;  %386 = vmatpush1.msra.mxu1 %v79_v24  ;;  %v550_v39 = vld [vmem:[#allocation3 + $0x1d8] sm:$0xff]  ;;  %v540_v40 = vld [vmem:[#allocation3 + $0x188] sm:$0xff]  ;;  %v539_v41 = vld [vmem:[#allocation3 + $0x180] sm:$0xff] }
  0x1c   :  { %3143 = vmatmul.mubr.msk.f32.gmra.mxu0 %vm81_vm0, %v3341_v21  ;;  %298 = vmatprep.subr.mxu0 %v70_v22  ;;  %v549_v42 = vld [vmem:[#allocation3 + $0x1d0] sm:$0xff]  ;;  %v532_v43 = vld [vmem:[#allocation3 + $0x148] sm:$0xff]  ;;  %v542_v44 = vld [vmem:[#allocation3 + $0x198] sm:$0xff] }
  0x1d   :  { %3147 = vmatmul.mubr.msk.f32.gmra.mxu1 %vm81_vm0, %v3341_v21  ;;  %170 = vmatprep.mubr.f32.mxu0 %v4652_v0  ;;  %v531_v45 = vld [vmem:[#allocation3 + $0x140] sm:$0xff]  ;;  %v541_v46 = vld [vmem:[#allocation3 + $0x190] sm:$0xff]  ;;  %v524_v47 = vld [vmem:[#allocation3 + $0x108] sm:$0xff] }
  0x1e   :  { %259 = vmatprep.mubr.f32.mxu1 %v4652_v0  ;;  %299 = vmatpush1.msra.mxu0 %v69_v23  ;;  %v534_v48 = vld [vmem:[#allocation3 + $0x158] sm:$0xff]  ;;  %v523_v49 = vld [vmem:[#allocation3 + $0x100] sm:$0xff]  ;;  %v533_v50 = vld [vmem:[#allocation3 + $0x150] sm:$0xff] }
  0x1f   :  { %300 = vmatprep.subr.mxu0 %v62_v25  ;;  %387 = vmatprep.subr.mxu1 %v72_v27  ;;  %v526_v51 = vld [vmem:[#allocation3 + $0x118] sm:$0xff]  ;;  %v525_v52 = vld [vmem:[#allocation3 + $0x110] sm:$0xff]  ;;  %v552_v53 = vld [vmem:[#allocation3 + $0x1e8] sm:$0xff] }
  0x20   :  { %3144 = vmatmul.mubr.msk.f32.gmra.mxu0 %vm81_vm0, %v3352_v26  ;;  %388 = vmatpush1.msra.mxu1 %v71_v29  ;;  %v551_v54 = vld [vmem:[#allocation3 + $0x1e0] sm:$0xff]  ;;  %v554_v55 = vld [vmem:[#allocation3 + $0x1f8] sm:$0xff]  ;;  %v544_v56 = vld [vmem:[#allocation3 + $0x1a8] sm:$0xff] }
  0x21   :  { %3148 = vmatmul.mubr.msk.f32.gmra.mxu1 %vm81_vm0, %v3352_v26  ;;  %176 = vmatprep.mubr.f32.mxu0 %v4652_v0  ;;  %v543_v57 = vld [vmem:[#allocation3 + $0x1a0] sm:$0xff]  ;;  %v553_v58 = vld [vmem:[#allocation3 + $0x1f0] sm:$0xff]  ;;  %v536_v59 = vld [vmem:[#allocation3 + $0x168] sm:$0xff] }
  0x22   :  { %265 = vmatprep.mubr.f32.mxu1 %v4652_v0  ;;  %301 = vmatpush1.msra.mxu0 %v61_v28  ;;  %v546_v60 = vld [vmem:[#allocation3 + $0x1b8] sm:$0xff]  ;;  %v535_v61 = vld [vmem:[#allocation3 + $0x160] sm:$0xff]  ;;  %v545_v62 = vld [vmem:[#allocation3 + $0x1b0] sm:$0xff] }
  0x23   :  { %302 = vmatprep.subr.mxu0 %v54_v30  ;;  %389 = vmatprep.subr.mxu1 %v64_v32  ;;  %v528_v63 = vld [vmem:[#allocation3 + $0x128] sm:$0xff]  ;;  %v538_v1 = vld [vmem:[#allocation3 + $0x178] sm:$0xff]  ;;  %v527_v2 = vld [vmem:[#allocation3 + $0x120] sm:$0xff] }
  0x24   :  { %3145 = vmatmul.mubr.msk.f32.gmra.mxu0 %vm81_vm0, %v3363_v31  ;;  %390 = vmatpush1.msra.mxu1 %v63_v34  ;;  %v537_v3 = vld [vmem:[#allocation3 + $0x170] sm:$0xff]  ;;  %v530_v4 = vld [vmem:[#allocation3 + $0x138] sm:$0xff] }
  0x25   :  { %3149 = vmatmul.mubr.msk.f32.gmra.mxu1 %vm81_vm0, %v3363_v31  ;;  %303 = vmatpush1.msra.mxu0 %v53_v33  ;;  %v529_v5 = vld [vmem:[#allocation3 + $0x130] sm:$0xff] }
  0x26   :  { %336 = vmatprep.mubr.f32.mxu0 %v4652_v0  ;;  %391 = vmatprep.subr.mxu1 %v56_v35 }
  0x27   :  { %425 = vmatprep.mubr.f32.mxu1 %v4652_v0  ;;  %392 = vmatpush1.msra.mxu1 %v55_v36 }
  0x28   :  { %3150 = vmatmul.mubr.msk.f32.vlgmr.msra.gmra.mxu0 %vm81_vm0, %v3331_v16  ;;  %579 = vmatprep.subr.mxu0 %v548_v37 }
  0x29   :  { %3154 = vmatmul.mubr.msk.f32.vlgmr.msra.gmra.mxu1 %vm81_vm0, %v3331_v16  ;;  %342 = vmatprep.mubr.f32.mxu0 %v4652_v0 }
  0x2a   :  { %431 = vmatprep.mubr.f32.mxu1 %v4652_v0  ;;  %580 = vmatpush1.msra.mxu0 %v547_v38 }
  0x2b   :  { %668 = vmatprep.subr.mxu1 %v550_v39  ;;  %581 = vmatprep.subr.mxu0 %v540_v40 }
  0x2c   :  { %3151 = vmatmul.mubr.msk.f32.gmra.mxu0 %vm81_vm0, %v3341_v21  ;;  %669 = vmatpush1.msra.mxu1 %v549_v42 }
  0x2d   :  { %3155 = vmatmul.mubr.msk.f32.gmra.mxu1 %vm81_vm0, %v3341_v21  ;;  %348 = vmatprep.mubr.f32.mxu0 %v4652_v0 }
  0x2e   :  { %437 = vmatprep.mubr.f32.mxu1 %v4652_v0  ;;  %582 = vmatpush1.msra.mxu0 %v539_v41 }
  0x2f   :  { %583 = vmatprep.subr.mxu0 %v532_v43  ;;  %670 = vmatprep.subr.mxu1 %v542_v44 }
  0x30   :  { %3152 = vmatmul.mubr.msk.f32.gmra.mxu0 %vm81_vm0, %v3352_v26  ;;  %671 = vmatpush1.msra.mxu1 %v541_v46 }
  0x31   :  { %3156 = vmatmul.mubr.msk.f32.gmra.mxu1 %vm81_vm0, %v3352_v26  ;;  %354 = vmatprep.mubr.f32.mxu0 %v4652_v0 }
  0x32   :  { %443 = vmatprep.mubr.f32.mxu1 %v4652_v0  ;;  %584 = vmatpush1.msra.mxu0 %v531_v45 }
  0x33   :  { %585 = vmatprep.subr.mxu0 %v524_v47  ;;  %672 = vmatprep.subr.mxu1 %v534_v48 }
  0x34   :  { %3153 = vmatmul.mubr.msk.f32.gmra.mxu0 %vm81_vm0, %v3363_v31  ;;  %673 = vmatpush1.msra.mxu1 %v533_v50 }
  0x35   :  { %3157 = vmatmul.mubr.msk.f32.gmra.mxu1 %vm81_vm0, %v3363_v31  ;;  %586 = vmatpush1.msra.mxu0 %v523_v49 }
  0x36   :  { %619 = vmatprep.mubr.f32.mxu0 %v4652_v0  ;;  %674 = vmatprep.subr.mxu1 %v526_v51 }
  0x37   :  { %708 = vmatprep.mubr.f32.mxu1 %v4652_v0  ;;  %675 = vmatpush1.msra.mxu1 %v525_v52 }
  0x38   :  { %3158 = vmatmul.mubr.msk.f32.vlgmr.msra.gmra.mxu0 %vm81_vm0, %v3331_v16  ;;  %757 = vmatprep.subr.mxu0 %v552_v53 }
  0x39   :  { %3162 = vmatmul.mubr.msk.f32.vlgmr.msra.gmra.mxu1 %vm81_vm0, %v3331_v16  ;;  %625 = vmatprep.mubr.f32.mxu0 %v4652_v0 }
  0x3a   :  { %714 = vmatprep.mubr.f32.mxu1 %v4652_v0  ;;  %758 = vmatpush1.msra.mxu0 %v551_v54 }
  0x3b   :  { %846 = vmatprep.subr.mxu1 %v554_v55  ;;  %759 = vmatprep.subr.mxu0 %v544_v56 }
  0x3c   :  { %3159 = vmatmul.mubr.msk.f32.gmra.mxu0 %vm81_vm0, %v3341_v21  ;;  %847 = vmatpush1.msra.mxu1 %v553_v58 }
  0x3d   :  { %3163 = vmatmul.mubr.msk.f32.gmra.mxu1 %vm81_vm0, %v3341_v21  ;;  %631 = vmatprep.mubr.f32.mxu0 %v4652_v0 }
  0x3e   :  { %720 = vmatprep.mubr.f32.mxu1 %v4652_v0  ;;  %760 = vmatpush1.msra.mxu0 %v543_v57 }
  0x3f   :  { %761 = vmatprep.subr.mxu0 %v536_v59  ;;  %848 = vmatprep.subr.mxu1 %v546_v60 }
  0x40   :  { %3160 = vmatmul.mubr.msk.f32.gmra.mxu0 %vm81_vm0, %v3352_v26  ;;  %849 = vmatpush1.msra.mxu1 %v545_v62 }
  0x41   :  { %3164 = vmatmul.mubr.msk.f32.gmra.mxu1 %vm81_vm0, %v3352_v26  ;;  %637 = vmatprep.mubr.f32.mxu0 %v4652_v0 }
  0x42   :  { %726 = vmatprep.mubr.f32.mxu1 %v4652_v0  ;;  %762 = vmatpush1.msra.mxu0 %v535_v61 }
  0x43   :  { %763 = vmatprep.subr.mxu0 %v528_v63  ;;  %850 = vmatprep.subr.mxu1 %v538_v1 }
  0x44   :  { %3161 = vmatmul.mubr.msk.f32.gmra.mxu0 %vm81_vm0, %v3363_v31  ;;  %851 = vmatpush1.msra.mxu1 %v537_v3 }
  0x45   :  { %3165 = vmatmul.mubr.msk.f32.gmra.mxu1 %vm81_vm0, %v3363_v31  ;;  %764 = vmatpush1.msra.mxu0 %v527_v2 }
  0x46   :  { %797 = vmatprep.mubr.f32.mxu0 %v4652_v0  ;;  %852 = vmatprep.subr.mxu1 %v530_v4 }
  0x47   :  { %886 = vmatprep.mubr.f32.mxu1 %v4652_v0  ;;  %853 = vmatpush1.msra.mxu1 %v529_v5 }
  0x48   :  { %3166 = vmatmul.mubr.msk.f32.vlgmr.msra.gmra.mxu0 %vm81_vm0, %v3331_v16 }
  0x49   :  { %3170 = vmatmul.mubr.msk.f32.vlgmr.msra.gmra.mxu1 %vm81_vm0, %v3331_v16  ;;  %803 = vmatprep.mubr.f32.mxu0 %v4652_v0 }
  0x4a   :  { %892 = vmatprep.mubr.f32.mxu1 %v4652_v0 }
  0x4c   :  { %3167 = vmatmul.mubr.msk.f32.gmra.mxu0 %vm81_vm0, %v3341_v21 }
  0x4d   :  { %3171 = vmatmul.mubr.msk.f32.gmra.mxu1 %vm81_vm0, %v3341_v21  ;;  %809 = vmatprep.mubr.f32.mxu0 %v4652_v0 }
  0x4e   :  { %898 = vmatprep.mubr.f32.mxu1 %v4652_v0 }
  0x50   :  { %3168 = vmatmul.mubr.msk.f32.gmra.mxu0 %vm81_vm0, %v3352_v26 }
  0x51   :  { %3172 = vmatmul.mubr.msk.f32.gmra.mxu1 %vm81_vm0, %v3352_v26  ;;  %815 = vmatprep.mubr.f32.mxu0 %v4652_v0 }
  0x52   :  { %904 = vmatprep.mubr.f32.mxu1 %v4652_v0 }
  0x54   :  { %3169 = vmatmul.mubr.msk.f32.gmra.mxu0 %vm81_vm0, %v3363_v31 }
  0x55   :  { %3173 = vmatmul.mubr.msk.f32.gmra.mxu1 %vm81_vm0, %v3363_v31  ;;  %1504 = vmatprep.mubr.f32.mxu0 %v4652_v0 }
  0x56   :  { %1593 = vmatprep.mubr.f32.mxu1 %v4652_v0 }
  0xd8   :  { %v3444_v6 = vpop.f32.mrf.mxu0  ;;  %v3446_v7 = vpop.f32.mrf.mxu1 }
  0xd9   :  { %4776 = vst [vmem:[#allocation9_spill] sm:$0xff] %v3444_v6  ;;  %4777 = vst [vmem:[#allocation10_spill] sm:$0xff] %v3446_v7 }
  0xda   :  { %v3448_v8 = vpop.f32.mrf.mxu0  ;;  %v3450_v9 = vpop.f32.mrf.mxu1 }
  0xdb   :  { %4778 = vst [vmem:[#allocation11_spill] sm:$0xff] %v3448_v8  ;;  %4779 = vst [vmem:[#allocation12_spill] sm:$0xff] %v3450_v9 }
  0xdc   :  { %v3452_v10 = vpop.f32.mrf.mxu0 }
  0xdd   :  { %4780 = vst [vmem:[#allocation13_spill] sm:$0xff] %v3452_v10  ;;  %v3454_v11 = vpop.f32.mrf.mxu1 }
  0xde   :  { %4781 = vst [vmem:[#allocation14_spill] sm:$0xff] %v3454_v11  ;;  %v3456_v12 = vpop.f32.mrf.mxu0 }
  0xdf   :  { %4782 = vst [vmem:[#allocation15_spill] sm:$0xff] %v3456_v12  ;;  %v3458_v13 = vpop.f32.mrf.mxu1 }
  0xe0   :  { %4783 = vst [vmem:[#allocation16_spill] sm:$0xff] %v3458_v13  ;;  %v3460_v14 = vpop.f32.mrf.mxu0 }
  0xe1   :  { %4784 = vst [vmem:[#allocation17_spill] sm:$0xff] %v3460_v14  ;;  %v3462_v15 = vpop.f32.mrf.mxu1 }
  0xe2   :  { %v3464_v16 = vpop.f32.mrf.mxu0 }
  0xe3   :  { %4785 = vst [vmem:[#allocation18_spill] sm:$0xff] %v3464_v16  ;;  %v3466_v17 = vpop.f32.mrf.mxu1  ;;  %v500_v21 = vadd.f32 %v3464_v16, %v3460_v14 }
  0xe4   :  { %v3468_v18 = vpop.f32.mrf.mxu0 }
  0xe5   :  { %v3470_v19 = vpop.f32.mrf.mxu1  ;;  %v501_v26 = vadd.f32 %v500_v21, %v3462_v15 }
  0xe6   :  { %v3472_v20 = vpop.f32.mrf.mxu0 }
  0xe7   :  { %v3476_v22 = vpop.f32.mrf.mxu1  ;;  %v509_v27 = vadd.f32 %v3472_v20, %v3468_v18  ;;  %v502_v32 = vadd.f32 %v501_v26, %v3466_v17  ;;  %v491_v26 = vadd.f32 %v3456_v12, %v3452_v10 }
  0xe8   :  { %v3478_v23 = vpop.f32.mrf.mxu0 }
  0xe9   :  { %4786 = vst [vmem:[#allocation19_spill] sm:$0xff] %v3478_v23  ;;  %v3480_v24 = vpop.f32.mrf.mxu1  ;;  %v510_v33 = vadd.f32 %v509_v27, %v3470_v19 }
  0xea   :  { %v3482_v25 = vpop.f32.mrf.mxu0 }
  0xeb   :  { %v3487_v28 = vpop.f32.mrf.mxu1  ;;  %v511_v39 = vadd.f32 %v510_v33, %v3476_v22 }
  0xec   :  { %4787 = vst [vmem:[#allocation20_spill] sm:$0xff] %v3487_v28  ;;  %v3489_v29 = vpop.f32.mrf.mxu0 }
  0xed   :  { %4788 = vst [vmem:[#allocation21_spill] sm:$0xff] %v3489_v29  ;;  %v3491_v30 = vpop.f32.mrf.mxu1 }
  0xee   :  { %v3493_v31 = vpop.f32.mrf.mxu0 }
  0xef   :  { %v3497_v34 = vpop.f32.mrf.mxu1 }
  0xf0   :  { %v3499_v35 = vpop.f32.mrf.mxu0 }
  0xf1   :  { %4789 = vst [vmem:[#allocation22_spill] sm:$0xff] %v3499_v35  ;;  %v503_v36 = vadd.f32 %v502_v32, %v3499_v35  ;;  %v3502_v37 = vpop.f32.mrf.mxu1 }
  0xf2   :  { %4790 = vst [vmem:[#allocation23_spill] sm:$0xff] %v3502_v37  ;;  %v3504_v38 = vpop.f32.mrf.mxu0 }
  0xf3   :  { %4791 = vst [vmem:[#allocation24_spill] sm:$0xff] %v3504_v38  ;;  %v504_v40 = vadd.f32 %v503_v36, %v3504_v38  ;;  %v3508_v41 = vpop.f32.mrf.mxu1 }
  0xf4   :  { %4792 = vst [vmem:[#allocation25_spill] sm:$0xff] %v3508_v41  ;;  %v3510_v42 = vpop.f32.mrf.mxu0 }
  0xf5   :  { %v512_v43 = vadd.f32 %v511_v39, %v3510_v42  ;;  %v3513_v44 = vpop.f32.mrf.mxu1  ;;  %v505_v45 = vadd.f32 %v504_v40, %v3502_v37 }
  0xf6   :  { %v3516_v46 = vpop.f32.mrf.mxu0 }
  0xf7   :  { %v513_v47 = vadd.f32 %v512_v43, %v3516_v46  ;;  %v3519_v48 = vpop.f32.mrf.mxu1  ;;  %v506_v49 = vadd.f32 %v505_v45, %v3508_v41 }
  0xf8   :  { %v3522_v50 = vpop.f32.mrf.mxu0 }
  0xf9   :  { %4793 = vst [vmem:[#allocation26_spill] sm:$0xff] %v3522_v50  ;;  %507 = vadd.xlane.f32.xlu1 %v506_v49  ;;  %v3524_v51 = vpop.f32.mrf.mxu1  ;;  %v514_v52 = vadd.f32 %v513_v47, %v3513_v44  ;;  %v482_v47 = vadd.f32 %v3448_v8, %v3444_v6  ;;  %v492_v49 = vadd.f32 %v491_v26, %v3454_v11 }
  0xfa   :  { %4794 = vst [vmem:[#allocation27_spill] sm:$0xff] %v3524_v51  ;;  %v3527_v53 = vpop.f32.mrf.mxu0 }
  0xfb   :  { %4795 = vst [vmem:[#allocation28_spill] sm:$0xff] %v3527_v53  ;;  %v3529_v54 = vpop.f32.mrf.mxu1  ;;  %v515_v55 = vadd.f32 %v514_v52, %v3519_v48  ;;  %v944_v32 = vadd.f32 %v3527_v53, %v3522_v50  ;;  %v483_v26 = vadd.f32 %v482_v47, %v3446_v7  ;;  %v493_v8 = vadd.f32 %v492_v49, %v3458_v13 }
  0xfc   :  { %4796 = vst [vmem:[#allocation29_spill] sm:$0xff] %v3529_v54  ;;  %v3532_v56 = vpop.f32.mrf.mxu0 }
  0xfd   :  { %516 = vadd.xlane.f32.xlu0 %v515_v55  ;;  %v3534_v57 = vpop.f32.mrf.mxu1  ;;  %v945_v55 = vadd.f32 %v944_v32, %v3524_v51 }
  0xfe   :  { %v3536_v58 = vpop.f32.mrf.mxu0 }
  0xff   :  { %v3538_v59 = vpop.f32.mrf.mxu1  ;;  %v953_v2 = vadd.f32 %v3536_v58, %v3532_v56  ;;  %v946_v32 = vadd.f32 %v945_v55, %v3529_v54  ;;  %v484_v55 = vadd.f32 %v483_v26, %v3450_v9 }
 0x100   :  { %v3540_v60 = vpop.f32.mrf.mxu0 }
 0x101   :  { %4797 = vst [vmem:[#allocation30_spill] sm:$0xff] %v3540_v60  ;;  %v3542_v61 = vpop.f32.mrf.mxu1  ;;  %v954_v33 = vadd.f32 %v953_v2, %v3534_v57 }
 0x102   :  { %4798 = vst [vmem:[#allocation31_spill] sm:$0xff] %v3542_v61  ;;  %v3544_v62 = vpop.f32.mrf.mxu0 }
 0x103   :  { %4799 = vst [vmem:[#allocation32_spill] sm:$0xff] %v3544_v62  ;;  %v3546_v63 = vpop.f32.mrf.mxu1  ;;  %v962_v5 = vadd.f32 %v3544_v62, %v3540_v60  ;;  %v955_v2 = vadd.f32 %v954_v33, %v3538_v59 }
 0x104   :  { %4800 = vst [vmem:[#allocation33_spill] sm:$0xff] %v3546_v63  ;;  %v3548_v1 = vpop.f32.mrf.mxu0 }
 0x105   :  { %4801 = vst [vmem:[#allocation34_spill] sm:$0xff] %v3548_v1  ;;  %v3552_v3 = vpop.f32.mrf.mxu1  ;;  %v963_v40 = vadd.f32 %v962_v5, %v3542_v61 }
 0x106   :  { %4802 = vst [vmem:[#allocation35_spill] sm:$0xff] %v3552_v3  ;;  %v3554_v4 = vpop.f32.mrf.mxu0 }
 0x107   :  { %4803 = vst [vmem:[#allocation36_spill] sm:$0xff] %v3554_v4  ;;  %v3558_v21 = vpop.f32.mrf.mxu1  ;;  %v971_v43 = vadd.f32 %v3554_v4, %v3548_v1  ;;  %v964_v5 = vadd.f32 %v963_v40, %v3546_v63  ;;  %v494_v40 = vadd.f32 %v493_v8, %v3489_v29  ;;  %v485_v29 = vadd.f32 %v484_v55, %v3478_v23 }
 0x108   :  { %v3562_v27 = vpop.f32.mrf.mxu0 }
 0x109   :  { %4804 = vst [vmem:[#allocation37_spill] sm:$0xff] %v3562_v27  ;;  %v3567_v36 = vpop.f32.mrf.mxu1  ;;  %v972_v50 = vadd.f32 %v971_v43, %v3552_v3 }
 0x10a   :  { %4805 = vst [vmem:[#allocation38_spill] sm:$0xff] %v3567_v36  ;;  %v3569_v39 = vpop.f32.mrf.mxu0 }
 0x10b   :  { %4806 = vst [vmem:[#allocation39_spill] sm:$0xff] %v3569_v39  ;;  %v3574_v45 = vpop.f32.mrf.mxu1  ;;  %v973_v43 = vadd.f32 %v972_v50, %v3558_v21  ;;  %v495_v50 = vadd.f32 %v494_v40, %v3493_v31 }
 0x10c   :  { %v3579_v52 = vpop.f32.mrf.mxu0 }
 0x10d   :  { %4807 = vst [vmem:[#allocation40_spill] sm:$0xff] %v3579_v52  ;;  %v3583_v0 = vpop.f32.mrf.mxu1  ;;  %v956_v12 = vadd.f32 %v955_v2, %v3579_v52  ;;  %v947_v2 = vadd.f32 %v946_v32, %v3562_v27 }
 0x10e   :  { %4808 = vst [vmem:[#allocation41_spill] sm:$0xff] %v3583_v0  ;;  %v3585_v53 = vpop.f32.mrf.mxu0 }
 0x10f   :  { %4809 = vst [vmem:[#allocation42_spill] sm:$0xff] %v3585_v53  ;;  %v3590_v10 = vpop.f32.mrf.mxu1  ;;  %v957_v47 = vadd.f32 %v956_v12, %v3585_v53  ;;  %v948_v12 = vadd.f32 %v947_v2, %v3569_v39  ;;  %v496_v2 = vadd.f32 %v495_v50, %v3491_v30 }
 0x110   :  { %4810 = vst [vmem:[#allocation43_spill] sm:$0xff] %v3590_v10  ;;  %v3594_v6 = vpop.f32.mrf.mxu0 }
 0x111   :  { %4811 = vst [vmem:[#allocation44_spill] sm:$0xff] %v3594_v6  ;;  %v965_v33 = vadd.f32 %v964_v5, %v3594_v6  ;;  %v3598_v51 = vpop.f32.mrf.mxu1  ;;  %v958_v9 = vadd.f32 %v957_v47, %v3583_v0  ;;  %v949_v27 = vadd.f32 %v948_v12, %v3567_v36  ;;  %v497_v47 = vadd.f32 %v496_v2, %v3497_v34 }
 0x112   :  { %4812 = vst [vmem:[#allocation45_spill] sm:$0xff] %v3598_v51  ;;  %v3601_v11 = vpop.f32.mrf.mxu0 }
 0x113   :  { %4813 = vst [vmem:[#allocation46_spill] sm:$0xff] %v3601_v11  ;;  %v966_v49 = vadd.f32 %v965_v33, %v3601_v11  ;;  %v3607_v7 = vpop.f32.mrf.mxu1  ;;  %v959_v40 = vadd.f32 %v958_v9, %v3590_v10 }
 0x114   :  { %4814 = vst [vmem:[#allocation47_spill] sm:$0xff] %v3607_v7  ;;  %v3610_v54 = vpop.f32.mrf.mxu0 }
 0x115   :  { %4815 = vst [vmem:[#allocation48_spill] sm:$0xff] %v3610_v54  ;;  %v974_v5 = vadd.f32 %v973_v43, %v3610_v54  ;;  %v967_v8 = vadd.f32 %v966_v49, %v3598_v51  ;;  %v3618_v32 = vpop.f32.mrf.mxu1  ;;  %v486_v49 = vadd.f32 %v485_v29, %v3482_v25 }
 0x116   :  { %v3616_v13 = vpop.f32.mrf.mxu0  ;;  %4816 = vst [vmem:[#allocation49_spill] sm:$0xff] %v3618_v32 }
 0x117   :  { %v975_v33 = vadd.f32 %v974_v5, %v3616_v13  ;;  %v968_v26 = vadd.f32 %v967_v8, %v3607_v7  ;;  %v3626_v55 = vpop.f32.mrf.mxu1  ;;  %v950_v5 = vadd.f32 %v949_v27, %v3574_v45  ;;  %v487_v8 = vadd.f32 %v486_v49, %v3480_v24 }
 0x118   :  { %4817 = vst [vmem:[#allocation50_spill] sm:$0xff] %v3626_v55 }
 0x119   :  { %969 = vadd.xlane.f32.xlu1 %v968_v26  ;;  %v976_v43 = vadd.f32 %v975_v33, %v3618_v32  ;;  %v488_v29 = vadd.f32 %v487_v8, %v3487_v28 }
 0x11b   :  { %v977_v23 = vadd.f32 %v976_v43, %v3626_v55 }
 0x11d   :  { %960 = vadd.xlane.f32.xlu1 %v959_v40  ;;  %978 = vadd.xlane.f32.xlu0 %v977_v23 }
 0x121   :  { %951 = vadd.xlane.f32.xlu1 %v950_v5  ;;  %498 = vadd.xlane.f32.xlu0 %v497_v47 }
 0x125   :  { %489 = vadd.xlane.f32.xlu0 %v488_v29 }
 0x182   :  { %v508_v9 = vpop.xlane.xlu1 %507 }
 0x186   :  { %v517_v33 = vpop.xlane.xlu0 %516 }
 0x1a2   :  { %v970_v26 = vpop.xlane.xlu1 %969 }
 0x1a3   :  { %v982_v43 = vadd.f32 %v970_v26, %v508_v9 }
 0x1a5   :  { %v3636_v12 = vmul.f32 0.00048828125, %v982_v43 }
 0x1a6   :  { %v979_v50 = vpop.xlane.xlu0 %978  ;;  %v961_v9 = vpop.xlane.xlu1 %960 }
 0x1a7   :  { %v1172_v23 = vsub.f32 %v3540_v60, %v3636_v12  ;;  %v1173_v27 = vsub.f32 %v3544_v62, %v3636_v12  ;;  %v1174_v49 = vsub.f32 %v3542_v61, %v3636_v12  ;;  %v983_v40 = vadd.f32 %v979_v50, %v517_v33 }
 0x1a8   :  { %v1175_v2 = vsub.f32 %v3546_v63, %v3636_v12  ;;  %v1176_v29 = vsub.f32 %v3594_v6, %v3636_v12  ;;  %v1177_v26 = vsub.f32 %v3601_v11, %v3636_v12  ;;  %v1178_v43 = vsub.f32 %v3598_v51, %v3636_v12 }
 0x1a9   :  { %v1204_v5 = vmul.f32 %v1172_v23, %v1172_v23  ;;  %v1205_v47 = vmul.f32 %v1173_v27, %v1173_v27  ;;  %v1206_v60 = vmul.f32 %v1174_v49, %v1174_v49  ;;  %v1179_v33 = vsub.f32 %v3607_v7, %v3636_v12 }
 0x1aa   :  { %v499_v8 = vpop.xlane.xlu0 %498  ;;  %v1036_v50 = vsub.f32 %v3460_v14, %v3636_v12  ;;  %v1037_v23 = vsub.f32 %v3464_v16, %v3636_v12  ;;  %v3658_v27 = vmul.f32 0.00048828125, %v983_v40  ;;  %v1207_v6 = vmul.f32 %v1175_v2, %v1175_v2 }
 0x1ab   :  { %v1238_v62 = vadd.f32 %v1205_v47, %v1204_v5  ;;  %v981_v61 = vadd.f32 %v961_v9, %v499_v8  ;;  %v1038_v11 = vsub.f32 %v3462_v15, %v3636_v12  ;;  %v1208_v51 = vmul.f32 %v1176_v29, %v1176_v29 }
 0x1ac   :  { %v1068_v49 = vmul.f32 %v1036_v50, %v1036_v50  ;;  %v1069_v5 = vmul.f32 %v1037_v23, %v1037_v23  ;;  %v1209_v47 = vmul.f32 %v1177_v26, %v1177_v26  ;;  %v1210_v8 = vmul.f32 %v1178_v43, %v1178_v43 }
 0x1ad   :  { %v1239_v63 = vadd.f32 %v1238_v62, %v1206_v60  ;;  %v1039_v7 = vsub.f32 %v3466_v17, %v3636_v12  ;;  %v3664_v14 = vmul.f32 0.00048828125, %v981_v61  ;;  %v1211_v16 = vmul.f32 %v1179_v33, %v1179_v33 }
 0x1ae   :  { %v490_v28 = vpop.xlane.xlu0 %489  ;;  %v1040_v40 = vsub.f32 %v3499_v35, %v3636_v12  ;;  %v1041_v60 = vsub.f32 %v3504_v38, %v3636_v12  ;;  %v1070_v2 = vmul.f32 %v1038_v11, %v1038_v11  ;;  %v1102_v29 = vadd.f32 %v1069_v5, %v1068_v49 }
 0x1af   :  { %v1240_v9 = vadd.f32 %v1239_v63, %v1207_v6  ;;  %v1180_v26 = vsub.f32 %v3548_v1, %v3658_v27  ;;  %v952_v6 = vpop.xlane.xlu1 %951  ;;  %v1042_v63 = vsub.f32 %v3502_v37, %v3636_v12  ;;  %v1043_v61 = vsub.f32 %v3508_v41, %v3636_v12 }
 0x1b0   :  { %v1181_v43 = vsub.f32 %v3554_v4, %v3658_v27  ;;  %v1182_v33 = vsub.f32 %v3552_v3, %v3658_v27  ;;  %v980_v50 = vadd.f32 %v952_v6, %v490_v28  ;;  %v1071_v11 = vmul.f32 %v1039_v7, %v1039_v7 }
 0x1b1   :  { %v1241_v62 = vadd.f32 %v1240_v9, %v1208_v51  ;;  %v1103_v23 = vadd.f32 %v1102_v29, %v1070_v2  ;;  %v1072_v49 = vmul.f32 %v1040_v40, %v1040_v40  ;;  %v1183_v5 = vsub.f32 %v3558_v21, %v3658_v27 }
 0x1b2   :  { %v1212_v9 = vmul.f32 %v1180_v26, %v1180_v26  ;;  %v1213_v1 = vmul.f32 %v1181_v43, %v1181_v43  ;;  %v1073_v35 = vmul.f32 %v1041_v60, %v1041_v60  ;;  %v1184_v41 = vsub.f32 %v3610_v54, %v3658_v27 }
 0x1b3   :  { %v1242_v51 = vadd.f32 %v1241_v62, %v1209_v47  ;;  %v1104_v38 = vadd.f32 %v1103_v23, %v1071_v11  ;;  %v1074_v4 = vmul.f32 %v1042_v63, %v1042_v63  ;;  %v1185_v3 = vsub.f32 %v3616_v13, %v3658_v27 }
 0x1b4   :  { %v1214_v28 = vmul.f32 %v1182_v33, %v1182_v33  ;;  %v1247_v47 = vadd.f32 %v1213_v1, %v1212_v9  ;;  %v1044_v40 = vsub.f32 %v3468_v18, %v3658_v27  ;;  %v1045_v2 = vsub.f32 %v3472_v20, %v3658_v27 }
 0x1b5   :  { %v1243_v37 = vadd.f32 %v1242_v51, %v1210_v8  ;;  %v1105_v62 = vadd.f32 %v1104_v38, %v1072_v49  ;;  %v1186_v8 = vsub.f32 %v3618_v32, %v3658_v27  ;;  %v1215_v60 = vmul.f32 %v1183_v5, %v1183_v5  ;;  %v4827_v32 = vld [vmem:[#allocation37_spill] sm:$0xff] }
 0x1b6   :  { %v1248_v29 = vadd.f32 %v1247_v47, %v1214_v28  ;;  %v1046_v26 = vsub.f32 %v3470_v19, %v3658_v27  ;;  %v3694_v6 = vmul.f32 0.00048828125, %v980_v50  ;;  %v1075_v1 = vmul.f32 %v1043_v61, %v1043_v61 }
 0x1b7   :  { %v1244_v7 = vadd.f32 %v1243_v37, %v1211_v16  ;;  %v1106_v16 = vadd.f32 %v1105_v62, %v1073_v35  ;;  %v1216_v37 = vmul.f32 %v1184_v41, %v1184_v41  ;;  %v1047_v63 = vsub.f32 %v3476_v22, %v3658_v27 }
 0x1b8   :  { %v1249_v38 = vadd.f32 %v1248_v29, %v1215_v60  ;;  %v1076_v43 = vmul.f32 %v1044_v40, %v1044_v40  ;;  %v1077_v33 = vmul.f32 %v1045_v2, %v1045_v2  ;;  %v1187_v11 = vsub.f32 %v3626_v55, %v3658_v27  ;;  %v4828_v55 = vld [vmem:[#allocation9_spill] sm:$0xff] }
 0x1b9   :  { %1245 = vadd.xlane.f32.xlu1 %v1244_v7  ;;  %v1107_v51 = vadd.f32 %v1106_v16, %v1074_v4  ;;  %v1217_v23 = vmul.f32 %v1185_v3, %v1185_v3  ;;  %v1048_v49 = vsub.f32 %v3510_v42, %v3658_v27  ;;  %v1218_v50 = vmul.f32 %v1186_v8, %v1186_v8 }
 0x1ba   :  { %v1250_v5 = vadd.f32 %v1249_v38, %v1216_v37  ;;  %v1078_v9 = vmul.f32 %v1046_v26, %v1046_v26  ;;  %v1111_v61 = vadd.f32 %v1077_v33, %v1076_v43  ;;  %v1049_v41 = vsub.f32 %v3516_v46, %v3658_v27 }
 0x1bb   :  { %v1108_v35 = vadd.f32 %v1107_v51, %v1075_v1  ;;  %v1164_v28 = vsub.f32 %v3532_v56, %v3664_v14  ;;  %v1165_v4 = vsub.f32 %v3536_v58, %v3664_v14  ;;  %v1079_v7 = vmul.f32 %v1047_v63, %v1047_v63 }
 0x1bc   :  { %v1251_v47 = vadd.f32 %v1250_v5, %v1217_v23  ;;  %v1112_v3 = vadd.f32 %v1111_v61, %v1078_v9  ;;  %v1166_v62 = vsub.f32 %v3534_v57, %v3664_v14  ;;  %v1219_v40 = vmul.f32 %v1187_v11, %v1187_v11  ;;  %v4819_v9 = vld [vmem:[#allocation15_spill] sm:$0xff] }
 0x1bd   :  { %1109 = vadd.xlane.f32.xlu0 %v1108_v35  ;;  %v1050_v2 = vsub.f32 %v3513_v44, %v3658_v27  ;;  %v1080_v8 = vmul.f32 %v1048_v49, %v1048_v49  ;;  %v1196_v60 = vmul.f32 %v1164_v28, %v1164_v28  ;;  %v1167_v1 = vsub.f32 %v3538_v59, %v3664_v14  ;;  %v4820_v35 = vld [vmem:[#allocation14_spill] sm:$0xff] }
 0x1be   :  { %v1252_v29 = vadd.f32 %v1251_v47, %v1218_v50  ;;  %v1113_v26 = vadd.f32 %v1112_v3, %v1079_v7  ;;  %v1197_v16 = vmul.f32 %v1165_v4, %v1165_v4  ;;  %v1051_v37 = vsub.f32 %v3519_v48, %v3658_v27  ;;  %v4818_v50 = vld [vmem:[#allocation13_spill] sm:$0xff] }
 0x1bf   :  { %v1081_v38 = vmul.f32 %v1049_v41, %v1049_v41  ;;  %v1168_v63 = vsub.f32 %v3579_v52, %v3664_v14  ;;  %v1169_v43 = vsub.f32 %v3585_v53, %v3664_v14  ;;  %v1198_v11 = vmul.f32 %v1166_v62, %v1166_v62 }
 0x1c0   :  { %v1253_v33 = vadd.f32 %v1252_v29, %v1219_v40  ;;  %v1114_v51 = vadd.f32 %v1113_v26, %v1080_v8  ;;  %v1229_v23 = vadd.f32 %v1197_v16, %v1196_v60  ;;  %v1170_v49 = vsub.f32 %v3583_v0, %v3664_v14  ;;  %v4821_v16 = vld [vmem:[#allocation16_spill] sm:$0xff] }
 0x1c1   :  { %v1028_v5 = vsub.f32 %v4818_v50, %v3664_v14  ;;  %v1029_v61 = vsub.f32 %v4819_v9, %v3664_v14  ;;  %v1030_v41 = vsub.f32 %v4820_v35, %v3664_v14  ;;  %v1082_v28 = vmul.f32 %v1050_v2, %v1050_v2 }
 0x1c2   :  { %1254 = vadd.xlane.f32.xlu1 %v1253_v33  ;;  %v1115_v4 = vadd.f32 %v1114_v51, %v1081_v38  ;;  %v1199_v47 = vmul.f32 %v1167_v1, %v1167_v1  ;;  %v1230_v7 = vadd.f32 %v1229_v23, %v1198_v11  ;;  %v1083_v3 = vmul.f32 %v1051_v37, %v1051_v37  ;;  %v4822_v33 = vld [vmem:[#allocation21_spill] sm:$0xff]  ;;  %v4823_v11 = vld [vmem:[#allocation26_spill] sm:$0xff] }
 0x1c3   :  { %v1171_v62 = vsub.f32 %v3590_v10, %v3664_v14  ;;  %v1060_v40 = vmul.f32 %v1028_v5, %v1028_v5  ;;  %v1061_v8 = vmul.f32 %v1029_v61, %v1029_v61  ;;  %v1200_v29 = vmul.f32 %v1168_v63, %v1168_v63  ;;  %v4824_v61 = vld [vmem:[#allocation28_spill] sm:$0xff] }
 0x1c4   :  { %v1116_v60 = vadd.f32 %v1115_v4, %v1082_v28  ;;  %v1231_v26 = vadd.f32 %v1230_v7, %v1199_v47  ;;  %v1031_v0 = vsub.f32 %v4821_v16, %v3664_v14  ;;  %v1201_v52 = vmul.f32 %v1169_v43, %v1169_v43  ;;  %v4825_v43 = vld [vmem:[#allocation27_spill] sm:$0xff] }
 0x1c5   :  { %v1202_v53 = vmul.f32 %v1170_v49, %v1170_v49  ;;  %v1032_v2 = vsub.f32 %v4822_v33, %v3664_v14  ;;  %v1062_v38 = vmul.f32 %v1030_v41, %v1030_v41  ;;  %v1093_v37 = vadd.f32 %v1061_v8, %v1060_v40 }
 0x1c6   :  { %v1117_v1 = vadd.f32 %v1116_v60, %v1083_v3  ;;  %v1232_v51 = vadd.f32 %v1231_v26, %v1200_v29  ;;  %v1156_v23 = vsub.f32 %v4823_v11, %v3694_v6  ;;  %v1203_v5 = vmul.f32 %v1171_v62, %v1171_v62  ;;  %v4826_v62 = vld [vmem:[#allocation29_spill] sm:$0xff] }
 0x1c7   :  { %v1033_v63 = vsub.f32 %v3493_v31, %v3664_v14  ;;  %v1157_v28 = vsub.f32 %v4824_v61, %v3694_v6  ;;  %v1158_v49 = vsub.f32 %v4825_v43, %v3694_v6  ;;  %v1034_v41 = vsub.f32 %v3491_v30, %v3664_v14 }
 0x1c8   :  { %1118 = vadd.xlane.f32.xlu0 %v1117_v1  ;;  %v1233_v4 = vadd.f32 %v1232_v51, %v1201_v52  ;;  %v1063_v47 = vmul.f32 %v1031_v0, %v1031_v0  ;;  %v1094_v7 = vadd.f32 %v1093_v37, %v1062_v38  ;;  %v1035_v3 = vsub.f32 %v3497_v34, %v3664_v14 }
 0x1c9   :  { %v1159_v40 = vsub.f32 %v4826_v62, %v3694_v6  ;;  %v1188_v8 = vmul.f32 %v1156_v23, %v1156_v23  ;;  %v1189_v60 = vmul.f32 %v1157_v28, %v1157_v28  ;;  %v1064_v26 = vmul.f32 %v1032_v2, %v1032_v2  ;;  %v4829_v23 = vld [vmem:[#allocation11_spill] sm:$0xff] }
 0x1ca   :  { %v1234_v29 = vadd.f32 %v1233_v4, %v1202_v53  ;;  %v1095_v10 = vadd.f32 %v1094_v7, %v1063_v47  ;;  %v1160_v1 = vsub.f32 %v4827_v32, %v3694_v6  ;;  %v1065_v52 = vmul.f32 %v1033_v63, %v1033_v63  ;;  %v4830_v4 = vld [vmem:[#allocation10_spill] sm:$0xff] }
 0x1cb   :  { %v1161_v51 = vsub.f32 %v3569_v39, %v3694_v6  ;;  %v1190_v0 = vmul.f32 %v1158_v49, %v1158_v49  ;;  %v1220_v38 = vadd.f32 %v1189_v60, %v1188_v8  ;;  %v1020_v43 = vsub.f32 %v4828_v55, %v3694_v6 }
 0x1cc   :  { %v1235_v37 = vadd.f32 %v1234_v29, %v1203_v5  ;;  %v1096_v54 = vadd.f32 %v1095_v10, %v1064_v26  ;;  %v1021_v28 = vsub.f32 %v4829_v23, %v3694_v6  ;;  %v1191_v53 = vmul.f32 %v1159_v40, %v1159_v40  ;;  %v4831_v10 = vld [vmem:[#allocation12_spill] sm:$0xff] }
 0x1cd   :  { %v1221_v2 = vadd.f32 %v1220_v38, %v1190_v0  ;;  %v1022_v47 = vsub.f32 %v4830_v4, %v3694_v6  ;;  %v1066_v63 = vmul.f32 %v1034_v41, %v1034_v41  ;;  %v1162_v49 = vsub.f32 %v3567_v36, %v3694_v6  ;;  %v4832_v41 = vld [vmem:[#allocation19_spill] sm:$0xff] }
 0x1ce   :  { %1236 = vadd.xlane.f32.xlu1 %v1235_v37  ;;  %v1097_v7 = vadd.f32 %v1096_v54, %v1065_v52  ;;  %v1192_v8 = vmul.f32 %v1160_v1, %v1160_v1  ;;  %v1023_v60 = vsub.f32 %v4831_v10, %v3694_v6  ;;  %v1052_v29 = vmul.f32 %v1020_v43, %v1020_v43 }
 0x1cf   :  { %v1222_v5 = vadd.f32 %v1221_v2, %v1191_v53  ;;  %v1053_v26 = vmul.f32 %v1021_v28, %v1021_v28  ;;  %v1067_v32 = vmul.f32 %v1035_v3, %v1035_v3  ;;  %v1163_v40 = vsub.f32 %v3574_v45, %v3694_v6 }
 0x1d0   :  { %v1098_v39 = vadd.f32 %v1097_v7, %v1066_v63  ;;  %v1193_v0 = vmul.f32 %v1161_v51, %v1161_v51  ;;  %v1024_v54 = vsub.f32 %v4832_v41, %v3694_v6  ;;  %v1054_v52 = vmul.f32 %v1022_v47, %v1022_v47  ;;  %v4833_v47 = vld [vmem:[#allocation20_spill] sm:$0xff] }
 0x1d1   :  { %v1223_v38 = vadd.f32 %v1222_v5, %v1192_v8  ;;  %v1084_v37 = vadd.f32 %v1053_v26, %v1052_v29  ;;  %v1194_v1 = vmul.f32 %v1162_v49, %v1162_v49  ;;  %v1025_v2 = vsub.f32 %v3482_v25, %v3694_v6 }
 0x1d2   :  { %v1099_v36 = vadd.f32 %v1098_v39, %v1067_v32  ;;  %v1055_v43 = vmul.f32 %v1023_v60, %v1023_v60  ;;  %v1195_v3 = vmul.f32 %v1163_v40, %v1163_v40  ;;  %v1026_v51 = vsub.f32 %v3480_v24, %v3694_v6 }
 0x1d3   :  { %v1224_v53 = vadd.f32 %v1223_v38, %v1193_v0  ;;  %v1085_v28 = vadd.f32 %v1084_v37, %v1054_v52  ;;  %v1056_v7 = vmul.f32 %v1024_v54, %v1024_v54  ;;  %v1027_v29 = vsub.f32 %v4833_v47, %v3694_v6 }
 0x1d4   :  { %1100 = vadd.xlane.f32.xlu0 %v1099_v36  ;;  %v1057_v39 = vmul.f32 %v1025_v2, %v1025_v2  ;;  %v1058_v49 = vmul.f32 %v1026_v51, %v1026_v51  ;;  %v3278_v36 = vmov 0  }
 0x1d5   :  { %v1225_v63 = vadd.f32 %v1224_v53, %v1194_v1  ;;  %v1086_v8 = vadd.f32 %v1085_v28, %v1055_v43  ;;  %v1059_v0 = vmul.f32 %v1027_v29, %v1027_v29  ;;  %3213 = vset.pattern.permute.xlu1 %v3278_v36  ;;  %3212 = vset.pattern.permute.xlu0 %v3278_v36 }
 0x1d7   :  { %v1226_v5 = vadd.f32 %v1225_v63, %v1195_v3  ;;  %v1087_v32 = vadd.f32 %v1086_v8, %v1056_v7  ;;  %v1262_v63 = vld [vmem:[%s4647_s3 + $0x10] sm:$0xff] }
 0x1d9   :  { %1227 = vadd.xlane.f32.xlu1 %v1226_v5  ;;  %v1088_v26 = vadd.f32 %v1087_v32, %v1057_v39 }
 0x1db   :  { %v1089_v60 = vadd.f32 %v1088_v26, %v1058_v49  ;;  %v1263_v49 = vld [vmem:[%s4647_s3 + $0x18] sm:$0xff] }
 0x1dd   :  { %v1090_v38 = vadd.f32 %v1089_v60, %v1059_v0 }
 0x1df   :  { %1091 = vadd.xlane.f32.xlu0 %v1090_v38 }
 0x242   :  { %v1246_v40 = vpop.xlane.xlu1 %1245 }
 0x246   :  { %v1110_v52 = vpop.xlane.xlu0 %1109 }
 0x247   :  { %v1258_v54 = vadd.f32 %v1246_v40, %v1110_v52 }
 0x249   :  { %v1266_v37 = vmul.f32 0.00048828125, %v1258_v54  ;;  %v1261_v54 = vld [vmem:[%s4647_s3 + $0x8] sm:$0xff] }
 0x24b   :  { %v1270_v1 = vadd.f32 1e-05, %v1266_v37  ;;  %v1255_v53 = vpop.xlane.xlu1 %1254 }
 0x24d   :  { %3214 = vrsqrt.f32 %v1270_v1 }
 0x251   :  { %v1119_v43 = vpop.xlane.xlu0 %1118 }
 0x252   :  { %v1259_v2 = vadd.f32 %v1255_v53, %v1119_v43  ;;  %v1260_v53 = vld [vmem:[%s4647_s3] sm:$0xff] }
 0x254   :  { %v1267_v28 = vmul.f32 0.00048828125, %v1259_v2 }
 0x256   :  { %v1271_v3 = vadd.f32 1e-05, %v1267_v28 }
 0x257   :  { %v1237_v7 = vpop.xlane.xlu1 %1236 }
 0x258   :  { %3216 = vrsqrt.f32 %v1271_v3  ;;  %v1282_v3 = vld [vmem:[%s4648_s4 + $0x10] sm:$0xff] }
 0x25a   :  { %v3215_v51 = vpop.eup %3214 }
 0x25b   :  { %v1278_v8 = vmul.f32 %v3215_v51, %v1262_v63 }
 0x25d   :  { %v1101_v5 = vpop.xlane.xlu0 %1100  ;;  %1304 = vperm.xlu1 %3213, %v1278_v8   ;;  %v1286_v28 = vmul.f32 %v1278_v8, %v3636_v12  ;;  %v1281_v12 = vld [vmem:[%s4648_s4 + $0x8] sm:$0xff] }
 0x25e   :  { %v1257_v29 = vadd.f32 %v1237_v7, %v1101_v5  ;;  %v1283_v7 = vld [vmem:[%s4648_s4 + $0x18] sm:$0xff] }
 0x25f   :  { %v1290_v63 = vsub.f32 %v1282_v3, %v1286_v28  ;;  %v4838_v28 = vld [vmem:[#allocation22_spill] sm:$0xff] }
 0x260   :  { %v1265_v39 = vmul.f32 0.00048828125, %v1257_v29 }
 0x262   :  { %v1269_v32 = vadd.f32 1e-05, %v1265_v39  ;;  %v1228_v0 = vpop.xlane.xlu1 %1227 }
 0x264   :  { %3218 = vrsqrt.f32 %v1269_v32 }
 0x265   :  { %v3217_v26 = vpop.eup %3216 }
 0x266   :  { %v1279_v60 = vmul.f32 %v3217_v26, %v1263_v49 }
 0x268   :  { %v1092_v38 = vpop.xlane.xlu0 %1091  ;;  %1309 = vperm.xlu0 %3212, %v1279_v60   ;;  %v1287_v51 = vmul.f32 %v1279_v60, %v3658_v27  ;;  %v1280_v27 = vld [vmem:[%s4648_s4] sm:$0xff] }
 0x269   :  { %v1256_v36 = vadd.f32 %v1228_v0, %v1092_v38  ;;  %v4834_v38 = vld [vmem:[#allocation18_spill] sm:$0xff] }
 0x26a   :  { %v1291_v5 = vsub.f32 %v1283_v7, %v1287_v51 }
 0x26b   :  { %v1264_v40 = vmul.f32 0.00048828125, %v1256_v36 }
 0x26d   :  { %v1268_v52 = vadd.f32 1e-05, %v1264_v40  ;;  %v4835_v40 = vld [vmem:[#allocation17_spill] sm:$0xff] }
 0x26f   :  { %3220 = vrsqrt.f32 %v1268_v52 }
 0x271   :  { %v3219_v37 = vpop.eup %3218 }
 0x272   :  { %v1277_v1 = vmul.f32 %v3219_v37, %v1261_v54  ;;  %v4836_v37 = vld [vmem:[#allocation24_spill] sm:$0xff] }
 0x274   :  { %1299 = vperm.xlu1 %3213, %v1277_v1   ;;  %v1285_v29 = vmul.f32 %v1277_v1, %v3664_v14 }
 0x276   :  { %v1289_v8 = vsub.f32 %v1281_v12, %v1285_v29 }
 0x27c   :  { %v3221_v43 = vpop.eup %3220 }
 0x27d   :  { %v1276_v2 = vmul.f32 %v3221_v43, %v1260_v53  ;;  %v4837_v53 = vld [vmem:[#allocation25_spill] sm:$0xff] }
 0x27f   :  { %1294 = vperm.xlu1 %3213, %v1276_v2   ;;  %v1284_v39 = vmul.f32 %v1276_v2, %v3694_v6 }
 0x281   :  { %v1288_v32 = vsub.f32 %v1280_v27, %v1284_v39 }
 0x283   :  { %1356 = vperm.xlu1 %3213, %v1290_v63   ;;  %v4839_v63 = vld [vmem:[#allocation23_spill] sm:$0xff] }
 0x287   :  { %1361 = vperm.xlu1 %3213, %v1291_v5  }
 0x28b   :  { %1351 = vperm.xlu1 %3213, %v1289_v8  }
 0x28f   :  { %1346 = vperm.xlu1 %3213, %v1288_v32  }
 0x2d8   :  { %v3800_v49 = vpop.permute.xlu1 %1304 }
 0x2d9   :  { %v1329_v6 = vmul.f32 %v3800_v49, %v4834_v38  ;;  %v1331_v36 = vmul.f32 %v3800_v49, %v3466_v17  ;;  %v1328_v52 = vmul.f32 %v3800_v49, %v4835_v40  ;;  %v1330_v54 = vmul.f32 %v3800_v49, %v3462_v15 }
 0x2da   :  { %v3820_v1 = vmul.f32 %v3800_v49, %v4836_v37  ;;  %v3824_v43 = vmul.f32 %v3800_v49, %v4837_v53  ;;  %v3832_v3 = vmul.f32 %v3800_v49, %v4838_v28  ;;  %v3836_v15 = vmul.f32 %v3800_v49, %v4839_v63 }
 0x2e3   :  { %v3806_v0 = vpop.permute.xlu0 %1309 }
 0x2e4   :  { %v1337_v2 = vmul.f32 %v3806_v0, %v3472_v20  ;;  %v1339_v17 = vmul.f32 %v3806_v0, %v3476_v22  ;;  %v1336_v51 = vmul.f32 %v3806_v0, %v3468_v18  ;;  %v1338_v7 = vmul.f32 %v3806_v0, %v3470_v19 }
 0x2e5   :  { %v1341_v20 = vmul.f32 %v3806_v0, %v3516_v46  ;;  %v1343_v22 = vmul.f32 %v3806_v0, %v3519_v48  ;;  %v1340_v18 = vmul.f32 %v3806_v0, %v3510_v42 }
 0x2ef   :  { %v3802_v26 = vpop.permute.xlu1 %1299 }
 0x2f0   :  { %v1321_v8 = vmul.f32 %v3802_v26, %v4819_v9  ;;  %v1323_v38 = vmul.f32 %v3802_v26, %v4821_v16  ;;  %v1320_v9 = vmul.f32 %v3802_v26, %v4818_v50 }
 0x2fa   :  { %v3804_v14 = vpop.permute.xlu1 %1294 }
 0x2fe   :  { %v3808_v60 = vpop.permute.xlu1 %1356 }
 0x2ff   :  { %v1381_v29 = vadd.f32 %v3808_v60, %v1329_v6  ;;  %v1383_v12 = vadd.f32 %v3808_v60, %v1331_v36  ;;  %v1380_v27 = vadd.f32 %v3808_v60, %v1328_v52  ;;  %v1382_v32 = vadd.f32 %v3808_v60, %v1330_v54 }
 0x300   :  { %v1313_v52 = vmul.f32 %v3804_v14, %v4829_v23  ;;  %v1342_v54 = vmul.f32 %v3806_v0, %v3513_v44  ;;  %v1315_v23 = vmul.f32 %v3804_v14, %v4831_v10  ;;  %v1325_v10 = vmul.f32 %v3802_v26, %v3493_v31 }
 0x301   :  { %v1413_v53 = vmax.f32 %v1381_v29, 0.0  ;;  %v1415_v16 = vmax.f32 %v1383_v12, 0.0  ;;  %v1412_v63 = vmax.f32 %v1380_v27, 0.0  ;;  %v1312_v12 = vmul.f32 %v3804_v14, %v4828_v55 }
 0x302   :  { %v3846_v5 = vpop.permute.xlu1 %1361 }
 0x303   :  { %v1389_v19 = vadd.f32 %v3846_v5, %v1337_v2  ;;  %v1391_v39 = vadd.f32 %v3846_v5, %v1339_v17  ;;  %v1388_v46 = vadd.f32 %v3846_v5, %v1336_v51  ;;  %v1390_v48 = vadd.f32 %v3846_v5, %v1338_v7 }
 0x304   :  { %v1322_v2 = vmul.f32 %v3802_v26, %v4820_v35  ;;  %v1414_v51 = vmax.f32 %v1382_v32, 0.0  ;;  %v1394_v31 = vadd.f32 %v3846_v5, %v1342_v54 }
 0x305   :  { %v1421_v6 = vmax.f32 %v1389_v19, 0.0  ;;  %v1423_v42 = vmax.f32 %v1391_v39, 0.0  ;;  %v1420_v36 = vmax.f32 %v1388_v46, 0.0  ;;  %v1422_v40 = vmax.f32 %v1390_v48, 0.0 }
 0x306   :  { %v3864_v37 = vpop.permute.xlu1 %1351  ;;  %v1314_v39 = vmul.f32 %v3804_v14, %v4830_v4  ;;  %v1393_v46 = vadd.f32 %v3846_v5, %v1341_v20  ;;  %v1392_v4 = vadd.f32 %v3846_v5, %v1340_v18  ;;  %v1324_v18 = vmul.f32 %v3802_v26, %v4822_v33 }
 0x307   :  { %1464 = vmatprep.subr.mxu0 %v1421_v6  ;;  %1553 = vmatprep.subr.mxu1 %v1423_v42  ;;  %v1373_v50 = vadd.f32 %v3864_v37, %v1321_v8  ;;  %v1375_v17 = vadd.f32 %v3864_v37, %v1323_v38  ;;  %v1372_v28 = vadd.f32 %v3864_v37, %v1320_v9  ;;  %v1426_v33 = vmax.f32 %v1394_v31, 0.0 }
 0x308   :  { %1465 = vmatpush1.msra.mxu0 %v1420_v36  ;;  %1554 = vmatpush1.msra.mxu1 %v1422_v40  ;;  %v1374_v35 = vadd.f32 %v3864_v37, %v1322_v2  ;;  %v1395_v38 = vadd.f32 %v3846_v5, %v1343_v22  ;;  %v3897_v36 = vld [vmem:[%s4646_s2] sm:$0xff]  ;;  %v1385_v40 = vadd.f32 %v3808_v60, %v3820_v1  ;;  %v1425_v1 = vmax.f32 %v1393_v46, 0.0 }
 0x309   :  { %1466 = vmatprep.subr.mxu0 %v1413_v53  ;;  %1555 = vmatprep.subr.mxu1 %v1415_v16  ;;  %v1405_v44 = vmax.f32 %v1373_v50, 0.0  ;;  %v1407_v7 = vmax.f32 %v1375_v17, 0.0  ;;  %v1404_v29 = vmax.f32 %v1372_v28, 0.0  ;;  %v1387_v53 = vadd.f32 %v3808_v60, %v3824_v43 }
 0x30a   :  { %v3880_v8 = vpop.permute.xlu1 %1346  ;;  %1467 = vmatpush1.msra.mxu0 %v1412_v63  ;;  %1556 = vmatpush1.msra.mxu1 %v1414_v51  ;;  %v1406_v19 = vmax.f32 %v1374_v35, 0.0  ;;  %v1327_v22 = vmul.f32 %v3802_v26, %v3497_v34  ;;  %v1326_v2 = vmul.f32 %v3802_v26, %v3491_v30  ;;  %v1427_v54 = vmax.f32 %v1395_v38, 0.0  ;;  %v3932_v35 = vld [vmem:[%s4646_s2 + $0x8] sm:$0xff] }
 0x30b   :  { %1468 = vmatprep.subr.mxu0 %v1405_v44  ;;  %1557 = vmatprep.subr.mxu1 %v1407_v7  ;;  %v1365_v48 = vadd.f32 %v3880_v8, %v1313_v52  ;;  %v1367_v27 = vadd.f32 %v3880_v8, %v1315_v23  ;;  %v1364_v55 = vadd.f32 %v3880_v8, %v1312_v12  ;;  %v1424_v30 = vmax.f32 %v1392_v4, 0.0 }
 0x30c   :  { %1469 = vmatpush1.msra.mxu0 %v1404_v29  ;;  %1558 = vmatpush1.msra.mxu1 %v1406_v19  ;;  %v1366_v32 = vadd.f32 %v3880_v8, %v1314_v39  ;;  %v1317_v52 = vmul.f32 %v3804_v14, %v3482_v25  ;;  %v1384_v43 = vadd.f32 %v3808_v60, %v3832_v3  ;;  %v1417_v3 = vmax.f32 %v1385_v40, 0.0  ;;  %v4841_v29 = vld [vmem:[#allocation36_spill] sm:$0xff]  ;;  %v4842_v40 = vld [vmem:[#allocation34_spill] sm:$0xff] }
 0x30d   :  { %v1397_v20 = vmax.f32 %v1365_v48, 0.0  ;;  %v1399_v9 = vmax.f32 %v1367_v27, 0.0  ;;  %v1396_v6 = vmax.f32 %v1364_v55, 0.0  ;;  %v1386_v34 = vadd.f32 %v3808_v60, %v3836_v15 }
 0x30e   :  { %v1398_v42 = vmax.f32 %v1366_v32, 0.0  ;;  %v1319_v25 = vmul.f32 %v3804_v14, %v4833_v47  ;;  %v1316_v16 = vmul.f32 %v3804_v14, %v4832_v41  ;;  %v1419_v50 = vmax.f32 %v1387_v53, 0.0 }
 0x30f   :  { %1470 = vmatprep.subr.mxu0 %v1397_v20  ;;  %1559 = vmatprep.subr.mxu1 %v1399_v9  ;;  %v1377_v15 = vadd.f32 %v3864_v37, %v1325_v10  ;;  %v1379_v17 = vadd.f32 %v3864_v37, %v1327_v22  ;;  %v1376_v28 = vadd.f32 %v3864_v37, %v1324_v18  ;;  %v1416_v41 = vmax.f32 %v1384_v43, 0.0  ;;  %v3953_v9 = vld [vmem:[%s4646_s2 + $0x10] sm:$0xff]  ;;  %v4846_v43 = vld [vmem:[#allocation30_spill] sm:$0xff] }
 0x310   :  { %1471 = vmatpush1.msra.mxu0 %v1396_v6  ;;  %1560 = vmatpush1.msra.mxu1 %v1398_v42  ;;  %v1378_v63 = vadd.f32 %v3864_v37, %v1326_v2  ;;  %v1318_v47 = vmul.f32 %v3804_v14, %v3480_v24  ;;  %v1418_v51 = vmax.f32 %v1386_v34, 0.0  ;;  %v1369_v23 = vadd.f32 %v3880_v8, %v1317_v52  ;;  %v3964_v42 = vld [vmem:[%s4646_s2 + $0x18] sm:$0xff]  ;;  %v4843_v22 = vld [vmem:[#allocation35_spill] sm:$0xff] }
 0x311   :  { %3174 = vmatmul.mubr.msk.f32.vlgmr.msra.gmra.mxu0 %vm81_vm0, %v3897_v36  ;;  %3178 = vmatmul.mubr.msk.f32.vlgmr.msra.gmra.mxu1 %vm81_vm0, %v3897_v36  ;;  %v1371_v44 = vadd.f32 %v3880_v8, %v1319_v25  ;;  %v4840_v7 = vmov 0.0   ;;  %v1925_v24 = vmul.f32 %v3806_v0, %v4841_v29  ;;  %v1927_v12 = vmul.f32 %v3806_v0, %v3558_v21  ;;  %v4844_v2 = vld [vmem:[#allocation32_spill] sm:$0xff]  ;;  %v4847_v25 = vld [vmem:[#allocation31_spill] sm:$0xff] }
 0x312   :  { %1642 = vmatprep.subr.mxu0 %v1425_v1  ;;  %1731 = vmatprep.subr.mxu1 %v1427_v54  ;;  %v1409_v19 = vmax.f32 %v1377_v15, 0.0  ;;  %v1411_v39 = vmax.f32 %v1379_v17, 0.0  ;;  %v1368_v46 = vadd.f32 %v3880_v8, %v1316_v16  ;;  %v1370_v10 = vadd.f32 %v3880_v8, %v1318_v47  ;;  %v4845_v1 = vld [vmem:[#allocation33_spill] sm:$0xff] }
 0x313   :  { %1643 = vmatpush1.msra.mxu0 %v1424_v30  ;;  %1732 = vmatpush1.msra.mxu1 %v1426_v33  ;;  %v1408_v48 = vmax.f32 %v1376_v28, 0.0  ;;  %v1410_v27 = vmax.f32 %v1378_v63, 0.0  ;;  %v1401_v55 = vmax.f32 %v1369_v23, 0.0  ;;  %v1403_v21 = vmax.f32 %v1371_v44, 0.0 }
 0x314   :  { %1644 = vmatprep.subr.mxu0 %v1417_v3  ;;  %1733 = vmatprep.subr.mxu1 %v1419_v50  ;;  %v1957_v32 = vadd.f32 %v1925_v24, %v3846_v5  ;;  %v1959_v38 = vadd.f32 %v1927_v12, %v3846_v5  ;;  %v1400_v4 = vmax.f32 %v1368_v46, 0.0  ;;  %v1402_v20 = vmax.f32 %v1370_v10, 0.0 }
 0x315   :  { %1510 = vmatprep.mubr.f32.mxu0 %v4840_v7  ;;  %1599 = vmatprep.mubr.f32.mxu1 %v4840_v7  ;;  %v1924_v53 = vmul.f32 %v3806_v0, %v4842_v40  ;;  %v1926_v18 = vmul.f32 %v3806_v0, %v4843_v22  ;;  %v1917_v52 = vmul.f32 %v3800_v49, %v4844_v2 }
 0x316   :  { %1645 = vmatpush1.msra.mxu0 %v1416_v41  ;;  %1734 = vmatpush1.msra.mxu1 %v1418_v51  ;;  %v1989_v6 = vmax.f32 %v1957_v32, 0.0  ;;  %v1991_v31 = vmax.f32 %v1959_v38, 0.0  ;;  %v1919_v54 = vmul.f32 %v3800_v49, %v4845_v1  ;;  %v1916_v34 = vmul.f32 %v3800_v49, %v4846_v43  ;;  %v4850_v1 = vld [vmem:[#allocation48_spill] sm:$0xff]  ;;  %v4851_v43 = vld [vmem:[#allocation49_spill] sm:$0xff] }
 0x317   :  { %3175 = vmatmul.mubr.msk.f32.gmra.mxu0 %vm81_vm0, %v3932_v35  ;;  %3179 = vmatmul.mubr.msk.f32.gmra.mxu1 %vm81_vm0, %v3932_v35  ;;  %v1956_v30 = vadd.f32 %v1924_v53, %v3846_v5  ;;  %v1958_v33 = vadd.f32 %v1926_v18, %v3846_v5  ;;  %v1918_v16 = vmul.f32 %v3800_v49, %v4847_v25  ;;  %v4853_v25 = vld [vmem:[#allocation47_spill] sm:$0xff] }
 0x318   :  { %1646 = vmatprep.subr.mxu0 %v1409_v19  ;;  %1735 = vmatprep.subr.mxu1 %v1411_v39  ;;  %v1929_v3 = vmul.f32 %v3806_v0, %v3616_v13  ;;  %v1949_v50 = vadd.f32 %v1917_v52, %v3808_v60  ;;  %v1951_v15 = vadd.f32 %v1919_v54, %v3808_v60 }
 0x319   :  { %1647 = vmatpush1.msra.mxu0 %v1408_v48  ;;  %1736 = vmatpush1.msra.mxu1 %v1410_v27  ;;  %v1909_v17 = vmul.f32 %v3802_v26, %v3536_v58  ;;  %v1948_v28 = vadd.f32 %v1916_v34, %v3808_v60  ;;  %v1950_v13 = vadd.f32 %v1918_v16, %v3808_v60  ;;  %v1988_v23 = vmax.f32 %v1956_v30, 0.0  ;;  %v4849_v27 = vld [vmem:[#allocation50_spill] sm:$0xff] }
 0x31a   :  { %1648 = vmatprep.subr.mxu0 %v1401_v55  ;;  %1737 = vmatprep.subr.mxu1 %v1403_v21  ;;  %v1911_v63 = vmul.f32 %v3802_v26, %v3538_v59  ;;  %v1908_v47 = vmul.f32 %v3802_v26, %v3532_v56  ;;  %v1910_v41 = vmul.f32 %v3802_v26, %v3534_v57  ;;  %v1990_v44 = vmax.f32 %v1958_v33, 0.0  ;;  %v4852_v30 = vld [vmem:[#allocation46_spill] sm:$0xff] }
 0x31b   :  { %1516 = vmatprep.mubr.f32.mxu0 %v4840_v7  ;;  %1605 = vmatprep.mubr.f32.mxu1 %v4840_v7  ;;  %v1901_v58 = vmul.f32 %v3804_v14, %v4824_v61  ;;  %v1903_v51 = vmul.f32 %v3804_v14, %v4826_v62  ;;  %v1941_v29 = vadd.f32 %v1909_v17, %v3864_v37  ;;  %v1981_v56 = vmax.f32 %v1949_v50, 0.0  ;;  %v4848_v61 = vld [vmem:[#allocation27_spill] sm:$0xff] }
 0x31c   :  { %1649 = vmatpush1.msra.mxu0 %v1400_v4  ;;  %1738 = vmatpush1.msra.mxu1 %v1402_v20  ;;  %v1943_v24 = vadd.f32 %v1911_v63, %v3864_v37  ;;  %v1983_v57 = vmax.f32 %v1951_v15, 0.0  ;;  %v1900_v59 = vmul.f32 %v3804_v14, %v4823_v11  ;;  %v1902_v62 = vmul.f32 %v3804_v14, %v4848_v61  ;;  %v4855_v15 = vld [vmem:[#allocation45_spill] sm:$0xff]  ;;  %v4856_v63 = vld [vmem:[#allocation42_spill] sm:$0xff] }
 0x31d   :  { %3176 = vmatmul.mubr.msk.f32.gmra.mxu0 %vm81_vm0, %v3953_v9  ;;  %3180 = vmatmul.mubr.msk.f32.gmra.mxu1 %vm81_vm0, %v3953_v9  ;;  %v1980_v12 = vmax.f32 %v1948_v28, 0.0  ;;  %v1982_v19 = vmax.f32 %v1950_v13, 0.0  ;;  %v1940_v39 = vadd.f32 %v1908_v47, %v3864_v37  ;;  %v1942_v46 = vadd.f32 %v1910_v41, %v3864_v37 }
 0x31e   :  { %2020 = vmatprep.subr.mxu0 %v1989_v6  ;;  %2109 = vmatprep.subr.mxu1 %v1991_v31  ;;  %v1933_v10 = vadd.f32 %v1901_v58, %v3880_v8  ;;  %v1935_v48 = vadd.f32 %v1903_v51, %v3880_v8  ;;  %v1931_v11 = vmul.f32 %v3806_v0, %v4849_v27  ;;  %v1973_v55 = vmax.f32 %v1941_v29, 0.0  ;;  %v4858_v51 = vld [vmem:[#allocation40_spill] sm:$0xff]  ;;  %v4859_v29 = vld [vmem:[#allocation41_spill] sm:$0xff] }
 0x31f   :  { %1522 = vmatprep.mubr.f32.mxu0 %v4840_v7  ;;  %1611 = vmatprep.mubr.f32.mxu1 %v4840_v7  ;;  %v1975_v21 = vmax.f32 %v1943_v24, 0.0  ;;  %v1932_v32 = vadd.f32 %v1900_v59, %v3880_v8  ;;  %v1934_v38 = vadd.f32 %v1902_v62, %v3880_v8  ;;  %v1972_v4 = vmax.f32 %v1940_v39, 0.0  ;;  %v4861_v62 = vld [vmem:[#allocation37_spill] sm:$0xff] }
 0x320   :  { %v1974_v20 = vmax.f32 %v1942_v46, 0.0  ;;  %v1961_v6 = vadd.f32 %v1929_v3, %v3846_v5  ;;  %v1963_v31 = vadd.f32 %v1931_v11, %v3846_v5  ;;  %v1965_v40 = vmax.f32 %v1933_v10, 0.0  ;;  %v4854_v3 = vld [vmem:[#allocation44_spill] sm:$0xff]  ;;  %v4862_v10 = vld [vmem:[#allocation38_spill] sm:$0xff] }
 0x321   :  { %3177 = vmatmul.mubr.msk.f32.gmra.mxu0 %vm81_vm0, %v3964_v42  ;;  %3181 = vmatmul.mubr.msk.f32.gmra.mxu1 %vm81_vm0, %v3964_v42  ;;  %v1967_v53 = vmax.f32 %v1935_v48, 0.0  ;;  %v1964_v22 = vmax.f32 %v1932_v32, 0.0  ;;  %v1966_v18 = vmax.f32 %v1934_v38, 0.0  ;;  %v1928_v54 = vmul.f32 %v3806_v0, %v4850_v1 }
 0x322   :  { %1682 = vmatprep.mubr.f32.mxu0 %v4840_v7  ;;  %1771 = vmatprep.mubr.f32.mxu1 %v4840_v7  ;;  %v1993_v2 = vmax.f32 %v1961_v6, 0.0  ;;  %v1995_v52 = vmax.f32 %v1963_v31, 0.0  ;;  %v1930_v34 = vmul.f32 %v3806_v0, %v4851_v43  ;;  %v1921_v33 = vmul.f32 %v3800_v49, %v4852_v30  ;;  %v4857_v0 = vld [vmem:[#allocation43_spill] sm:$0xff] }
 0x323   :  { %v1923_v16 = vmul.f32 %v3800_v49, %v4853_v25  ;;  %v1920_v50 = vmul.f32 %v3800_v49, %v4854_v3  ;;  %v1922_v17 = vmul.f32 %v3800_v49, %v4855_v15  ;;  %v1960_v28 = vadd.f32 %v1928_v54, %v3846_v5 }
 0x324   :  { %v1962_v13 = vadd.f32 %v1930_v34, %v3846_v5  ;;  %v1913_v47 = vmul.f32 %v3802_v26, %v4856_v63  ;;  %v1915_v41 = vmul.f32 %v3802_v26, %v4857_v0  ;;  %v1953_v58 = vadd.f32 %v1921_v33, %v3808_v60 }
 0x325   :  { %3182 = vmatmul.mubr.msk.f32.vlgmr.msra.gmra.mxu0 %vm81_vm0, %v3897_v36  ;;  %3186 = vmatmul.mubr.msk.f32.vlgmr.msra.gmra.mxu1 %vm81_vm0, %v3897_v36  ;;  %v1955_v49 = vadd.f32 %v1923_v16, %v3808_v60  ;;  %v1952_v5 = vadd.f32 %v1920_v50, %v3808_v60  ;;  %v1914_v24 = vmul.f32 %v3802_v26, %v4859_v29 }
 0x326   :  { %2021 = vmatpush1.msra.mxu0 %v1988_v23  ;;  %2110 = vmatpush1.msra.mxu1 %v1990_v44  ;;  %v1912_v23 = vmul.f32 %v3802_v26, %v4858_v51  ;;  %v1954_v44 = vadd.f32 %v1922_v17, %v3808_v60  ;;  %v1907_v61 = vmul.f32 %v3804_v14, %v3574_v45  ;;  %v1994_v39 = vmax.f32 %v1962_v13, 0.0 }
 0x327   :  { %2022 = vmatprep.subr.mxu0 %v1981_v56  ;;  %2111 = vmatprep.subr.mxu1 %v1983_v57  ;;  %v1945_v56 = vadd.f32 %v1913_v47, %v3864_v37  ;;  %v4860_v57 = vld [vmem:[#allocation39_spill] sm:$0xff]  ;;  %v1947_v46 = vadd.f32 %v1915_v41, %v3864_v37  ;;  %v1906_v60 = vmul.f32 %v3804_v14, %v4862_v10  ;;  %v1985_v26 = vmax.f32 %v1953_v58, 0.0 }
 0x328   :  { %2023 = vmatpush1.msra.mxu0 %v1980_v12  ;;  %2112 = vmatpush1.msra.mxu1 %v1982_v19  ;;  %v1905_v59 = vmul.f32 %v3804_v14, %v4860_v57  ;;  %v1904_v12 = vmul.f32 %v3804_v14, %v4861_v62  ;;  %v1992_v19 = vmax.f32 %v1960_v28, 0.0  ;;  %v1987_v48 = vmax.f32 %v1955_v49, 0.0 }
 0x329   :  { %1688 = vmatprep.mubr.f32.mxu0 %v4840_v7  ;;  %1777 = vmatprep.mubr.f32.mxu1 %v4840_v7  ;;  %v1944_v45 = vadd.f32 %v1912_v23, %v3864_v37  ;;  %v1946_v27 = vadd.f32 %v1914_v24, %v3864_v37  ;;  %v1984_v11 = vmax.f32 %v1952_v5, 0.0  ;;  %v1939_v14 = vadd.f32 %v1907_v61, %v3880_v8 }
 0x32a   :  { %2024 = vmatprep.subr.mxu0 %v1973_v55  ;;  %2113 = vmatprep.subr.mxu1 %v1975_v21  ;;  %v1986_v55 = vmax.f32 %v1954_v44, 0.0  ;;  %v1937_v21 = vadd.f32 %v1905_v59, %v3880_v8  ;;  %v1977_v32 = vmax.f32 %v1945_v56, 0.0  ;;  %v1936_v38 = vadd.f32 %v1904_v12, %v3880_v8 }
 0x32b   :  { %3183 = vmatmul.mubr.msk.f32.gmra.mxu0 %vm81_vm0, %v3932_v35  ;;  %3187 = vmatmul.mubr.msk.f32.gmra.mxu1 %vm81_vm0, %v3932_v35  ;;  %v1976_v37 = vmax.f32 %v1944_v45, 0.0  ;;  %v1978_v6 = vmax.f32 %v1946_v27, 0.0 }
 0x32c   :  { %2025 = vmatpush1.msra.mxu0 %v1972_v4  ;;  %2114 = vmatpush1.msra.mxu1 %v1974_v20  ;;  %v1938_v4 = vadd.f32 %v1906_v60, %v3880_v8  ;;  %v1979_v20 = vmax.f32 %v1947_v46, 0.0  ;;  %v1969_v31 = vmax.f32 %v1937_v21, 0.0 }
 0x32d   :  { %2026 = vmatprep.subr.mxu0 %v1965_v40  ;;  %2115 = vmatprep.subr.mxu1 %v1967_v53  ;;  %v1971_v40 = vmax.f32 %v1939_v14, 0.0  ;;  %v1968_v53 = vmax.f32 %v1936_v38, 0.0 }
 0x32e   :  { %2027 = vmatpush1.msra.mxu0 %v1964_v22  ;;  %2116 = vmatpush1.msra.mxu1 %v1966_v18  ;;  %v1970_v22 = vmax.f32 %v1938_v4, 0.0 }
 0x32f   :  { %1694 = vmatprep.mubr.f32.mxu0 %v4840_v7  ;;  %1783 = vmatprep.mubr.f32.mxu1 %v4840_v7 }
 0x330   :  { %2198 = vmatprep.subr.mxu0 %v1993_v2  ;;  %2287 = vmatprep.subr.mxu1 %v1995_v52 }
 0x331   :  { %3184 = vmatmul.mubr.msk.f32.gmra.mxu0 %vm81_vm0, %v3953_v9  ;;  %3188 = vmatmul.mubr.msk.f32.gmra.mxu1 %vm81_vm0, %v3953_v9 }
 0x332   :  { %1700 = vmatprep.mubr.f32.mxu0 %v4840_v7  ;;  %1789 = vmatprep.mubr.f32.mxu1 %v4840_v7 }
 0x335   :  { %3185 = vmatmul.mubr.msk.f32.gmra.mxu0 %vm81_vm0, %v3964_v42  ;;  %3189 = vmatmul.mubr.msk.f32.gmra.mxu1 %vm81_vm0, %v3964_v42 }
 0x336   :  { %2060 = vmatprep.mubr.f32.mxu0 %v4840_v7  ;;  %2149 = vmatprep.mubr.f32.mxu1 %v4840_v7 }
 0x339   :  { %3190 = vmatmul.mubr.msk.f32.vlgmr.msra.gmra.mxu0 %vm81_vm0, %v3897_v36  ;;  %3194 = vmatmul.mubr.msk.f32.vlgmr.msra.gmra.mxu1 %vm81_vm0, %v3897_v36 }
 0x33a   :  { %2199 = vmatpush1.msra.mxu0 %v1992_v19  ;;  %2288 = vmatpush1.msra.mxu1 %v1994_v39 }
 0x33b   :  { %2200 = vmatprep.subr.mxu0 %v1985_v26  ;;  %2289 = vmatprep.subr.mxu1 %v1987_v48 }
 0x33c   :  { %2201 = vmatpush1.msra.mxu0 %v1984_v11  ;;  %2290 = vmatpush1.msra.mxu1 %v1986_v55 }
 0x33d   :  { %2066 = vmatprep.mubr.f32.mxu0 %v4840_v7  ;;  %2202 = vmatprep.subr.mxu0 %v1977_v32 }
 0x33e   :  { %2291 = vmatprep.subr.mxu1 %v1979_v20  ;;  %3191 = vmatmul.mubr.msk.f32.gmra.mxu0 %vm81_vm0, %v3932_v35 }
 0x33f   :  { %2203 = vmatpush1.msra.mxu0 %v1976_v37  ;;  %2292 = vmatpush1.msra.mxu1 %v1978_v6 }
 0x340   :  { %2204 = vmatprep.subr.mxu0 %v1969_v31  ;;  %2293 = vmatprep.subr.mxu1 %v1971_v40 }
 0x341   :  { %2205 = vmatpush1.msra.mxu0 %v1968_v53  ;;  %2294 = vmatpush1.msra.mxu1 %v1970_v22 }
 0x342   :  { %2072 = vmatprep.mubr.f32.mxu0 %v4840_v7  ;;  %2155 = vmatprep.mubr.f32.mxu1 %v4840_v7 }
 0x343   :  { %3192 = vmatmul.mubr.msk.f32.gmra.mxu0 %vm81_vm0, %v3953_v9  ;;  %3195 = vmatmul.mubr.msk.f32.gmra.mxu1 %vm81_vm0, %v3932_v35 }
 0x344   :  { %2078 = vmatprep.mubr.f32.mxu0 %v4840_v7  ;;  %2161 = vmatprep.mubr.f32.mxu1 %v4840_v7 }
 0x347   :  { %3193 = vmatmul.mubr.msk.f32.gmra.mxu0 %vm81_vm0, %v3964_v42  ;;  %3196 = vmatmul.mubr.msk.f32.gmra.mxu1 %vm81_vm0, %v3953_v9 }
 0x348   :  { %2167 = vmatprep.mubr.f32.mxu1 %v4840_v7  ;;  %2238 = vmatprep.mubr.f32.mxu0 %v4840_v7 }
 0x34b   :  { %3197 = vmatmul.mubr.msk.f32.gmra.mxu1 %vm81_vm0, %v3964_v42  ;;  %3198 = vmatmul.mubr.msk.f32.vlgmr.msra.gmra.mxu0 %vm81_vm0, %v3897_v36 }
 0x34c   :  { %2244 = vmatprep.mubr.f32.mxu0 %v4840_v7  ;;  %2327 = vmatprep.mubr.f32.mxu1 %v4840_v7 }
 0x34f   :  { %3199 = vmatmul.mubr.msk.f32.gmra.mxu0 %vm81_vm0, %v3932_v35  ;;  %3202 = vmatmul.mubr.msk.f32.vlgmr.msra.gmra.mxu1 %vm81_vm0, %v3897_v36 }
 0x350   :  { %2250 = vmatprep.mubr.f32.mxu0 %v4840_v7  ;;  %2333 = vmatprep.mubr.f32.mxu1 %v4840_v7 }
 0x353   :  { %3200 = vmatmul.mubr.msk.f32.gmra.mxu0 %vm81_vm0, %v3953_v9  ;;  %3203 = vmatmul.mubr.msk.f32.gmra.mxu1 %vm81_vm0, %v3932_v35 }
 0x354   :  { %2256 = vmatprep.mubr.f32.mxu0 %v4840_v7  ;;  %2339 = vmatprep.mubr.f32.mxu1 %v4840_v7 }
 0x357   :  { %3201 = vmatmul.mubr.msk.f32.gmra.mxu0 %vm81_vm0, %v3964_v42  ;;  %3204 = vmatmul.mubr.msk.f32.gmra.mxu1 %vm81_vm0, %v3953_v9 }
 0x358   :  { %2345 = vmatprep.mubr.f32.mxu1 %v4840_v7 }
 0x35b   :  { %3205 = vmatmul.mubr.msk.f32.gmra.mxu1 %vm81_vm0, %v3964_v42 }
 0x3d1   :  { %v4134_v8 = vpop.f32.mrf.mxu0  ;;  %v4136_v36 = vpop.f32.mrf.mxu1 }
 0x3d2   :  { %4863 = vst [vmem:[#allocation13_spill] sm:$0xff] %v4134_v8  ;;  %4864 = vst [vmem:[#allocation15_spill] sm:$0xff] %v4136_v36 }
 0x3d3   :  { %v4138_v35 = vpop.f32.mrf.mxu0  ;;  %v4140_v18 = vpop.f32.mrf.mxu1 }
 0x3d4   :  { %4865 = vst [vmem:[#allocation14_spill] sm:$0xff] %v4138_v35  ;;  %4866 = vst [vmem:[#allocation16_spill] sm:$0xff] %v4140_v18  ;;  %v1828_v7 = vadd.f32 %v4138_v35, %v4134_v8 }
 0x3d6   :  { %v1829_v30 = vadd.f32 %v1828_v7, %v4136_v36 }
 0x3d7   :  { %v4142_v2 = vpop.f32.mrf.mxu0  ;;  %v4144_v52 = vpop.f32.mrf.mxu1 }
 0x3d8   :  { %4867 = vst [vmem:[#allocation21_spill] sm:$0xff] %v4142_v2  ;;  %4868 = vst [vmem:[#allocation26_spill] sm:$0xff] %v4144_v52  ;;  %v1830_v15 = vadd.f32 %v1829_v30, %v4140_v18 }
 0x3d9   :  { %v4146_v1 = vpop.f32.mrf.mxu0  ;;  %v4148_v9 = vpop.f32.mrf.mxu1 }
 0x3da   :  { %4869 = vst [vmem:[#allocation28_spill] sm:$0xff] %v4146_v1  ;;  %v1837_v16 = vadd.f32 %v4146_v1, %v4142_v2 }
 0x3dc   :  { %v1838_v13 = vadd.f32 %v1837_v16, %v4144_v52 }
 0x3dd   :  { %v4152_v42 = vpop.f32.mrf.mxu0  ;;  %v4154_v54 = vpop.f32.mrf.mxu1 }
 0x3de   :  { %4870 = vst [vmem:[#allocation29_spill] sm:$0xff] %v4152_v42  ;;  %4871 = vst [vmem:[#allocation9_spill] sm:$0xff] %v4154_v54  ;;  %v1839_v49 = vadd.f32 %v1838_v13, %v4148_v9 }
 0x3df   :  { %v4156_v43 = vpop.f32.mrf.mxu0  ;;  %v4158_v34 = vpop.f32.mrf.mxu1 }
 0x3e0   :  { %4872 = vst [vmem:[#allocation11_spill] sm:$0xff] %v4156_v43  ;;  %4873 = vst [vmem:[#allocation10_spill] sm:$0xff] %v4158_v34  ;;  %v1846_v41 = vadd.f32 %v4156_v43, %v4152_v42 }
 0x3e1   :  { %v4161_v33 = vpop.f32.mrf.mxu0  ;;  %v4163_v25 = vpop.f32.mrf.mxu1 }
 0x3e2   :  { %4874 = vst [vmem:[#allocation12_spill] sm:$0xff] %v4163_v25  ;;  %v1847_v44 = vadd.f32 %v1846_v41, %v4154_v54 }
 0x3e3   :  { %v4167_v3 = vpop.f32.mrf.mxu0  ;;  %v4169_v50 = vpop.f32.mrf.mxu1 }
 0x3e4   :  { %4875 = vst [vmem:[#allocation19_spill] sm:$0xff] %v4167_v3  ;;  %4876 = vst [vmem:[#allocation20_spill] sm:$0xff] %v4169_v50  ;;  %v1855_v29 = vadd.f32 %v4167_v3, %v4161_v33  ;;  %v1848_v62 = vadd.f32 %v1847_v44, %v4158_v34 }
 0x3e5   :  { %v4172_v17 = vpop.f32.mrf.mxu0  ;;  %v4174_v28 = vpop.f32.mrf.mxu1 }
 0x3e6   :  { %4877 = vst [vmem:[#allocation18_spill] sm:$0xff] %v4172_v17  ;;  %4878 = vst [vmem:[#allocation17_spill] sm:$0xff] %v4174_v28  ;;  %v1831_v63 = vadd.f32 %v1830_v15, %v4172_v17  ;;  %v1856_v12 = vadd.f32 %v1855_v29, %v4163_v25 }
 0x3e7   :  { %v4178_v47 = vpop.f32.mrf.mxu0  ;;  %v4180_v0 = vpop.f32.mrf.mxu1 }
 0x3e8   :  { %4879 = vst [vmem:[#allocation24_spill] sm:$0xff] %v4178_v47  ;;  %4880 = vst [vmem:[#allocation25_spill] sm:$0xff] %v4180_v0  ;;  %v1832_v58 = vadd.f32 %v1831_v63, %v4178_v47  ;;  %v1857_v45 = vadd.f32 %v1856_v12, %v4169_v50 }
 0x3ea   :  { %v1833_v51 = vadd.f32 %v1832_v58, %v4174_v28 }
 0x3eb   :  { %v4187_v23 = vpop.f32.mrf.mxu0  ;;  %v4189_v5 = vpop.f32.mrf.mxu1 }
 0x3ec   :  { %v1840_v24 = vadd.f32 %v1839_v49, %v4187_v23  ;;  %v1834_v56 = vadd.f32 %v1833_v51, %v4180_v0 }
 0x3ed   :  { %v4196_v57 = vpop.f32.mrf.mxu0  ;;  %v4198_v59 = vpop.f32.mrf.mxu1 }
 0x3ee   :  { %v1841_v61 = vadd.f32 %v1840_v24, %v4196_v57  ;;  %1835 = vadd.xlane.f32.xlu1 %v1834_v56 }
 0x3f0   :  { %v1842_v19 = vadd.f32 %v1841_v61, %v4189_v5 }
 0x3f1   :  { %v4204_v39 = vpop.f32.mrf.mxu0  ;;  %v4206_v46 = vpop.f32.mrf.mxu1 }
 0x3f2   :  { %4881 = vst [vmem:[#allocation22_spill] sm:$0xff] %v4204_v39  ;;  %4882 = vst [vmem:[#allocation23_spill] sm:$0xff] %v4206_v46  ;;  %v1849_v10 = vadd.f32 %v1848_v62, %v4204_v39  ;;  %v1843_v60 = vadd.f32 %v1842_v19, %v4198_v59 }
 0x3f3   :  { %v4210_v26 = vpop.f32.mrf.mxu0  ;;  %v4212_v48 = vpop.f32.mrf.mxu1 }
 0x3f4   :  { %4883 = vst [vmem:[#allocation36_spill] sm:$0xff] %v4210_v26  ;;  %4884 = vst [vmem:[#allocation34_spill] sm:$0xff] %v4212_v48  ;;  %v1850_v27 = vadd.f32 %v1849_v10, %v4210_v26  ;;  %1844 = vadd.xlane.f32.xlu0 %v1843_v60 }
 0x3f5   :  { %v4216_v11 = vpop.f32.mrf.mxu0  ;;  %v4218_v55 = vpop.f32.mrf.mxu1 }
 0x3f6   :  { %4885 = vst [vmem:[#allocation35_spill] sm:$0xff] %v4216_v11  ;;  %4886 = vst [vmem:[#allocation32_spill] sm:$0xff] %v4218_v55  ;;  %v1858_v21 = vadd.f32 %v1857_v45, %v4216_v11  ;;  %v1851_v14 = vadd.f32 %v1850_v27, %v4206_v46 }
 0x3f7   :  { %v4222_v32 = vpop.f32.mrf.mxu0  ;;  %v4224_v38 = vpop.f32.mrf.mxu1 }
 0x3f8   :  { %4887 = vst [vmem:[#allocation33_spill] sm:$0xff] %v4222_v32  ;;  %4888 = vst [vmem:[#allocation30_spill] sm:$0xff] %v4224_v38  ;;  %v1859_v4 = vadd.f32 %v1858_v21, %v4222_v32  ;;  %v1852_v20 = vadd.f32 %v1851_v14, %v4212_v48 }
 0x3f9   :  { %v4228_v37 = vpop.f32.mrf.mxu0  ;;  %v4233_v40 = vpop.f32.mrf.mxu1 }
 0x3fa   :  { %4889 = vst [vmem:[#allocation31_spill] sm:$0xff] %v4228_v37  ;;  %1853 = vadd.xlane.f32.xlu0 %v1852_v20  ;;  %v1860_v6 = vadd.f32 %v1859_v4, %v4218_v55 }
 0x3fb   :  { %v4231_v31 = vpop.f32.mrf.mxu0  ;;  %v4238_v7 = vpop.f32.mrf.mxu1 }
 0x3fc   :  { %4890 = vst [vmem:[#allocation27_spill] sm:$0xff] %v4231_v31  ;;  %v1861_v53 = vadd.f32 %v1860_v6, %v4224_v38  ;;  %v2384_v16 = vadd.f32 %v4231_v31, %v4228_v37 }
 0x3fe   :  { %v4236_v22 = vpop.f32.mrf.mxu0  ;;  %1862 = vadd.xlane.f32.xlu1 %v1861_v53  ;;  %v2385_v58 = vadd.f32 %v2384_v16, %v4233_v40 }
 0x400   :  { %v4240_v30 = vpop.f32.mrf.mxu0  ;;  %v2386_v56 = vadd.f32 %v2385_v58, %v4238_v7 }
 0x401   :  { %v2393_v49 = vadd.f32 %v4240_v30, %v4236_v22 }
 0x403   :  { %v4244_v15 = vpop.f32.mrf.mxu0  ;;  %v4246_v13 = vpop.f32.mrf.mxu1 }
 0x404   :  { %4891 = vst [vmem:[#allocation50_spill] sm:$0xff] %v4244_v15  ;;  %v2394_v61 = vadd.f32 %v2393_v49, %v4246_v13 }
 0x405   :  { %v4248_v63 = vpop.f32.mrf.mxu0  ;;  %v4250_v41 = vpop.f32.mrf.mxu1 }
 0x406   :  { %4892 = vst [vmem:[#allocation48_spill] sm:$0xff] %v4248_v63  ;;  %v2402_v62 = vadd.f32 %v4248_v63, %v4244_v15  ;;  %v2395_v27 = vadd.f32 %v2394_v61, %v4250_v41 }
 0x407   :  { %v4255_v51 = vpop.f32.mrf.mxu0  ;;  %v4257_v44 = vpop.f32.mrf.mxu1 }
 0x408   :  { %4893 = vst [vmem:[#allocation49_spill] sm:$0xff] %v4255_v51  ;;  %4894 = vst [vmem:[#allocation46_spill] sm:$0xff] %v4257_v44  ;;  %v2403_v21 = vadd.f32 %v2402_v62, %v4257_v44 }
 0x409   :  { %v4259_v29 = vpop.f32.mrf.mxu0  ;;  %v4261_v24 = vpop.f32.mrf.mxu1 }
 0x40a   :  { %4895 = vst [vmem:[#allocation47_spill] sm:$0xff] %v4259_v29  ;;  %4896 = vst [vmem:[#allocation44_spill] sm:$0xff] %v4261_v24  ;;  %v2411_v14 = vadd.f32 %v4259_v29, %v4255_v51 }
 0x40b   :  { %v4267_v12 = vpop.f32.mrf.mxu1  ;;  %v4269_v19 = vpop.f32.mrf.mxu0 }
 0x40c   :  { %4897 = vst [vmem:[#allocation45_spill] sm:$0xff] %v4267_v12  ;;  %v2387_v10 = vadd.f32 %v2386_v56, %v4269_v19  ;;  %v2404_v56 = vadd.f32 %v2403_v21, %v4261_v24  ;;  %v2412_v61 = vadd.f32 %v2411_v14, %v4267_v12 }
 0x40d   :  { %v4272_v60 = vpop.f32.mrf.mxu1  ;;  %v4274_v45 = vpop.f32.mrf.mxu0 }
 0x40e   :  { %4898 = vst [vmem:[#allocation42_spill] sm:$0xff] %v4272_v60  ;;  %4899 = vst [vmem:[#allocation43_spill] sm:$0xff] %v4274_v45  ;;  %v2388_v4 = vadd.f32 %v2387_v10, %v4274_v45  ;;  %v2413_v21 = vadd.f32 %v2412_v61, %v4272_v60 }
 0x40f   :  { %v4281_v20 = vpop.f32.mrf.mxu0  ;;  %v4283_v6 = vpop.f32.mrf.mxu1 }
 0x410   :  { %4900 = vst [vmem:[#allocation40_spill] sm:$0xff] %v4283_v6  ;;  %v2396_v53 = vadd.f32 %v2395_v27, %v4281_v20  ;;  %v2389_v16 = vadd.f32 %v2388_v4, %v4283_v6 }
 0x411   :  { %v4287_v58 = vpop.f32.mrf.mxu0  ;;  %v4289_v49 = vpop.f32.mrf.mxu1 }
 0x412   :  { %4901 = vst [vmem:[#allocation41_spill] sm:$0xff] %v4289_v49  ;;  %v2397_v62 = vadd.f32 %v2396_v53, %v4287_v58  ;;  %v2390_v10 = vadd.f32 %v2389_v16, %v4289_v49 }
 0x413   :  { %v4295_v38 = vpop.f32.mrf.mxu0  ;;  %v4297_v55 = vpop.f32.mrf.mxu1 }
 0x414   :  { %4902 = vst [vmem:[#allocation39_spill] sm:$0xff] %v4295_v38  ;;  %v2405_v27 = vadd.f32 %v2404_v56, %v4295_v38  ;;  %2391 = vadd.xlane.f32.xlu0 %v2390_v10  ;;  %v2398_v4 = vadd.f32 %v2397_v62, %v4297_v55 }
 0x415   :  { %v4301_v29 = vpop.f32.mrf.mxu0  ;;  %v4303_v51 = vpop.f32.mrf.mxu1 }
 0x416   :  { %4903 = vst [vmem:[#allocation37_spill] sm:$0xff] %v4301_v29  ;;  %v2406_v14 = vadd.f32 %v2405_v27, %v4301_v29  ;;  %v2399_v53 = vadd.f32 %v2398_v4, %v4303_v51 }
 0x417   :  { %v4308_v16 = vpop.f32.mrf.mxu0  ;;  %v4310_v12 = vpop.f32.mrf.mxu1 }
 0x418   :  { %4904 = vst [vmem:[#allocation38_spill] sm:$0xff] %v4308_v16  ;;  %4905 = vst [vmem:[#allocation51_spill] sm:$0xff] %v4310_v12  ;;  %v2414_v32 = vadd.f32 %v2413_v21, %v4308_v16  ;;  %2400 = vadd.xlane.f32.xlu1 %v2399_v53  ;;  %v2407_v56 = vadd.f32 %v2406_v14, %v4310_v12 }
 0x419   :  { %v4314_v62 = vpop.f32.mrf.mxu0  ;;  %v4316_v10 = vpop.f32.mrf.mxu1 }
 0x41a   :  { %4906 = vst [vmem:[#allocation52_spill] sm:$0xff] %v4314_v62  ;;  %4907 = vst [vmem:[#allocation53_spill] sm:$0xff] %v4316_v10  ;;  %v2415_v11 = vadd.f32 %v2414_v32, %v4314_v62  ;;  %v2408_v61 = vadd.f32 %v2407_v56, %v4316_v10 }
 0x41b   :  { %v4320_v27 = vpop.f32.mrf.mxu1 }
 0x41c   :  { %4908 = vst [vmem:[#allocation54_spill] sm:$0xff] %v4320_v27  ;;  %2409 = vadd.xlane.f32.xlu0 %v2408_v61  ;;  %v2416_v4 = vadd.f32 %v2415_v11, %v4320_v27 }
 0x41d   :  { %v4323_v60 = vpop.f32.mrf.mxu1 }
 0x41e   :  { %4909 = vst [vmem:[#allocation55_spill] sm:$0xff] %v4323_v60  ;;  %v2417_v21 = vadd.f32 %v2416_v4, %v4323_v60 }
 0x420   :  { %2418 = vadd.xlane.f32.xlu1 %v2417_v21 }
 0x477   :  { %v1836_v14 = vpop.xlane.xlu1 %1835 }
 0x47d   :  { %v1845_v53 = vpop.xlane.xlu0 %1844 }
 0x483   :  { %v1854_v16 = vpop.xlane.xlu0 %1853 }
 0x487   :  { %v1863_v50 = vpop.xlane.xlu1 %1862 }
 0x49d   :  { %v2392_v12 = vpop.xlane.xlu0 %2391 }
 0x49e   :  { %v2420_v25 = vadd.f32 %v2392_v12, %v1836_v14 }
 0x4a0   :  { %v4326_v3 = vmul.f32 0.00048828125, %v2420_v25 }
 0x4a1   :  { %v2401_v32 = vpop.xlane.xlu1 %2400 }
 0x4a2   :  { %v2460_v56 = vsub.f32 %v4134_v8, %v4326_v3  ;;  %v2461_v11 = vsub.f32 %v4138_v35, %v4326_v3  ;;  %v2462_v61 = vsub.f32 %v4136_v36, %v4326_v3  ;;  %v2421_v4 = vadd.f32 %v2401_v32, %v1845_v53 }
 0x4a3   :  { %v2463_v21 = vsub.f32 %v4140_v18, %v4326_v3  ;;  %v2464_v25 = vsub.f32 %v4172_v17, %v4326_v3  ;;  %v2465_v12 = vsub.f32 %v4178_v47, %v4326_v3  ;;  %v2466_v14 = vsub.f32 %v4174_v28, %v4326_v3 }
 0x4a4   :  { %v2492_v60 = vmul.f32 %v2460_v56, %v2460_v56  ;;  %v2493_v27 = vmul.f32 %v2461_v11, %v2461_v11  ;;  %v2494_v35 = vmul.f32 %v2462_v61, %v2462_v61  ;;  %v2467_v53 = vsub.f32 %v4180_v0, %v4326_v3 }
 0x4a5   :  { %v2410_v62 = vpop.xlane.xlu0 %2409  ;;  %v2596_v32 = vsub.f32 %v4228_v37, %v4326_v3  ;;  %v2597_v56 = vsub.f32 %v4231_v31, %v4326_v3  ;;  %v4348_v11 = vmul.f32 0.00048828125, %v2421_v4  ;;  %v2495_v17 = vmul.f32 %v2463_v21, %v2463_v21 }
 0x4a6   :  { %v2524_v8 = vadd.f32 %v2493_v27, %v2492_v60  ;;  %v2422_v10 = vadd.f32 %v2410_v62, %v1854_v16  ;;  %v2598_v47 = vsub.f32 %v4233_v40, %v4326_v3  ;;  %v2496_v28 = vmul.f32 %v2464_v25, %v2464_v25 }
 0x4a7   :  { %v2628_v61 = vmul.f32 %v2596_v32, %v2596_v32  ;;  %v2629_v60 = vmul.f32 %v2597_v56, %v2597_v56  ;;  %v2497_v16 = vmul.f32 %v2465_v12, %v2465_v12  ;;  %v2498_v62 = vmul.f32 %v2466_v14, %v2466_v14 }
 0x4a8   :  { %v2525_v18 = vadd.f32 %v2524_v8, %v2494_v35  ;;  %v2599_v0 = vsub.f32 %v4238_v7, %v4326_v3  ;;  %v4354_v37 = vmul.f32 0.00048828125, %v2422_v10  ;;  %v2499_v31 = vmul.f32 %v2467_v53, %v2467_v53 }
 0x4a9   :  { %v2419_v36 = vpop.xlane.xlu1 %2418  ;;  %v2600_v4 = vsub.f32 %v4269_v19, %v4326_v3  ;;  %v2601_v8 = vsub.f32 %v4274_v45, %v4326_v3  ;;  %v2630_v21 = vmul.f32 %v2598_v47, %v2598_v47  ;;  %v2660_v25 = vadd.f32 %v2629_v60, %v2628_v61 }
 0x4aa   :  { %v2526_v27 = vadd.f32 %v2525_v18, %v2495_v17  ;;  %v2468_v12 = vsub.f32 %v4142_v2, %v4348_v11  ;;  %v2602_v18 = vsub.f32 %v4283_v6, %v4326_v3  ;;  %v2603_v17 = vsub.f32 %v4289_v49, %v4326_v3 }
 0x4ab   :  { %v2469_v10 = vsub.f32 %v4146_v1, %v4348_v11  ;;  %v2470_v14 = vsub.f32 %v4144_v52, %v4348_v11  ;;  %v2423_v53 = vadd.f32 %v2419_v36, %v1863_v50  ;;  %v2661_v47 = vadd.f32 %v2660_v25, %v2630_v21 }
 0x4ac   :  { %v2527_v35 = vadd.f32 %v2526_v27, %v2496_v28  ;;  %v2631_v28 = vmul.f32 %v2599_v0, %v2599_v0  ;;  %v2632_v56 = vmul.f32 %v2600_v4, %v2600_v4  ;;  %v2471_v61 = vsub.f32 %v4148_v9, %v4348_v11 }
 0x4ad   :  { %v2500_v60 = vmul.f32 %v2468_v12, %v2468_v12  ;;  %v2501_v27 = vmul.f32 %v2469_v10, %v2469_v10  ;;  %v2633_v6 = vmul.f32 %v2601_v8, %v2601_v8  ;;  %v2472_v49 = vsub.f32 %v4187_v23, %v4348_v11 }
 0x4ae   :  { %v2528_v32 = vadd.f32 %v2527_v35, %v2497_v16  ;;  %v2662_v45 = vadd.f32 %v2661_v47, %v2631_v28  ;;  %v2634_v1 = vmul.f32 %v2602_v18, %v2602_v18  ;;  %v2473_v52 = vsub.f32 %v4196_v57, %v4348_v11 }
 0x4af   :  { %v2502_v36 = vmul.f32 %v2470_v14, %v2470_v14  ;;  %v2533_v50 = vadd.f32 %v2501_v27, %v2500_v60  ;;  %v2476_v4 = vsub.f32 %v4152_v42, %v4354_v37  ;;  %v2477_v35 = vsub.f32 %v4156_v43, %v4354_v37  ;;  %v2849_v43 = vld [vmem:[#allocation3 + $0x68] sm:$0xff]  ;;  %v2851_v42 = vld [vmem:[#allocation3 + $0x78] sm:$0xff] }
 0x4b0   :  { %v2529_v2 = vadd.f32 %v2528_v32, %v2498_v62  ;;  %v2663_v16 = vadd.f32 %v2662_v45, %v2632_v56  ;;  %v2474_v62 = vsub.f32 %v4189_v5, %v4348_v11  ;;  %v2503_v8 = vmul.f32 %v2471_v61, %v2471_v61 }
 0x4b1   :  { %v2534_v21 = vadd.f32 %v2533_v50, %v2502_v36  ;;  %v2478_v25 = vsub.f32 %v4154_v54, %v4354_v37  ;;  %v4384_v12 = vmul.f32 0.00048828125, %v2423_v53  ;;  %v2635_v18 = vmul.f32 %v2603_v17, %v2603_v17  ;;  %v2848_v54 = vld [vmem:[#allocation3 + $0x60] sm:$0xff] }
 0x4b2   :  { %v2530_v0 = vadd.f32 %v2529_v2, %v2499_v31  ;;  %v2664_v2 = vadd.f32 %v2663_v16, %v2633_v6  ;;  %v2504_v31 = vmul.f32 %v2472_v49, %v2472_v49  ;;  %v2479_v10 = vsub.f32 %v4158_v34, %v4354_v37  ;;  %v2846_v34 = vld [vmem:[#allocation3 + $0x50] sm:$0xff] }
 0x4b3   :  { %v2535_v45 = vadd.f32 %v2534_v21, %v2503_v8  ;;  %v2508_v14 = vmul.f32 %v2476_v4, %v2476_v4  ;;  %v2509_v32 = vmul.f32 %v2477_v35, %v2477_v35  ;;  %v2475_v47 = vsub.f32 %v4198_v59, %v4348_v11 }
 0x4b4   :  { %2531 = vadd.xlane.f32.xlu0 %v2530_v0  ;;  %v2665_v28 = vadd.f32 %v2664_v2, %v2634_v1  ;;  %v2505_v56 = vmul.f32 %v2473_v52, %v2473_v52  ;;  %v2480_v61 = vsub.f32 %v4204_v39, %v4354_v37  ;;  %v2506_v53 = vmul.f32 %v2474_v62, %v2474_v62 }
 0x4b5   :  { %v2536_v60 = vadd.f32 %v2535_v45, %v2504_v31  ;;  %v2510_v27 = vmul.f32 %v2478_v25, %v2478_v25  ;;  %v2542_v17 = vadd.f32 %v2509_v32, %v2508_v14  ;;  %v2481_v49 = vsub.f32 %v4210_v26, %v4354_v37 }
 0x4b6   :  { %v2666_v6 = vadd.f32 %v2665_v28, %v2635_v18  ;;  %v2604_v36 = vsub.f32 %v4236_v22, %v4348_v11  ;;  %v2605_v1 = vsub.f32 %v4240_v30, %v4348_v11  ;;  %v2511_v0 = vmul.f32 %v2479_v10, %v2479_v10 }
 0x4b7   :  { %v2537_v50 = vadd.f32 %v2536_v60, %v2505_v56  ;;  %v2543_v52 = vadd.f32 %v2542_v17, %v2510_v27  ;;  %v2606_v16 = vsub.f32 %v4246_v13, %v4348_v11  ;;  %v2507_v4 = vmul.f32 %v2475_v47, %v2475_v47 }
 0x4b8   :  { %2667 = vadd.xlane.f32.xlu0 %v2666_v6  ;;  %v2482_v35 = vsub.f32 %v4206_v46, %v4354_v37  ;;  %v2512_v62 = vmul.f32 %v2480_v61, %v2480_v61  ;;  %v2636_v8 = vmul.f32 %v2604_v36, %v2604_v36  ;;  %v2607_v18 = vsub.f32 %v4250_v41, %v4348_v11 }
 0x4b9   :  { %v2538_v21 = vadd.f32 %v2537_v50, %v2506_v53  ;;  %v2544_v25 = vadd.f32 %v2543_v52, %v2511_v0  ;;  %v2637_v2 = vmul.f32 %v2605_v1, %v2605_v1  ;;  %v2483_v31 = vsub.f32 %v4212_v48, %v4354_v37 }
 0x4ba   :  { %v2513_v45 = vmul.f32 %v2481_v49, %v2481_v49  ;;  %v2608_v10 = vsub.f32 %v4281_v20, %v4348_v11  ;;  %v2609_v14 = vsub.f32 %v4287_v58, %v4348_v11  ;;  %v2638_v47 = vmul.f32 %v2606_v16, %v2606_v16 }
 0x4bb   :  { %v2539_v32 = vadd.f32 %v2538_v21, %v2507_v4  ;;  %v2545_v28 = vadd.f32 %v2544_v25, %v2512_v62  ;;  %v2669_v56 = vadd.f32 %v2637_v2, %v2636_v8  ;;  %v2610_v61 = vsub.f32 %v4297_v55, %v4348_v11 }
 0x4bc   :  { %v2612_v53 = vsub.f32 %v4244_v15, %v4354_v37  ;;  %v2613_v60 = vsub.f32 %v4248_v63, %v4354_v37  ;;  %v2614_v27 = vsub.f32 %v4257_v44, %v4354_v37  ;;  %v2514_v17 = vmul.f32 %v2482_v35, %v2482_v35  ;;  %v4920_v44 = vld [vmem:[#allocation32_spill] sm:$0xff] }
 0x4bd   :  { %2540 = vadd.xlane.f32.xlu1 %v2539_v32  ;;  %v2546_v6 = vadd.f32 %v2545_v28, %v2513_v45  ;;  %v2639_v49 = vmul.f32 %v2607_v18, %v2607_v18  ;;  %v2670_v36 = vadd.f32 %v2669_v56, %v2638_v47  ;;  %v2515_v1 = vmul.f32 %v2483_v31, %v2483_v31  ;;  %v4910_v47 = vld [vmem:[#allocation19_spill] sm:$0xff] }
 0x4be   :  { %v2611_v50 = vsub.f32 %v4303_v51, %v4348_v11  ;;  %v2644_v0 = vmul.f32 %v2612_v53, %v2612_v53  ;;  %v2645_v52 = vmul.f32 %v2613_v60, %v2613_v60  ;;  %v2640_v4 = vmul.f32 %v2608_v10, %v2608_v10  ;;  %v4912_v60 = vld [vmem:[#allocation51_spill] sm:$0xff] }
 0x4bf   :  { %v2547_v16 = vadd.f32 %v2546_v6, %v2514_v17  ;;  %v2671_v62 = vadd.f32 %v2670_v36, %v2639_v49  ;;  %v2615_v8 = vsub.f32 %v4261_v24, %v4354_v37  ;;  %v2641_v21 = vmul.f32 %v2609_v14, %v2609_v14  ;;  %v4911_v14 = vld [vmem:[#allocation12_spill] sm:$0xff]  ;;  %v4913_v49 = vld [vmem:[#allocation53_spill] sm:$0xff] }
 0x4c0   :  { %v2642_v25 = vmul.f32 %v2610_v61, %v2610_v61  ;;  %v2616_v35 = vsub.f32 %v4295_v38, %v4354_v37  ;;  %v2646_v2 = vmul.f32 %v2614_v27, %v2614_v27  ;;  %v2678_v31 = vadd.f32 %v2645_v52, %v2644_v0 }
 0x4c1   :  { %v2548_v18 = vadd.f32 %v2547_v16, %v2515_v1  ;;  %v2672_v45 = vadd.f32 %v2671_v62, %v2640_v4  ;;  %v2484_v32 = vsub.f32 %v4161_v33, %v4384_v12  ;;  %v2643_v28 = vmul.f32 %v2611_v50, %v2611_v50  ;;  %v4914_v1 = vld [vmem:[#allocation20_spill] sm:$0xff] }
 0x4c2   :  { %v2617_v10 = vsub.f32 %v4301_v29, %v4354_v37  ;;  %v2485_v56 = vsub.f32 %v4910_v47, %v4384_v12  ;;  %v2486_v61 = vsub.f32 %v4911_v14, %v4384_v12  ;;  %v2618_v27 = vsub.f32 %v4912_v60, %v4354_v37  ;;  %v4915_v29 = vld [vmem:[#allocation35_spill] sm:$0xff] }
 0x4c3   :  { %2549 = vadd.xlane.f32.xlu0 %v2548_v18  ;;  %v2673_v53 = vadd.f32 %v2672_v45, %v2641_v21  ;;  %v2647_v17 = vmul.f32 %v2615_v8, %v2615_v8  ;;  %v2679_v6 = vadd.f32 %v2678_v31, %v2646_v2  ;;  %v2619_v36 = vsub.f32 %v4913_v49, %v4354_v37  ;;  %v4916_v45 = vld [vmem:[#allocation33_spill] sm:$0xff] }
 0x4c4   :  { %v2487_v50 = vsub.f32 %v4914_v1, %v4384_v12  ;;  %v2516_v0 = vmul.f32 %v2484_v32, %v2484_v32  ;;  %v2517_v52 = vmul.f32 %v2485_v56, %v2485_v56  ;;  %v2648_v4 = vmul.f32 %v2616_v35, %v2616_v35  ;;  %v4917_v49 = vld [vmem:[#allocation49_spill] sm:$0xff]  ;;  %v4918_v32 = vld [vmem:[#allocation47_spill] sm:$0xff] }
 0x4c5   :  { %v2674_v16 = vadd.f32 %v2673_v53, %v2642_v25  ;;  %v2680_v62 = vadd.f32 %v2679_v6, %v2647_v17  ;;  %v2488_v18 = vsub.f32 %v4915_v29, %v4384_v12  ;;  %v2649_v21 = vmul.f32 %v2617_v10, %v2617_v10  ;;  %v4919_v53 = vld [vmem:[#allocation45_spill] sm:$0xff] }
 0x4c6   :  { %v2489_v60 = vsub.f32 %v4916_v45, %v4384_v12  ;;  %v2518_v8 = vmul.f32 %v2486_v61, %v2486_v61  ;;  %v2551_v2 = vadd.f32 %v2517_v52, %v2516_v0  ;;  %v2620_v24 = vsub.f32 %v4917_v49, %v4384_v12  ;;  %v4921_v52 = vld [vmem:[#allocation42_spill] sm:$0xff]  ;;  %v3038_v49 = vld [vmem:[#allocation3 + $0x150] sm:$0xff] }
 0x4c7   :  { %v2675_v31 = vadd.f32 %v2674_v16, %v2643_v28  ;;  %v2681_v38 = vadd.f32 %v2680_v62, %v2648_v4  ;;  %v2621_v56 = vsub.f32 %v4918_v32, %v4384_v12  ;;  %v2519_v25 = vmul.f32 %v2487_v50, %v2487_v50  ;;  %v4922_v50 = vld [vmem:[#allocation30_spill] sm:$0xff] }
 0x4c8   :  { %v2552_v35 = vadd.f32 %v2551_v2, %v2518_v8  ;;  %v2622_v17 = vsub.f32 %v4919_v53, %v4384_v12  ;;  %v2650_v10 = vmul.f32 %v2618_v27, %v2618_v27  ;;  %v2490_v61 = vsub.f32 %v4920_v44, %v4384_v12  ;;  %v4923_v27 = vld [vmem:[#allocation38_spill] sm:$0xff]  ;;  %v3040_v44 = vld [vmem:[#allocation3 + $0x160] sm:$0xff] }
 0x4c9   :  { %2676 = vadd.xlane.f32.xlu1 %v2675_v31  ;;  %v2682_v6 = vadd.f32 %v2681_v38, %v2649_v21  ;;  %v2520_v0 = vmul.f32 %v2488_v18, %v2488_v18  ;;  %v2623_v16 = vsub.f32 %v4921_v52, %v4384_v12  ;;  %v2652_v4 = vmul.f32 %v2620_v24, %v2620_v24  ;;  %v3037_v53 = vld [vmem:[#allocation3 + $0x148] sm:$0xff] }
 0x4ca   :  { %v2553_v28 = vadd.f32 %v2552_v35, %v2519_v25  ;;  %v2653_v62 = vmul.f32 %v2621_v56, %v2621_v56  ;;  %v2651_v63 = vmul.f32 %v2619_v36, %v2619_v36  ;;  %v2491_v8 = vsub.f32 %v4922_v50, %v4384_v12  ;;  %v4924_v35 = vld [vmem:[#allocation52_spill] sm:$0xff] }
 0x4cb   :  { %v2683_v15 = vadd.f32 %v2682_v6, %v2650_v10  ;;  %v2521_v2 = vmul.f32 %v2489_v60, %v2489_v60  ;;  %v2624_v38 = vsub.f32 %v4923_v27, %v4384_v12  ;;  %v2654_v21 = vmul.f32 %v2622_v17, %v2622_v17  ;;  %v4925_v6 = vld [vmem:[#allocation54_spill] sm:$0xff]  ;;  %v4926_v17 = vld [vmem:[#allocation55_spill] sm:$0xff]  ;;  %v3039_v50 = vld [vmem:[#allocation3 + $0x158] sm:$0xff] }
 0x4cc   :  { %v2554_v48 = vadd.f32 %v2553_v28, %v2520_v0  ;;  %v2687_v31 = vadd.f32 %v2653_v62, %v2652_v4  ;;  %v2522_v18 = vmul.f32 %v2490_v61, %v2490_v61  ;;  %v2625_v26 = vsub.f32 %v4924_v35, %v4384_v12 }
 0x4cd   :  { %v2684_v46 = vadd.f32 %v2683_v15, %v2651_v63  ;;  %v2655_v24 = vmul.f32 %v2623_v16, %v2623_v16  ;;  %v2523_v36 = vmul.f32 %v2491_v8, %v2491_v8  ;;  %v2626_v60 = vsub.f32 %v4925_v6, %v4384_v12 }
 0x4ce   :  { %v2555_v25 = vadd.f32 %v2554_v48, %v2521_v2  ;;  %v2688_v56 = vadd.f32 %v2687_v31, %v2654_v21  ;;  %v2656_v0 = vmul.f32 %v2624_v38, %v2624_v38  ;;  %v2627_v4 = vsub.f32 %v4926_v17, %v4384_v12 }
 0x4cf   :  { %2685 = vadd.xlane.f32.xlu0 %v2684_v46  ;;  %v2657_v15 = vmul.f32 %v2625_v26, %v2625_v26  ;;  %v2658_v48 = vmul.f32 %v2626_v60, %v2626_v60 }
 0x4d0   :  { %v2556_v10 = vadd.f32 %v2555_v25, %v2522_v18  ;;  %v2689_v28 = vadd.f32 %v2688_v56, %v2655_v24  ;;  %v2659_v62 = vmul.f32 %v2627_v4, %v2627_v4 }
 0x4d2   :  { %v2557_v39 = vadd.f32 %v2556_v10, %v2523_v36  ;;  %v2690_v63 = vadd.f32 %v2689_v28, %v2656_v0 }
 0x4d4   :  { %2558 = vadd.xlane.f32.xlu1 %v2557_v39  ;;  %v2691_v61 = vadd.f32 %v2690_v63, %v2657_v15  ;;  %v2700_v39 = vld [vmem:[%s4649_s5] sm:$0xff] }
 0x4d6   :  { %v2692_v16 = vadd.f32 %v2691_v61, %v2658_v48 }
 0x4d8   :  { %v2693_v2 = vadd.f32 %v2692_v16, %v2659_v62  ;;  %v2701_v62 = vld [vmem:[%s4649_s5 + $0x8] sm:$0xff] }
 0x4da   :  { %2694 = vadd.xlane.f32.xlu1 %v2693_v2 }
 0x53d   :  { %v2532_v46 = vpop.xlane.xlu0 %2531 }
 0x541   :  { %v2668_v8 = vpop.xlane.xlu0 %2667 }
 0x542   :  { %v2696_v21 = vadd.f32 %v2668_v8, %v2532_v46 }
 0x544   :  { %v2704_v31 = vmul.f32 0.00048828125, %v2696_v21 }
 0x546   :  { %v2708_v18 = vadd.f32 1e-05, %v2704_v31  ;;  %v2541_v38 = vpop.xlane.xlu1 %2540  ;;  %v2720_v31 = vld [vmem:[%s4650_s6] sm:$0xff] }
 0x548   :  { %3222 = vrsqrt.f32 %v2708_v18  ;;  %v2721_v18 = vld [vmem:[%s4650_s6 + $0x8] sm:$0xff] }
 0x54c   :  { %v2550_v25 = vpop.xlane.xlu0 %2549 }
 0x552   :  { %v2677_v24 = vpop.xlane.xlu1 %2676 }
 0x553   :  { %v2697_v56 = vadd.f32 %v2677_v24, %v2541_v38 }
 0x555   :  { %v3223_v26 = vpop.eup %3222  ;;  %v2705_v36 = vmul.f32 0.00048828125, %v2697_v56 }
 0x556   :  { %v2716_v10 = vmul.f32 %v3223_v26, %v2700_v39 }
 0x557   :  { %v2709_v60 = vadd.f32 1e-05, %v2705_v36  ;;  %v2722_v36 = vld [vmem:[%s4650_s6 + $0x10] sm:$0xff] }
 0x558   :  { %v2686_v0 = vpop.xlane.xlu0 %2685  ;;  %2734 = vperm.xlu0 %3212, %v2716_v10   ;;  %v2724_v8 = vmul.f32 %v2716_v10, %v4326_v3 }
 0x559   :  { %3224 = vrsqrt.f32 %v2709_v60  ;;  %v2698_v28 = vadd.f32 %v2686_v0, %v2550_v25  ;;  %v2702_v25 = vld [vmem:[%s4649_s5 + $0x10] sm:$0xff] }
 0x55a   :  { %v2728_v24 = vsub.f32 %v2720_v31, %v2724_v8 }
 0x55b   :  { %v2706_v4 = vmul.f32 0.00048828125, %v2698_v28  ;;  %v2723_v28 = vld [vmem:[%s4650_s6 + $0x18] sm:$0xff] }
 0x55d   :  { %v2710_v15 = vadd.f32 1e-05, %v2706_v4  ;;  %v2559_v63 = vpop.xlane.xlu1 %2558 }
 0x55f   :  { %3226 = vrsqrt.f32 %v2710_v15 }
 0x563   :  { %v2695_v48 = vpop.xlane.xlu1 %2694 }
 0x564   :  { %v2699_v61 = vadd.f32 %v2695_v48, %v2559_v63  ;;  %v4927_v63 = vld [vmem:[#allocation13_spill] sm:$0xff] }
 0x566   :  { %v3225_v16 = vpop.eup %3224  ;;  %v2707_v2 = vmul.f32 0.00048828125, %v2699_v61  ;;  %v4928_v61 = vld [vmem:[#allocation14_spill] sm:$0xff] }
 0x567   :  { %v2717_v46 = vmul.f32 %v3225_v16, %v2701_v62  ;;  %v4929_v16 = vld [vmem:[#allocation15_spill] sm:$0xff] }
 0x568   :  { %v2711_v21 = vadd.f32 1e-05, %v2707_v2 }
 0x569   :  { %2739 = vperm.xlu1 %3213, %v2717_v46   ;;  %v2725_v38 = vmul.f32 %v2717_v46, %v4348_v11  ;;  %v2703_v11 = vld [vmem:[%s4649_s5 + $0x18] sm:$0xff]  ;;  %s3279_s5 = smov [#allocation6]  }
 0x56a   :  { %3228 = vrsqrt.f32 %v2711_v21  ;;  %v4930_v46 = vld [vmem:[#allocation16_spill] sm:$0xff]  ;;  %v4931_v21 = vld [vmem:[#allocation18_spill] sm:$0xff]  ;;  %s3130_s6 = sshll.u32 %s3279_s5, 4  ;;  %s3131_s6 = int_to_ptr.vmem [resolvable:$true] %s3130_s6 }
 0x56b   :  { %v2729_v56 = vsub.f32 %v2721_v18, %v2725_v38  ;;  %v4932_v18 = vld [vmem:[#allocation24_spill] sm:$0xff]  ;;  %v4933_v38 = vld [vmem:[#allocation17_spill] sm:$0xff]  ;;  %s3250_s29 = scalar_lea.vmem %s3131_s6, 8192  ;;  %p3255_p6 = scmp.lt.s32.totalorder %s3131_s6, %s3131_s6 }
 0x56c   :  { %v3227_v3 = vpop.eup %3226  ;;  %p3251_p5 = scmp.ne.s32.totalorder %s3131_s6, %s3250_s29  ;;  %p3256_p7 = scmp.lt.s32.totalorder %s3250_s29, %s3250_s29 }
 0x56d   :  { %2786 = vperm.xlu1 %3213, %v2728_v24   ;;  %2791 = vperm.xlu0 %3212, %v2729_v56   ;;  %v2718_v39 = vmul.f32 %v3227_v3, %v2702_v25  ;;  %v4934_v24 = vld [vmem:[#allocation25_spill] sm:$0xff]  ;;  %v4935_v3 = vld [vmem:[#allocation31_spill] sm:$0xff] }
 0x56e   :  { %p3257_p8 = por %p3256_p7, %p3255_p6 }
 0x56f   :  { %v2726_v26 = vmul.f32 %v2718_v39, %v4354_v37 }
 0x570   :  { %p3258_p9 = pnand %p3257_p8, %p3251_p5 }
 0x571   :  { %2744 = vperm.xlu1 %3213, %v2718_v39   ;;  %v2730_v10 = vsub.f32 %v2722_v36, %v2726_v26  ;;  %v4936_v26 = vld [vmem:[#allocation27_spill] sm:$0xff] }
 0x575   :  { %2796 = vperm.xlu1 %3213, %v2730_v10  }
 0x577   :  { %v3229_v60 = vpop.eup %3228 }
 0x578   :  { %v2719_v0 = vmul.f32 %v3229_v60, %v2703_v11 }
 0x57a   :  { %2749 = vperm.xlu0 %3212, %v2719_v0   ;;  %v2727_v37 = vmul.f32 %v2719_v0, %v4384_v12  ;;  %v4937_v0 = vld [vmem:[#allocation43_spill] sm:$0xff] }
 0x57c   :  { %v2731_v4 = vsub.f32 %v2723_v28, %v2727_v37  ;;  %v4938_v37 = vld [vmem:[#allocation40_spill] sm:$0xff] }
 0x57e   :  { %2801 = vperm.xlu0 %3212, %v2731_v4  }
 0x5d3   :  { %v2735_v15 = vpop.permute.xlu0 %2734 }
 0x5d4   :  { %v4491_v48 = vmul.f32 %v2735_v15, %v4927_v63  ;;  %v4494_v62 = vmul.f32 %v2735_v15, %v4928_v61  ;;  %v4497_v2 = vmul.f32 %v2735_v15, %v4929_v16  ;;  %v4500_v8 = vmul.f32 %v2735_v15, %v4930_v46  ;;  %v4939_v63 = vld [vmem:[#allocation41_spill] sm:$0xff] }
 0x5d5   :  { %v4503_v31 = vmul.f32 %v2735_v15, %v4931_v21  ;;  %v4506_v12 = vmul.f32 %v2735_v15, %v4932_v18  ;;  %v4509_v25 = vmul.f32 %v2735_v15, %v4933_v38  ;;  %v4512_v56 = vmul.f32 %v2735_v15, %v4934_v24  ;;  %v4940_v46 = vld [vmem:[#allocation21_spill] sm:$0xff]  ;;  %v4942_v38 = vld [vmem:[#allocation26_spill] sm:$0xff] }
 0x5d6   :  { %v4515_v39 = vmul.f32 %v2735_v15, %v4935_v3  ;;  %v4518_v36 = vmul.f32 %v2735_v15, %v4936_v26  ;;  %v4521_v10 = vmul.f32 %v2735_v15, %v4233_v40  ;;  %v4524_v11 = vmul.f32 %v2735_v15, %v4238_v7  ;;  %v4941_v40 = vld [vmem:[#allocation28_spill] sm:$0xff] }
 0x5d7   :  { %v4527_v60 = vmul.f32 %v2735_v15, %v4269_v19  ;;  %v4530_v28 = vmul.f32 %v2735_v15, %v4937_v0  ;;  %v4533_v4 = vmul.f32 %v2735_v15, %v4938_v37  ;;  %v4536_v61 = vmul.f32 %v2735_v15, %v4939_v63 }
 0x5e4   :  { %v2740_v16 = vpop.permute.xlu1 %2739 }
 0x5e5   :  { %v2760_v21 = vmul.f32 %v2740_v16, %v4940_v46  ;;  %v2761_v18 = vmul.f32 %v2740_v16, %v4941_v40  ;;  %v2762_v7 = vmul.f32 %v2740_v16, %v4942_v38  ;;  %v2763_v24 = vmul.f32 %v2740_v16, %v4148_v9  ;;  %v2844_v40 = vld [vmem:[#allocation3 + $0x40] sm:$0xff]  ;;  %v2845_v38 = vld [vmem:[#allocation3 + $0x48] sm:$0xff] }
 0x5e6   :  { %v2764_v19 = vmul.f32 %v2740_v16, %v4187_v23  ;;  %v2765_v3 = vmul.f32 %v2740_v16, %v4196_v57  ;;  %v2766_v26 = vmul.f32 %v2740_v16, %v4189_v5  ;;  %v2767_v0 = vmul.f32 %v2740_v16, %v4198_v59  ;;  %v2847_v59 = vld [vmem:[#allocation3 + $0x58] sm:$0xff] }
 0x5e7   :  { %v2972_v15 = vmul.f32 %v2740_v16, %v4236_v22  ;;  %v2973_v37 = vmul.f32 %v2740_v16, %v4240_v30  ;;  %v2974_v63 = vmul.f32 %v2740_v16, %v4246_v13  ;;  %v2975_v46 = vmul.f32 %v2740_v16, %v4250_v41  ;;  %v2850_v30 = vld [vmem:[#allocation3 + $0x70] sm:$0xff] }
 0x5e8   :  { %v2976_v9 = vmul.f32 %v2740_v16, %v4281_v20  ;;  %v2977_v23 = vmul.f32 %v2740_v16, %v4287_v58  ;;  %v2978_v57 = vmul.f32 %v2740_v16, %v4297_v55  ;;  %v2979_v5 = vmul.f32 %v2740_v16, %v4303_v51  ;;  %v2792_v22 = vpop.permute.xlu0 %2791  ;;  %v3036_v58 = vld [vmem:[#allocation3 + $0x140] sm:$0xff] }
 0x5e9   :  { %v2812_v13 = vadd.f32 %v2792_v22, %v2760_v21  ;;  %v2813_v17 = vadd.f32 %v2792_v22, %v2761_v18  ;;  %v2814_v41 = vadd.f32 %v2792_v22, %v2762_v7  ;;  %v2815_v6 = vadd.f32 %v2792_v22, %v2763_v24  ;;  %v3041_v18 = vld [vmem:[#allocation3 + $0x168] sm:$0xff]  ;;  %v3042_v7 = vld [vmem:[#allocation3 + $0x170] sm:$0xff]  ;;  %v3043_v24 = vld [vmem:[#allocation3 + $0x178] sm:$0xff] }
 0x5ea   :  { %v2816_v35 = vadd.f32 %v2792_v22, %v2764_v19  ;;  %v2817_v27 = vadd.f32 %v2792_v22, %v2765_v3  ;;  %v2818_v20 = vadd.f32 %v2792_v22, %v2766_v26  ;;  %v2819_v52 = vadd.f32 %v2792_v22, %v2767_v0  ;;  %v2836_v0 = vld [vmem:[#allocation3] sm:$0xff] }
 0x5eb   :  { %v2876_v55 = vadd.f32 %v2844_v40, %v2812_v13  ;;  %v2877_v32 = vadd.f32 %v2845_v38, %v2813_v17  ;;  %v2878_v51 = vadd.f32 %v2846_v34, %v2814_v41  ;;  %v2879_v16 = vadd.f32 %v2847_v59, %v2815_v6  ;;  %v2837_v40 = vld [vmem:[#allocation3 + $0x8] sm:$0xff]  ;;  %v3030_v41 = vld [vmem:[#allocation3 + $0x110] sm:$0xff] }
 0x5ec   :  { %v2880_v45 = vadd.f32 %v2848_v54, %v2816_v35  ;;  %v2881_v29 = vadd.f32 %v2849_v43, %v2817_v27  ;;  %v2882_v1 = vadd.f32 %v2850_v30, %v2818_v20  ;;  %v2883_v21 = vadd.f32 %v2851_v42, %v2819_v52  ;;  %v4554_v42 = vpop.permute.xlu1 %2786  ;;  %v2841_v38 = vld [vmem:[#allocation3 + $0x28] sm:$0xff]  ;;  %v3031_v20 = vld [vmem:[#allocation3 + $0x118] sm:$0xff] }
 0x5ed   :  { %2908 = vst [vmem:[#allocation6 + $0x40] sm:$0xff] %v2876_v55  ;;  %2909 = vst [vmem:[#allocation6 + $0x48] sm:$0xff] %v2877_v32  ;;  %v3004_v19 = vadd.f32 %v2972_v15, %v2792_v22  ;;  %v3005_v3 = vadd.f32 %v2973_v37, %v2792_v22  ;;  %v3006_v26 = vadd.f32 %v2974_v63, %v2792_v22  ;;  %v3029_v59 = vld [vmem:[#allocation3 + $0x108] sm:$0xff] }
 0x5ee   :  { %2910 = vst [vmem:[#allocation6 + $0x50] sm:$0xff] %v2878_v51  ;;  %2911 = vst [vmem:[#allocation6 + $0x58] sm:$0xff] %v2879_v16  ;;  %v3007_v17 = vadd.f32 %v2975_v46, %v2792_v22  ;;  %v3008_v34 = vadd.f32 %v2976_v9, %v2792_v22  ;;  %v3009_v54 = vadd.f32 %v2977_v23, %v2792_v22  ;;  %v2842_v9 = vld [vmem:[#allocation3 + $0x30] sm:$0xff]  ;;  %v2843_v23 = vld [vmem:[#allocation3 + $0x38] sm:$0xff] }
 0x5ef   :  { %2912 = vst [vmem:[#allocation6 + $0x60] sm:$0xff] %v2880_v45  ;;  %2913 = vst [vmem:[#allocation6 + $0x68] sm:$0xff] %v2881_v29  ;;  %v3010_v43 = vadd.f32 %v2978_v57, %v2792_v22  ;;  %v3011_v27 = vadd.f32 %v2979_v5, %v2792_v22  ;;  %v3068_v52 = vadd.f32 %v3036_v58, %v3004_v19  ;;  %v2838_v45 = vld [vmem:[#allocation3 + $0x10] sm:$0xff]  ;;  %v2839_v29 = vld [vmem:[#allocation3 + $0x18] sm:$0xff] }
 0x5f0   :  { %2914 = vst [vmem:[#allocation6 + $0x70] sm:$0xff] %v2882_v1  ;;  %2915 = vst [vmem:[#allocation6 + $0x78] sm:$0xff] %v2883_v21  ;;  %v3069_v35 = vadd.f32 %v3037_v53, %v3005_v3  ;;  %v3070_v6 = vadd.f32 %v3038_v49, %v3006_v26  ;;  %v3071_v32 = vadd.f32 %v3039_v50, %v3007_v17  ;;  %v2840_v1 = vld [vmem:[#allocation3 + $0x20] sm:$0xff]  ;;  %v3034_v21 = vld [vmem:[#allocation3 + $0x130] sm:$0xff] }
 0x5f1   :  { %v3072_v15 = vadd.f32 %v3040_v44, %v3008_v34  ;;  %v3073_v37 = vadd.f32 %v3041_v18, %v3009_v54  ;;  %v3074_v63 = vadd.f32 %v3042_v7, %v3010_v43  ;;  %v3075_v46 = vadd.f32 %v3043_v24, %v3011_v27  ;;  %3101 = vst [vmem:[#allocation6 + $0x140] sm:$0xff] %v3068_v52  ;;  %v3032_v58 = vld [vmem:[#allocation3 + $0x120] sm:$0xff]  ;;  %v3035_v18 = vld [vmem:[#allocation3 + $0x138] sm:$0xff] }
 0x5f2   :  { %3102 = vst [vmem:[#allocation6 + $0x148] sm:$0xff] %v3069_v35  ;;  %3103 = vst [vmem:[#allocation6 + $0x150] sm:$0xff] %v3070_v6  ;;  %v2804_v49 = vadd.f32 %v4554_v42, %v4491_v48  ;;  %v2805_v53 = vadd.f32 %v4554_v42, %v4494_v62  ;;  %v2806_v44 = vadd.f32 %v4554_v42, %v4497_v2  ;;  %v3028_v2 = vld [vmem:[#allocation3 + $0x100] sm:$0xff]  ;;  %v4943_v35 = vld [vmem:[#allocation20_spill] sm:$0xff] }
 0x5f3   :  { %3104 = vst [vmem:[#allocation6 + $0x158] sm:$0xff] %v3071_v32  ;;  %v2807_v50 = vadd.f32 %v4554_v42, %v4500_v8  ;;  %3105 = vst [vmem:[#allocation6 + $0x160] sm:$0xff] %v3072_v15  ;;  %v2808_v57 = vadd.f32 %v4554_v42, %v4503_v31  ;;  %v2809_v5 = vadd.f32 %v4554_v42, %v4506_v12  ;;  %v3033_v12 = vld [vmem:[#allocation3 + $0x128] sm:$0xff]  ;;  %v4945_v32 = vld [vmem:[#allocation33_spill] sm:$0xff] }
 0x5f4   :  { %3106 = vst [vmem:[#allocation6 + $0x168] sm:$0xff] %v3073_v37  ;;  %3107 = vst [vmem:[#allocation6 + $0x170] sm:$0xff] %v3074_v63  ;;  %v2810_v48 = vadd.f32 %v4554_v42, %v4509_v25  ;;  %v2811_v62 = vadd.f32 %v4554_v42, %v4512_v56  ;;  %v2868_v22 = vadd.f32 %v2836_v0, %v2804_v49  ;;  %v4947_v37 = vld [vmem:[#allocation30_spill] sm:$0xff] }
 0x5f5   :  { %3108 = vst [vmem:[#allocation6 + $0x178] sm:$0xff] %v3075_v46  ;;  %v2869_v8 = vadd.f32 %v2837_v40, %v2805_v53  ;;  %v2870_v30 = vadd.f32 %v2838_v45, %v2806_v44  ;;  %v2871_v13 = vadd.f32 %v2839_v29, %v2807_v50  ;;  %v2872_v55 = vadd.f32 %v2840_v1, %v2808_v57  ;;  %v2750_v19 = vpop.permute.xlu0 %2749  ;;  %v4946_v40 = vld [vmem:[#allocation32_spill] sm:$0xff]  ;;  %v2861_v45 = vld [vmem:[#allocation3 + $0xc8] sm:$0xff]  ;;  %v2862_v53 = vld [vmem:[#allocation3 + $0xd0] sm:$0xff] }
 0x5f6   :  { %v2873_v31 = vadd.f32 %v2841_v38, %v2809_v5  ;;  %v2874_v51 = vadd.f32 %v2842_v9, %v2810_v48  ;;  %v2875_v16 = vadd.f32 %v2843_v23, %v2811_v62  ;;  %2900 = vst [vmem:[#allocation6] sm:$0xff] %v2868_v22  ;;  %v2996_v25 = vadd.f32 %v4515_v39, %v4554_v42  ;;  %v4950_v38 = vld [vmem:[#allocation45_spill] sm:$0xff]  ;;  %v4951_v23 = vld [vmem:[#allocation42_spill] sm:$0xff]  ;;  %v2863_v44 = vld [vmem:[#allocation3 + $0xd8] sm:$0xff] }
 0x5f7   :  { %2901 = vst [vmem:[#allocation6 + $0x8] sm:$0xff] %v2869_v8  ;;  %2902 = vst [vmem:[#allocation6 + $0x10] sm:$0xff] %v2870_v30  ;;  %v2997_v56 = vadd.f32 %v4518_v36, %v4554_v42  ;;  %v2998_v7 = vadd.f32 %v4521_v10, %v4554_v42  ;;  %v2999_v24 = vadd.f32 %v4524_v11, %v4554_v42  ;;  %v2864_v50 = vld [vmem:[#allocation3 + $0xe0] sm:$0xff]  ;;  %v4952_v57 = vld [vmem:[#allocation38_spill] sm:$0xff] }
 0x5f8   :  { %2903 = vst [vmem:[#allocation6 + $0x18] sm:$0xff] %v2871_v13  ;;  %2904 = vst [vmem:[#allocation6 + $0x20] sm:$0xff] %v2872_v55  ;;  %v3000_v3 = vadd.f32 %v4527_v60, %v4554_v42  ;;  %v3001_v39 = vadd.f32 %v4530_v28, %v4554_v42  ;;  %v3002_v36 = vadd.f32 %v4533_v4, %v4554_v42  ;;  %v4953_v48 = vld [vmem:[#allocation52_spill] sm:$0xff]  ;;  %v4955_v22 = vld [vmem:[#allocation55_spill] sm:$0xff] }
 0x5f9   :  { %2905 = vst [vmem:[#allocation6 + $0x28] sm:$0xff] %v2873_v31  ;;  %2906 = vst [vmem:[#allocation6 + $0x30] sm:$0xff] %v2874_v51  ;;  %v3003_v10 = vadd.f32 %v4536_v61, %v4554_v42  ;;  %v3060_v26 = vadd.f32 %v3028_v2, %v2996_v25  ;;  %v3061_v17 = vadd.f32 %v3029_v59, %v2997_v56  ;;  %v4944_v42 = vld [vmem:[#allocation35_spill] sm:$0xff]  ;;  %v2802_v46 = vpop.permute.xlu0 %2801  ;;  %v4954_v2 = vld [vmem:[#allocation54_spill] sm:$0xff] }
 0x5fa   :  { %2907 = vst [vmem:[#allocation6 + $0x38] sm:$0xff] %v2875_v16  ;;  %v3062_v11 = vadd.f32 %v3030_v41, %v2998_v7  ;;  %v3063_v34 = vadd.f32 %v3031_v20, %v2999_v24  ;;  %v3064_v54 = vadd.f32 %v3032_v58, %v3000_v3  ;;  %v3065_v43 = vadd.f32 %v3033_v12, %v3001_v39  ;;  %v2865_v30 = vld [vmem:[#allocation3 + $0xe8] sm:$0xff]  ;;  %v2866_v13 = vld [vmem:[#allocation3 + $0xf0] sm:$0xff]  ;;  %v2867_v41 = vld [vmem:[#allocation3 + $0xf8] sm:$0xff]  ;;  %v4604_v39 = vpop.permute.xlu1 %2744 }
 0x5fb   :  { %v3066_v27 = vadd.f32 %v3034_v21, %v3002_v36  ;;  %v3067_v52 = vadd.f32 %v3035_v18, %v3003_v10  ;;  %3093 = vst [vmem:[#allocation6 + $0x100] sm:$0xff] %v3060_v26  ;;  %3094 = vst [vmem:[#allocation6 + $0x108] sm:$0xff] %v3061_v17  ;;  %v2776_v60 = vmul.f32 %v2750_v19, %v4161_v33  ;;  %v2860_v33 = vld [vmem:[#allocation3 + $0xc0] sm:$0xff]  ;;  %v3053_v25 = vld [vmem:[#allocation3 + $0x1c8] sm:$0xff] }
 0x5fc   :  { %3095 = vst [vmem:[#allocation6 + $0x110] sm:$0xff] %v3062_v11  ;;  %3096 = vst [vmem:[#allocation6 + $0x118] sm:$0xff] %v3063_v34  ;;  %v2777_v28 = vmul.f32 %v2750_v19, %v4910_v47  ;;  %v2778_v4 = vmul.f32 %v2750_v19, %v4911_v14  ;;  %v2779_v61 = vmul.f32 %v2750_v19, %v4943_v35  ;;  %v4948_v47 = vld [vmem:[#allocation49_spill] sm:$0xff]  ;;  %v4949_v14 = vld [vmem:[#allocation47_spill] sm:$0xff] }
 0x5fd   :  { %3097 = vst [vmem:[#allocation6 + $0x120] sm:$0xff] %v3064_v54  ;;  %3098 = vst [vmem:[#allocation6 + $0x128] sm:$0xff] %v3065_v43  ;;  %v2780_v6 = vmul.f32 %v2750_v19, %v4944_v42  ;;  %v2781_v0 = vmul.f32 %v2750_v19, %v4945_v32  ;;  %v2782_v15 = vmul.f32 %v2750_v19, %v4946_v40  ;;  %v3052_v18 = vld [vmem:[#allocation3 + $0x1c0] sm:$0xff]  ;;  %v3055_v36 = vld [vmem:[#allocation3 + $0x1d8] sm:$0xff] }
 0x5fe   :  { %3099 = vst [vmem:[#allocation6 + $0x130] sm:$0xff] %v3066_v27  ;;  %3100 = vst [vmem:[#allocation6 + $0x138] sm:$0xff] %v3067_v52  ;;  %v2783_v63 = vmul.f32 %v2750_v19, %v4947_v37  ;;  %v2988_v29 = vmul.f32 %v2750_v19, %v4948_v47  ;;  %v2989_v1 = vmul.f32 %v2750_v19, %v4949_v14  ;;  %v3056_v10 = vld [vmem:[#allocation3 + $0x1e0] sm:$0xff]  ;;  %v3057_v54 = vld [vmem:[#allocation3 + $0x1e8] sm:$0xff] }
 0x5ff   :  { %v2990_v9 = vmul.f32 %v2750_v19, %v4950_v38  ;;  %v2991_v49 = vmul.f32 %v2750_v19, %v4951_v23  ;;  %v2992_v5 = vmul.f32 %v2750_v19, %v4952_v57  ;;  %v2993_v62 = vmul.f32 %v2750_v19, %v4953_v48  ;;  %v3058_v43 = vld [vmem:[#allocation3 + $0x1f0] sm:$0xff]  ;;  %v3059_v27 = vld [vmem:[#allocation3 + $0x1f8] sm:$0xff]  ;;  %v4956_v47 = vld [vmem:[#allocation29_spill] sm:$0xff] }
 0x600   :  { %v2994_v59 = vmul.f32 %v2750_v19, %v4954_v2  ;;  %v2995_v8 = vmul.f32 %v2750_v19, %v4955_v22  ;;  %v2828_v20 = vadd.f32 %v2802_v46, %v2776_v60  ;;  %v2829_v58 = vadd.f32 %v2802_v46, %v2777_v28  ;;  %v3054_v19 = vld [vmem:[#allocation3 + $0x1d0] sm:$0xff]  ;;  %v4958_v38 = vld [vmem:[#allocation9_spill] sm:$0xff]  ;;  %v4963_v48 = vld [vmem:[#allocation34_spill] sm:$0xff]  ;;  %v2797_v2 = vpop.permute.xlu1 %2796 }
 0x601   :  { %v2830_v55 = vadd.f32 %v2802_v46, %v2778_v4  ;;  %v2831_v31 = vadd.f32 %v2802_v46, %v2779_v61  ;;  %v2832_v51 = vadd.f32 %v2802_v46, %v2780_v6  ;;  %v2833_v16 = vadd.f32 %v2802_v46, %v2781_v0  ;;  %v4957_v14 = vld [vmem:[#allocation11_spill] sm:$0xff]  ;;  %v2853_v22 = vld [vmem:[#allocation3 + $0x88] sm:$0xff] }
 0x602   :  { %v2834_v12 = vadd.f32 %v2802_v46, %v2782_v15  ;;  %v2835_v21 = vadd.f32 %v2802_v46, %v2783_v63  ;;  %v2892_v56 = vadd.f32 %v2860_v33, %v2828_v20  ;;  %v2893_v7 = vadd.f32 %v2861_v45, %v2829_v58  ;;  %v4962_v57 = vld [vmem:[#allocation23_spill] sm:$0xff]  ;;  %v4966_v20 = vld [vmem:[#allocation46_spill] sm:$0xff] }
 0x603   :  { %v2894_v24 = vadd.f32 %v2862_v53, %v2830_v55  ;;  %v2895_v3 = vadd.f32 %v2863_v44, %v2831_v31  ;;  %v2896_v26 = vadd.f32 %v2864_v50, %v2832_v51  ;;  %v2897_v17 = vadd.f32 %v2865_v30, %v2833_v16  ;;  %v4961_v44 = vld [vmem:[#allocation36_spill] sm:$0xff]  ;;  %v2854_v51 = vld [vmem:[#allocation3 + $0x90] sm:$0xff] }
 0x604   :  { %v2898_v11 = vadd.f32 %v2866_v13, %v2834_v12  ;;  %v2899_v34 = vadd.f32 %v2867_v41, %v2835_v21  ;;  %2924 = vst [vmem:[#allocation6 + $0xc0] sm:$0xff] %v2892_v56  ;;  %2925 = vst [vmem:[#allocation6 + $0xc8] sm:$0xff] %v2893_v7  ;;  %v3020_v52 = vadd.f32 %v2988_v29, %v2802_v46  ;;  %v4965_v13 = vld [vmem:[#allocation48_spill] sm:$0xff]  ;;  %v2856_v12 = vld [vmem:[#allocation3 + $0xa0] sm:$0xff] }
 0x605   :  { %2926 = vst [vmem:[#allocation6 + $0xd0] sm:$0xff] %v2894_v24  ;;  %2927 = vst [vmem:[#allocation6 + $0xd8] sm:$0xff] %v2895_v3  ;;  %v3021_v60 = vadd.f32 %v2989_v1, %v2802_v46  ;;  %v3022_v28 = vadd.f32 %v2990_v9, %v2802_v46  ;;  %v3023_v4 = vadd.f32 %v2991_v49, %v2802_v46  ;;  %v4959_v9 = vld [vmem:[#allocation10_spill] sm:$0xff]  ;;  %v4967_v55 = vld [vmem:[#allocation44_spill] sm:$0xff] }
 0x606   :  { %2928 = vst [vmem:[#allocation6 + $0xe0] sm:$0xff] %v2896_v26  ;;  %2929 = vst [vmem:[#allocation6 + $0xe8] sm:$0xff] %v2897_v17  ;;  %v3024_v35 = vadd.f32 %v2992_v5, %v2802_v46  ;;  %v3025_v61 = vadd.f32 %v2993_v62, %v2802_v46  ;;  %v3026_v42 = vadd.f32 %v2994_v59, %v2802_v46  ;;  %v4960_v49 = vld [vmem:[#allocation22_spill] sm:$0xff]  ;;  %v2852_v59 = vld [vmem:[#allocation3 + $0x80] sm:$0xff] }
 0x607   :  { %2930 = vst [vmem:[#allocation6 + $0xf0] sm:$0xff] %v2898_v11  ;;  %2931 = vst [vmem:[#allocation6 + $0xf8] sm:$0xff] %v2899_v34  ;;  %v3027_v6 = vadd.f32 %v2995_v8, %v2802_v46  ;;  %v3084_v32 = vadd.f32 %v3052_v18, %v3020_v52  ;;  %v3085_v0 = vadd.f32 %v3053_v25, %v3021_v60  ;;  %v4964_v8 = vld [vmem:[#allocation50_spill] sm:$0xff]  ;;  %v2855_v16 = vld [vmem:[#allocation3 + $0x98] sm:$0xff] }
 0x608   :  { %v3086_v40 = vadd.f32 %v3054_v19, %v3022_v28  ;;  %v3087_v15 = vadd.f32 %v3055_v36, %v3023_v4  ;;  %v3088_v37 = vadd.f32 %v3056_v10, %v3024_v35  ;;  %v3089_v63 = vadd.f32 %v3057_v54, %v3025_v61  ;;  %v4968_v21 = vld [vmem:[#allocation39_spill] sm:$0xff]  ;;  %v4969_v25 = vld [vmem:[#allocation37_spill] sm:$0xff]  ;;  %v2857_v36 = vld [vmem:[#allocation3 + $0xa8] sm:$0xff] }
 0x609   :  { %v3090_v33 = vadd.f32 %v3058_v43, %v3026_v42  ;;  %v3091_v45 = vadd.f32 %v3059_v27, %v3027_v6  ;;  %3117 = vst [vmem:[#allocation6 + $0x1c0] sm:$0xff] %v3084_v32  ;;  %3118 = vst [vmem:[#allocation6 + $0x1c8] sm:$0xff] %v3085_v0  ;;  %v2768_v29 = vmul.f32 %v4604_v39, %v4956_v47  ;;  %v4970_v7 = vld [vmem:[#allocation51_spill] sm:$0xff]  ;;  %v4971_v3 = vld [vmem:[#allocation53_spill] sm:$0xff] }
 0x60a   :  { %3119 = vst [vmem:[#allocation6 + $0x1d0] sm:$0xff] %v3086_v40  ;;  %3120 = vst [vmem:[#allocation6 + $0x1d8] sm:$0xff] %v3087_v15  ;;  %v2769_v1 = vmul.f32 %v4604_v39, %v4957_v14  ;;  %v2770_v46 = vmul.f32 %v4604_v39, %v4958_v38  ;;  %v2771_v23 = vmul.f32 %v4604_v39, %v4959_v9  ;;  %v2858_v10 = vld [vmem:[#allocation3 + $0xb0] sm:$0xff]  ;;  %v2859_v26 = vld [vmem:[#allocation3 + $0xb8] sm:$0xff] }
 0x60b   :  { %3121 = vst [vmem:[#allocation6 + $0x1e0] sm:$0xff] %v3088_v37  ;;  %3122 = vst [vmem:[#allocation6 + $0x1e8] sm:$0xff] %v3089_v63  ;;  %v2772_v53 = vmul.f32 %v4604_v39, %v4960_v49  ;;  %v2773_v50 = vmul.f32 %v4604_v39, %v4961_v44  ;;  %v2774_v5 = vmul.f32 %v4604_v39, %v4962_v57  ;;  %v3044_v28 = vld [vmem:[#allocation3 + $0x180] sm:$0xff]  ;;  %v3045_v4 = vld [vmem:[#allocation3 + $0x188] sm:$0xff] }
 0x60c   :  { %3123 = vst [vmem:[#allocation6 + $0x1f0] sm:$0xff] %v3090_v33  ;;  %3124 = vst [vmem:[#allocation6 + $0x1f8] sm:$0xff] %v3091_v45  ;;  %v2775_v62 = vmul.f32 %v4604_v39, %v4963_v48  ;;  %v2980_v30 = vmul.f32 %v4604_v39, %v4964_v8  ;;  %v2981_v41 = vmul.f32 %v4604_v39, %v4965_v13  ;;  %v3046_v32 = vld [vmem:[#allocation3 + $0x190] sm:$0xff]  ;;  %v3047_v0 = vld [vmem:[#allocation3 + $0x198] sm:$0xff] }
 0x60d   :  { %v2982_v58 = vmul.f32 %v4604_v39, %v4966_v20  ;;  %v2983_v31 = vmul.f32 %v4604_v39, %v4967_v55  ;;  %v2984_v18 = vmul.f32 %v4604_v39, %v4968_v21  ;;  %v2985_v56 = vmul.f32 %v4604_v39, %v4969_v25  ;;  %v3049_v33 = vld [vmem:[#allocation3 + $0x1a8] sm:$0xff]  ;;  %v3050_v45 = vld [vmem:[#allocation3 + $0x1b0] sm:$0xff]  ;;  %v3051_v47 = vld [vmem:[#allocation3 + $0x1b8] sm:$0xff] }
 0x60e   :  { %v2986_v24 = vmul.f32 %v4604_v39, %v4970_v7  ;;  %v2987_v19 = vmul.f32 %v4604_v39, %v4971_v3  ;;  %v2820_v17 = vadd.f32 %v2797_v2, %v2768_v29  ;;  %v2821_v11 = vadd.f32 %v2797_v2, %v2769_v1  ;;  %v3048_v39 = vld [vmem:[#allocation3 + $0x1a0] sm:$0xff] }
 0x60f   :  { %v2822_v34 = vadd.f32 %v2797_v2, %v2770_v46  ;;  %v2823_v54 = vadd.f32 %v2797_v2, %v2771_v23  ;;  %v2824_v43 = vadd.f32 %v2797_v2, %v2772_v53  ;;  %v2825_v27 = vadd.f32 %v2797_v2, %v2773_v50 }
 0x610   :  { %v2826_v52 = vadd.f32 %v2797_v2, %v2774_v5  ;;  %v2827_v60 = vadd.f32 %v2797_v2, %v2775_v62  ;;  %v2884_v35 = vadd.f32 %v2852_v59, %v2820_v17  ;;  %v2885_v61 = vadd.f32 %v2853_v22, %v2821_v11 }
 0x611   :  { %v2886_v42 = vadd.f32 %v2854_v51, %v2822_v34  ;;  %v2887_v6 = vadd.f32 %v2855_v16, %v2823_v54  ;;  %v2888_v40 = vadd.f32 %v2856_v12, %v2824_v43  ;;  %v2889_v15 = vadd.f32 %v2857_v36, %v2825_v27 }
 0x612   :  { %v2890_v37 = vadd.f32 %v2858_v10, %v2826_v52  ;;  %v2891_v63 = vadd.f32 %v2859_v26, %v2827_v60  ;;  %2916 = vst [vmem:[#allocation6 + $0x80] sm:$0xff] %v2884_v35  ;;  %2917 = vst [vmem:[#allocation6 + $0x88] sm:$0xff] %v2885_v61  ;;  %v3012_v29 = vadd.f32 %v2980_v30, %v2797_v2 }
 0x613   :  { %2918 = vst [vmem:[#allocation6 + $0x90] sm:$0xff] %v2886_v42  ;;  %2919 = vst [vmem:[#allocation6 + $0x98] sm:$0xff] %v2887_v6  ;;  %v3013_v14 = vadd.f32 %v2981_v41, %v2797_v2  ;;  %v3014_v1 = vadd.f32 %v2982_v58, %v2797_v2  ;;  %v3015_v38 = vadd.f32 %v2983_v31, %v2797_v2 }
 0x614   :  { %2920 = vst [vmem:[#allocation6 + $0xa0] sm:$0xff] %v2888_v40  ;;  %2921 = vst [vmem:[#allocation6 + $0xa8] sm:$0xff] %v2889_v15  ;;  %v3016_v46 = vadd.f32 %v2984_v18, %v2797_v2  ;;  %v3017_v9 = vadd.f32 %v2985_v56, %v2797_v2  ;;  %v3018_v23 = vadd.f32 %v2986_v24, %v2797_v2 }
 0x615   :  { %2922 = vst [vmem:[#allocation6 + $0xb0] sm:$0xff] %v2890_v37  ;;  %2923 = vst [vmem:[#allocation6 + $0xb8] sm:$0xff] %v2891_v63  ;;  %v3019_v49 = vadd.f32 %v2987_v19, %v2797_v2  ;;  %v3076_v53 = vadd.f32 %v3044_v28, %v3012_v29  ;;  %v3077_v44 = vadd.f32 %v3045_v4, %v3013_v14 }
 0x616   :  { %v3078_v50 = vadd.f32 %v3046_v32, %v3014_v1  ;;  %v3079_v57 = vadd.f32 %v3047_v0, %v3015_v38  ;;  %v3080_v5 = vadd.f32 %v3048_v39, %v3016_v46  ;;  %v3081_v48 = vadd.f32 %v3049_v33, %v3017_v9 }
 0x617   :  { %v3082_v62 = vadd.f32 %v3050_v45, %v3018_v23  ;;  %v3083_v59 = vadd.f32 %v3051_v47, %v3019_v49  ;;  %3109 = vst [vmem:[#allocation6 + $0x180] sm:$0xff] %v3076_v53  ;;  %3110 = vst [vmem:[#allocation6 + $0x188] sm:$0xff] %v3077_v44 }
 0x618   :  { %3111 = vst [vmem:[#allocation6 + $0x190] sm:$0xff] %v3078_v50  ;;  %3112 = vst [vmem:[#allocation6 + $0x198] sm:$0xff] %v3079_v57 }
 0x619   :  { %3113 = vst [vmem:[#allocation6 + $0x1a0] sm:$0xff] %v3080_v5  ;;  %3114 = vst [vmem:[#allocation6 + $0x1a8] sm:$0xff] %v3081_v48 }
 0x61a   :  { %3115 = vst [vmem:[#allocation6 + $0x1b0] sm:$0xff] %v3082_v62  ;;  %3116 = vst [vmem:[#allocation6 + $0x1b8] sm:$0xff] %v3083_v59 }
 0x61b   :  { %3261 = shalt.err (!%p3258_p9)
}
 0x61c   :  { %3136 = dma.vmem_to_hbm [thread:$0]  %s3131_s6, 8192, %s4651_s7, [#allocation5], %s3275_s27, %s3275_s27, %s3276_s28  }
 0x61d   :  { %3272 = dma.done.wait [#allocation5], 8192  }
 0x61e   :  { %3273 = vsyncadd [#allocation5], 4294959104 }
 0x61f   :  { %3140 = vsyncpa [#allocation4], 1 }
 0x620   :  { %3141 = vsyncpa [#allocation5], 1 }

</bundles_post_ra>
